<compile_context>
chip_gen: v5e
topology: v5e:2x2
jax: 0.10.0
libtpu: 0.0.40
codegen_flags: <defaults>
</compile_context>

<pallas_src>
import functools
import math

import jax
import jax.numpy as jnp
from jax.experimental import pallas as pl
from jax.experimental.pallas import tpu as pltpu

# -------------------- small synthetic configuration --------------------------
BLOCK_INPLANES = [8, 16, 32, 64]
LAYERS = [1, 1, 1, 1]
N_INPUT_CHANNELS = 3
CONV1_T_SIZE = 7
CONV1_T_STRIDE = 1
TEMPORAL_STRIDE = None          # model-level temporal_stride argument
EXPANSION = 1                   # BasicBlock.expansion
BN_EPS = 1e-5


def _round_up(x, m):
    return (x + m - 1) // m * m


# ============================ Pallas kernels =================================
# Fused (im2col) matmul + folded-BN affine [+ ReLU] [+ residual add] epilogue.
# a: (tm, K) bf16, b: (K, tn) bf16, s/t: (1, tn) f32, r: (tm, tn) bf16.
def _mm_bn_relu_kernel(a_ref, b_ref, s_ref, t_ref, o_ref):
    acc = jnp.dot(a_ref[...], b_ref[...], preferred_element_type=jnp.float32)
    y = acc * s_ref[...] + t_ref[...]
    o_ref[...] = jnp.maximum(y, 0.0).astype(o_ref.dtype)


def _mm_bn_kernel(a_ref, b_ref, s_ref, t_ref, o_ref):
    acc = jnp.dot(a_ref[...], b_ref[...], preferred_element_type=jnp.float32)
    o_ref[...] = (acc * s_ref[...] + t_ref[...]).astype(o_ref.dtype)


def _mm_bn_add_relu_kernel(a_ref, b_ref, s_ref, t_ref, r_ref, o_ref):
    acc = jnp.dot(a_ref[...], b_ref[...], preferred_element_type=jnp.float32)
    y = acc * s_ref[...] + t_ref[...] + r_ref[...].astype(jnp.float32)
    o_ref[...] = jnp.maximum(y, 0.0).astype(o_ref.dtype)


def _gap_kernel(x_ref, o_ref, *, inv_denom):
    # Global average pool: grid over spatial chunks ("arbitrary" reduction
    # axis), f32 sum accumulated in the resident output block.
    @pl.when(pl.program_id(0) == 0)
    def _():
        o_ref[...] = jnp.zeros_like(o_ref)

    o_ref[...] += jnp.sum(x_ref[...].astype(jnp.float32), axis=1)

    @pl.when(pl.program_id(0) == pl.num_programs(0) - 1)
    def _():
        o_ref[...] = o_ref[...] * inv_denom


# ============================ Pallas wrappers ================================
def _choose_tm(M):
    # Large tiles amortize per-step overhead; keep >=2 M tiles when M is large
    # enough so both v7x TensorCores get work (N is usually a single 128 tile).
    if M >= 1024:
        return 512
    if M >= 256:
        return 128
    if M >= 128:
        return 64
    return _round_up(max(M, 1), 16)


def fused_matmul(a, w, scale, shift, *, relu, residual=None):
    """(M,K)bf16 @ (K,Np)bf16 with BN affine (+ReLU) (+res add) epilogue.

    Returns (Mp, Np) bf16.  K is a single VMEM-resident block (K <= 640 here),
    so there is no reduction grid axis and no accumulator scratch.
    """
    M, K = a.shape
    Kw, Np = w.shape
    assert K == Kw and Np % 128 == 0
    tm = _choose_tm(M)
    tn = 128
    Mp = _round_up(M, tm)
    if Mp != M:
        a = jnp.pad(a, ((0, Mp - M), (0, 0)))

    in_specs = [
        pl.BlockSpec((tm, K), lambda i, j: (i, 0)),
        pl.BlockSpec((K, tn), lambda i, j: (0, j)),
        pl.BlockSpec((1, tn), lambda i, j: (0, j)),
        pl.BlockSpec((1, tn), lambda i, j: (0, j)),
    ]
    args = [a, w, scale, shift]
    if residual is not None:
        r = residual
        rM, rN = r.shape
        if (rM, rN) != (Mp, Np):
            r = jnp.pad(r, ((0, Mp - rM), (0, Np - rN)))
        in_specs.append(pl.BlockSpec((tm, tn), lambda i, j: (i, j)))
        args.append(r)
        kern = _mm_bn_add_relu_kernel      # residual path always ends in ReLU
    else:
        kern = _mm_bn_relu_kernel if relu else _mm_bn_kernel

    return pl.pallas_call(
        kern,
        out_shape=jax.ShapeDtypeStruct((Mp, Np), jnp.bfloat16),
        grid=(Mp // tm, Np // tn),
        in_specs=in_specs,
        out_specs=pl.BlockSpec((tm, tn), lambda i, j: (i, j)),
        compiler_params=pltpu.CompilerParams(
            dimension_semantics=("parallel", "parallel")),
    )(*args)


def conv_bn(x, cw, stride, padding, relu=True, residual=None):
    """Fused Conv3d(bias=False) + BatchNorm3d (+ReLU) (+residual add, ReLU).

    x: (N, D, H, W, Cin) bf16.  Returns (N, Do, Ho, Wo, Cout) bf16.
    """
    N, D, H, W, Cin = x.shape
    kd, kh, kw = cw['k']
    cout = cw['cout']
    Kp = cw['w'].shape[0]
    sd, sh, sw = stride
    pd, ph, pw = padding
    Do = (D + 2 * pd - kd) // sd + 1
    Ho = (H + 2 * ph - kh) // sh + 1
    Wo = (W + 2 * pw - kw) // sw + 1

    xp = x
    if pd or ph or pw:
        xp = jnp.pad(x, ((0, 0), (pd, pd), (ph, ph), (pw, pw), (0, 0)))

    # im2col (bf16).  TODO(synk): taps could be folded into the Pallas grid to
    # avoid materializing the kd*kh*kw-inflated matrix, but strided spatial
    # sampling is not expressible with blocked index_maps alone.
    patches = []
    for id_ in range(kd):
        for ih in range(kh):
            for iw in range(kw):
                patches.append(xp[:, id_:id_ + sd * Do:sd,
                                  ih:ih + sh * Ho:sh,
                                  iw:iw + sw * Wo:sw, :])
    K = kd * kh * kw * Cin
    if Kp > K:   # K padding folded into the single concatenate (zero tap)
        patches.append(jnp.zeros((N, Do, Ho, Wo, Kp - K), x.dtype))
    a = patches[0] if len(patches) == 1 else jnp.concatenate(patches, axis=-1)
    M = N * Do * Ho * Wo
    a = a.reshape(M, Kp)

    res2d = None
    if residual is not None:
        res2d = residual.reshape(M, residual.shape[-1])

    out2d = fused_matmul(a, cw['w'], cw['scale'], cw['shift'],
                         relu=relu, residual=res2d)
    return out2d[:M, :cout].reshape(N, Do, Ho, Wo, cout)


def maxpool3d(x, k, stride, padding):
    """MaxPool3d as a running maximum over the k^3 strided window views.

    Deliberately plain XLA (fused elementwise max): avoids writing/re-reading a
    27x-inflated stacked tensor through HBM, which dominated the old version.
    """
    N, D, H, W, C = x.shape
    sd, sh, sw = stride
    p = padding
    Do = (D + 2 * p - k) // sd + 1
    Ho = (H + 2 * p - k) // sh + 1
    Wo = (W + 2 * p - k) // sw + 1
    xp = jnp.pad(x, ((0, 0), (p, p), (p, p), (p, p), (0, 0)),
                 constant_values=-jnp.inf)
    out = None
    for id_ in range(k):
        for ih in range(k):
            for iw in range(k):
                win = xp[:, id_:id_ + sd * Do:sd,
                         ih:ih + sh * Ho:sh,
                         iw:iw + sw * Wo:sw, :]
                out = win if out is None else jnp.maximum(out, win)
    return out


def global_avgpool(x):
    """AdaptiveAvgPool3d((1,1,1)) + flatten, tiled over spatial chunks."""
    N, D, H, W, C = x.shape
    S = D * H * W
    x3 = x.reshape(N, S, C)
    ts = min(512, _round_up(S, 8))
    Sp = _round_up(S, ts)
    if Sp != S:
        x3 = jnp.pad(x3, ((0, 0), (0, Sp - S), (0, 0)))
    return pl.pallas_call(
        functools.partial(_gap_kernel, inv_denom=1.0 / S),
        out_shape=jax.ShapeDtypeStruct((N, C), jnp.float32),
        grid=(Sp // ts,),
        in_specs=[pl.BlockSpec((N, ts, C), lambda s: (0, s, 0))],
        out_specs=pl.BlockSpec((N, C), lambda s: (0, 0)),
        compiler_params=pltpu.CompilerParams(
            dimension_semantics=("arbitrary",)),
    )(x3)


# =========================== model definition ================================
def _kaiming_conv(key, cout, cin, kd, kh, kw):
    fan_out = cout * kd * kh * kw            # kaiming_normal_, mode='fan_out'
    std = math.sqrt(2.0 / fan_out)
    return (std * jax.random.normal(key, (cout, cin, kd, kh, kw))).astype(jnp.float32)


def _prep_conv_bn(key, cout, cin, kd, kh, kw):
    """Conv weight in matmul layout (bf16, K padded to 128, N padded to 128)
    plus the folded BatchNorm scale/shift (inference mode, PyTorch init)."""
    w = _kaiming_conv(key, cout, cin, kd, kh, kw)
    K = kd * kh * kw * cin
    Kp = _round_up(K, 128)
    Np = _round_up(cout, 128)
    wmat = jnp.transpose(w, (2, 3, 4, 1, 0)).reshape(K, cout)
    wmat = jnp.pad(wmat, ((0, Kp - K), (0, Np - cout))).astype(jnp.bfloat16)
    # BN init: gamma=1, beta=0, running_mean=0, running_var=1
    gamma = jnp.ones((cout,), jnp.float32)
    beta = jnp.zeros((cout,), jnp.float32)
    mean = jnp.zeros((cout,), jnp.float32)
    var = jnp.ones((cout,), jnp.float32)
    inv = gamma / jnp.sqrt(var + BN_EPS)
    scale = jnp.pad(inv, (0, Np - cout)).reshape(1, Np).astype(jnp.float32)
    shift = jnp.pad(beta - mean * inv, (0, Np - cout)).reshape(1, Np).astype(jnp.float32)
    return {'w': wmat, 'scale': scale, 'shift': shift,
            'cout': cout, 'cin': cin, 'k': (kd, kh, kw)}


def init_params(key):
    kit = iter(jax.random.split(key, 64))
    p = {}
    in_planes = BLOCK_INPLANES[0]
    n3d = 3 * in_planes * CONV1_T_SIZE * 7 * 7
    n2p1d = 3 * 7 * 7 + CONV1_T_SIZE * in_planes
    mid = n3d // n2p1d
    p['c1s'] = _prep_conv_bn(next(kit), mid, N_INPUT_CHANNELS, 1, 7, 7)
    p['c1t'] = _prep_conv_bn(next(kit), in_planes, mid, CONV1_T_SIZE, 1, 1)

    strides = [1, 2, 2, 2]
    layers = []
    for planes, nblocks, stride in zip(BLOCK_INPLANES, LAYERS, strides):
        ts_stage = TEMPORAL_STRIDE if TEMPORAL_STRIDE is not None else stride
        blocks = []
        for b in range(nblocks):
            s = stride if b == 0 else 1
            t = ts_stage if b == 0 else 1
            bp = {'s': s, 'ts': t}
            mid1 = (in_planes * planes * 27) // (in_planes * 9 + 3 * planes)
            bp['c1s'] = _prep_conv_bn(next(kit), mid1, in_planes, 1, 3, 3)
            bp['c1t'] = _prep_conv_bn(next(kit), planes, mid1, 3, 1, 1)
            mid2 = (planes * planes * 27) // (planes * 9 + 3 * planes)
            bp['c2s'] = _prep_conv_bn(next(kit), mid2, planes, 1, 3, 3)
            bp['c2t'] = _prep_conv_bn(next(kit), planes, mid2, 3, 1, 1)
            if b == 0 and (s != 1 or in_planes != planes * EXPANSION):
                # shortcut_type 'B': conv1x1x1(stride=(ts, s, s)) + BN
                bp['down'] = _prep_conv_bn(next(kit), planes * EXPANSION,
                                           in_planes, 1, 1, 1)
            blocks.append(bp)
            in_planes = planes * EXPANSION
        layers.append(blocks)
    p['layers'] = layers
    return p


def basic_block_forward(x, bp):
    s, t = bp['s'], bp['ts']
    out = conv_bn(x, bp['c1s'], (1, s, s), (0, 1, 1), relu=True)
    out = conv_bn(out, bp['c1t'], (t, 1, 1), (1, 0, 0), relu=True)
    out = conv_bn(out, bp['c2s'], (1, 1, 1), (0, 1, 1), relu=True)
    if 'down' in bp:
        res = conv_bn(x, bp['down'], (t, s, s), (0, 0, 0), relu=False)
    else:
        res = x
    # conv2_t + bn2_t + residual add + ReLU fused into one kernel epilogue
    return conv_bn(out, bp['c2t'], (1, 1, 1), (1, 0, 0),
                   relu=False, residual=res)


def resnet2p1d_forward(params, x_ncdhw):
    # NCDHW (PyTorch) -> NDHWC (kernel layout), bf16 activations (f32 math on
    # the MXU accumulator / epilogue inside the kernels).
    x = jnp.transpose(x_ncdhw, (0, 2, 3, 4, 1)).astype(jnp.bfloat16)
    # stem: (2+1)D factored 7x7x7, BN+ReLU fused into each conv
    x = conv_bn(x, params['c1s'], (1, 2, 2), (0, 3, 3), relu=True)
    x = conv_bn(x, params['c1t'], (CONV1_T_STRIDE, 1, 1),
                (CONV1_T_SIZE // 2, 0, 0), relu=True)
    # maxpool k=3, stride=(temporal_stride or 2, 2, 2), padding=1
    mp_td = TEMPORAL_STRIDE if TEMPORAL_STRIDE is not None else 2
    x = maxpool3d(x, 3, (mp_td, 2, 2), 1)
    # residual stages
    for blocks in params['layers']:
        for bp in blocks:
            x = basic_block_forward(x, bp)
    # AdaptiveAvgPool3d((1,1,1)) + flatten   (fc is never applied in forward())
    return global_avgpool(x)


if __name__ == "__main__":
    key = jax.random.PRNGKey(0)
    pkey, xkey = jax.random.split(key)
    params = init_params(pkey)
    # PyTorch-style input: (N, C, D, H, W)
    x = jax.random.normal(xkey, (2, 3, 8, 16, 16), jnp.float32)
    fwd = jax.jit(lambda inp: resnet2p1d_forward(params, inp))
    out = jax.block_until_ready(fwd(x))
    assert out.shape == (2, BLOCK_INPLANES[3] * EXPANSION), out.shape
    assert bool(jnp.all(jnp.isfinite(out)))
    print("KERNEL_OK")
</pallas_src>

<mosaic_0001>
module attributes {stable_mosaic.version = 11 : i64} {
  func.func @_mm_bn_relu_kernel(%arg0: i32, %arg1: i32, %arg2: memref<512x256xbf16, #tpu.memory_space<vmem>>, %arg3: memref<256x128xbf16, #tpu.memory_space<vmem>>, %arg4: memref<1x128xf32, #tpu.memory_space<vmem>>, %arg5: memref<1x128xf32, #tpu.memory_space<vmem>>, %arg6: memref<512x128xbf16, #tpu.memory_space<vmem>>) attributes {dimension_semantics = [#tpu.dimension_semantics<parallel>, #tpu.dimension_semantics<parallel>], iteration_bounds = array<i64: 2, 1>, scalar_prefetch = 0 : i64, scratch_operands = 0 : i64, tpu.core_type = #tpu.core_type<tc>, window_params = [{transform_indices = @transform_0, window_bounds = array<i64: 512, 256>}, {transform_indices = @transform_1, window_bounds = array<i64: 256, 128>}, {transform_indices = @transform_2, window_bounds = array<i64: 1, 128>}, {transform_indices = @transform_3, window_bounds = array<i64: 1, 128>}, {transform_indices = @transform_4, window_bounds = array<i64: 512, 128>}]} {
    %c0 = arith.constant 0 : index
    %c0_0 = arith.constant 0 : index
    %0 = vector.load %arg2[%c0, %c0_0] : memref<512x256xbf16, #tpu.memory_space<vmem>>, vector<512x256xbf16>
    %c0_1 = arith.constant 0 : index
    %c0_2 = arith.constant 0 : index
    %1 = vector.load %arg3[%c0_1, %c0_2] : memref<256x128xbf16, #tpu.memory_space<vmem>>, vector<256x128xbf16>
    %cst = arith.constant dense<0.000000e+00> : vector<512x128xf32>
    %2 = tpu.matmul %0, %1, %cst {dimension_numbers = #tpu.dot_dimension_numbers<[1], [0], [0], [1], [0, 0, 1, 1], [], []>} : vector<512x256xbf16>, vector<256x128xbf16>, vector<512x128xf32> -> vector<512x128xf32>
    %c0_3 = arith.constant 0 : index
    %c0_4 = arith.constant 0 : index
    %3 = vector.load %arg4[%c0_3, %c0_4] : memref<1x128xf32, #tpu.memory_space<vmem>>, vector<1x128xf32>
    %4 = vector.broadcast %3 : vector<1x128xf32> to vector<512x128xf32>
    %5 = arith.mulf %2, %4 : vector<512x128xf32>
    %c0_5 = arith.constant 0 : index
    %c0_6 = arith.constant 0 : index
    %6 = vector.load %arg5[%c0_5, %c0_6] : memref<1x128xf32, #tpu.memory_space<vmem>>, vector<1x128xf32>
    %7 = vector.broadcast %6 : vector<1x128xf32> to vector<512x128xf32>
    %8 = arith.addf %5, %7 : vector<512x128xf32>
    %cst_7 = arith.constant 0.000000e+00 : f32
    %9 = vector.broadcast %cst_7 : f32 to vector<512x128xf32>
    %10 = arith.maximumf %8, %9 : vector<512x128xf32>
    %11 = arith.truncf %10 : vector<512x128xf32> to vector<512x128xbf16>
    %c0_8 = arith.constant 0 : index
    %c0_9 = arith.constant 0 : index
    %12 = vector.load %arg6[%c0_8, %c0_9] : memref<512x128xbf16, #tpu.memory_space<vmem>>, vector<512x128xbf16>
    tpu.vector_store %arg6[%c0_8, %c0_9], %11 {strides = array<i32>} : memref<512x128xbf16, #tpu.memory_space<vmem>>, vector<512x128xbf16>,
    return
  }
  func.func @transform_0(%arg0: i32, %arg1: i32) -> (i32, i32) {
    %c0_i32 = arith.constant 0 : i32
    %c0_i32_0 = arith.constant 0 : i32
    return %arg0, %c0_i32 : i32, i32
  }
  func.func @transform_1(%arg0: i32, %arg1: i32) -> (i32, i32) {
    %c0_i32 = arith.constant 0 : i32
    %c0_i32_0 = arith.constant 0 : i32
    return %c0_i32, %arg1 : i32, i32
  }
  func.func @transform_2(%arg0: i32, %arg1: i32) -> (i32, i32) {
    %c0_i32 = arith.constant 0 : i32
    %c0_i32_0 = arith.constant 0 : i32
    return %c0_i32, %arg1 : i32, i32
  }
  func.func @transform_3(%arg0: i32, %arg1: i32) -> (i32, i32) {
    %c0_i32 = arith.constant 0 : i32
    %c0_i32_0 = arith.constant 0 : i32
    return %c0_i32, %arg1 : i32, i32
  }
  func.func @transform_4(%arg0: i32, %arg1: i32) -> (i32, i32) {
    %c0_i32 = arith.constant 0 : i32
    return %arg0, %arg1 : i32, i32
  }
}

module attributes {stable_mosaic.version = 11 : i64} {
  func.func @_mm_bn_relu_kernel(%arg0: i32, %arg1: i32, %arg2: memref<512x384xbf16, #tpu.memory_space<vmem>>, %arg3: memref<384x128xbf16, #tpu.memory_space<vmem>>, %arg4: memref<1x128xf32, #tpu.memory_space<vmem>>, %arg5: memref<1x128xf32, #tpu.memory_space<vmem>>, %arg6: memref<512x128xbf16, #tpu.memory_space<vmem>>) attributes {dimension_semantics = [#tpu.dimension_semantics<parallel>, #tpu.dimension_semantics<parallel>], iteration_bounds = array<i64: 2, 1>, scalar_prefetch = 0 : i64, scratch_operands = 0 : i64, tpu.core_type = #tpu.core_type<tc>, window_params = [{transform_indices = @transform_0, window_bounds = array<i64: 512, 384>}, {transform_indices = @transform_1, window_bounds = array<i64: 384, 128>}, {transform_indices = @transform_2, window_bounds = array<i64: 1, 128>}, {transform_indices = @transform_3, window_bounds = array<i64: 1, 128>}, {transform_indices = @transform_4, window_bounds = array<i64: 512, 128>}]} {
    %c0 = arith.constant 0 : index
    %c0_0 = arith.constant 0 : index
    %0 = vector.load %arg2[%c0, %c0_0] : memref<512x384xbf16, #tpu.memory_space<vmem>>, vector<512x384xbf16>
    %c0_1 = arith.constant 0 : index
    %c0_2 = arith.constant 0 : index
    %1 = vector.load %arg3[%c0_1, %c0_2] : memref<384x128xbf16, #tpu.memory_space<vmem>>, vector<384x128xbf16>
    %cst = arith.constant dense<0.000000e+00> : vector<512x128xf32>
    %2 = tpu.matmul %0, %1, %cst {dimension_numbers = #tpu.dot_dimension_numbers<[1], [0], [0], [1], [0, 0, 1, 1], [], []>} : vector<512x384xbf16>, vector<384x128xbf16>, vector<512x128xf32> -> vector<512x128xf32>
    %c0_3 = arith.constant 0 : index
    %c0_4 = arith.constant 0 : index
    %3 = vector.load %arg4[%c0_3, %c0_4] : memref<1x128xf32, #tpu.memory_space<vmem>>, vector<1x128xf32>
    %4 = vector.broadcast %3 : vector<1x128xf32> to vector<512x128xf32>
    %5 = arith.mulf %2, %4 : vector<512x128xf32>
    %c0_5 = arith.constant 0 : index
    %c0_6 = arith.constant 0 : index
    %6 = vector.load %arg5[%c0_5, %c0_6] : memref<1x128xf32, #tpu.memory_space<vmem>>, vector<1x128xf32>
    %7 = vector.broadcast %6 : vector<1x128xf32> to vector<512x128xf32>
    %8 = arith.addf %5, %7 : vector<512x128xf32>
    %cst_7 = arith.constant 0.000000e+00 : f32
    %9 = vector.broadcast %cst_7 : f32 to vector<512x128xf32>
    %10 = arith.maximumf %8, %9 : vector<512x128xf32>
    %11 = arith.truncf %10 : vector<512x128xf32> to vector<512x128xbf16>
    %c0_8 = arith.constant 0 : index
    %c0_9 = arith.constant 0 : index
    %12 = vector.load %arg6[%c0_8, %c0_9] : memref<512x128xbf16, #tpu.memory_space<vmem>>, vector<512x128xbf16>
    tpu.vector_store %arg6[%c0_8, %c0_9], %11 {strides = array<i32>} : memref<512x128xbf16, #tpu.memory_space<vmem>>, vector<512x128xbf16>,
    return
  }
  func.func @transform_0(%arg0: i32, %arg1: i32) -> (i32, i32) {
    %c0_i32 = arith.constant 0 : i32
    %c0_i32_0 = arith.constant 0 : i32
    return %arg0, %c0_i32 : i32, i32
  }
  func.func @transform_1(%arg0: i32, %arg1: i32) -> (i32, i32) {
    %c0_i32 = arith.constant 0 : i32
    %c0_i32_0 = arith.constant 0 : i32
    return %c0_i32, %arg1 : i32, i32
  }
  func.func @transform_2(%arg0: i32, %arg1: i32) -> (i32, i32) {
    %c0_i32 = arith.constant 0 : i32
    %c0_i32_0 = arith.constant 0 : i32
    return %c0_i32, %arg1 : i32, i32
  }
  func.func @transform_3(%arg0: i32, %arg1: i32) -> (i32, i32) {
    %c0_i32 = arith.constant 0 : i32
    %c0_i32_0 = arith.constant 0 : i32
    return %c0_i32, %arg1 : i32, i32
  }
  func.func @transform_4(%arg0: i32, %arg1: i32) -> (i32, i32) {
    %c0_i32 = arith.constant 0 : i32
    return %arg0, %arg1 : i32, i32
  }
}

module attributes {stable_mosaic.version = 11 : i64} {
  func.func @_mm_bn_relu_kernel(%arg0: i32, %arg1: i32, %arg2: memref<64x128xbf16, #tpu.memory_space<vmem>>, %arg3: memref<128x128xbf16, #tpu.memory_space<vmem>>, %arg4: memref<1x128xf32, #tpu.memory_space<vmem>>, %arg5: memref<1x128xf32, #tpu.memory_space<vmem>>, %arg6: memref<64x128xbf16, #tpu.memory_space<vmem>>) attributes {dimension_semantics = [#tpu.dimension_semantics<parallel>, #tpu.dimension_semantics<parallel>], iteration_bounds = array<i64: 2, 1>, scalar_prefetch = 0 : i64, scratch_operands = 0 : i64, tpu.core_type = #tpu.core_type<tc>, window_params = [{transform_indices = @transform_0, window_bounds = array<i64: 64, 128>}, {transform_indices = @transform_1, window_bounds = array<i64: 128, 128>}, {transform_indices = @transform_2, window_bounds = array<i64: 1, 128>}, {transform_indices = @transform_3, window_bounds = array<i64: 1, 128>}, {transform_indices = @transform_4, window_bounds = array<i64: 64, 128>}]} {
    %c0 = arith.constant 0 : index
    %c0_0 = arith.constant 0 : index
    %0 = vector.load %arg2[%c0, %c0_0] : memref<64x128xbf16, #tpu.memory_space<vmem>>, vector<64x128xbf16>
    %c0_1 = arith.constant 0 : index
    %c0_2 = arith.constant 0 : index
    %1 = vector.load %arg3[%c0_1, %c0_2] : memref<128x128xbf16, #tpu.memory_space<vmem>>, vector<128x128xbf16>
    %cst = arith.constant dense<0.000000e+00> : vector<64x128xf32>
    %2 = tpu.matmul %0, %1, %cst {dimension_numbers = #tpu.dot_dimension_numbers<[1], [0], [0], [1], [0, 0, 1, 1], [], []>} : vector<64x128xbf16>, vector<128x128xbf16>, vector<64x128xf32> -> vector<64x128xf32>
    %c0_3 = arith.constant 0 : index
    %c0_4 = arith.constant 0 : index
    %3 = vector.load %arg4[%c0_3, %c0_4] : memref<1x128xf32, #tpu.memory_space<vmem>>, vector<1x128xf32>
    %4 = vector.broadcast %3 : vector<1x128xf32> to vector<64x128xf32>
    %5 = arith.mulf %2, %4 : vector<64x128xf32>
    %c0_5 = arith.constant 0 : index
    %c0_6 = arith.constant 0 : index
    %6 = vector.load %arg5[%c0_5, %c0_6] : memref<1x128xf32, #tpu.memory_space<vmem>>, vector<1x128xf32>
    %7 = vector.broadcast %6 : vector<1x128xf32> to vector<64x128xf32>
    %8 = arith.addf %5, %7 : vector<64x128xf32>
    %cst_7 = arith.constant 0.000000e+00 : f32
    %9 = vector.broadcast %cst_7 : f32 to vector<64x128xf32>
    %10 = arith.maximumf %8, %9 : vector<64x128xf32>
    %11 = arith.truncf %10 : vector<64x128xf32> to vector<64x128xbf16>
    %c0_8 = arith.constant 0 : index
    %c0_9 = arith.constant 0 : index
    %12 = vector.load %arg6[%c0_8, %c0_9] : memref<64x128xbf16, #tpu.memory_space<vmem>>, vector<64x128xbf16>
    tpu.vector_store %arg6[%c0_8, %c0_9], %11 {strides = array<i32>} : memref<64x128xbf16, #tpu.memory_space<vmem>>, vector<64x128xbf16>,
    return
  }
  func.func @transform_0(%arg0: i32, %arg1: i32) -> (i32, i32) {
    %c0_i32 = arith.constant 0 : i32
    %c0_i32_0 = arith.constant 0 : i32
    return %arg0, %c0_i32 : i32, i32
  }
  func.func @transform_1(%arg0: i32, %arg1: i32) -> (i32, i32) {
    %c0_i32 = arith.constant 0 : i32
    %c0_i32_0 = arith.constant 0 : i32
    return %c0_i32, %arg1 : i32, i32
  }
  func.func @transform_2(%arg0: i32, %arg1: i32) -> (i32, i32) {
    %c0_i32 = arith.constant 0 : i32
    %c0_i32_0 = arith.constant 0 : i32
    return %c0_i32, %arg1 : i32, i32
  }
  func.func @transform_3(%arg0: i32, %arg1: i32) -> (i32, i32) {
    %c0_i32 = arith.constant 0 : i32
    %c0_i32_0 = arith.constant 0 : i32
    return %c0_i32, %arg1 : i32, i32
  }
  func.func @transform_4(%arg0: i32, %arg1: i32) -> (i32, i32) {
    %c0_i32 = arith.constant 0 : i32
    return %arg0, %arg1 : i32, i32
  }
}

module attributes {stable_mosaic.version = 11 : i64} {
  func.func @_mm_bn_add_relu_kernel(%arg0: i32, %arg1: i32, %arg2: memref<64x128xbf16, #tpu.memory_space<vmem>>, %arg3: memref<128x128xbf16, #tpu.memory_space<vmem>>, %arg4: memref<1x128xf32, #tpu.memory_space<vmem>>, %arg5: memref<1x128xf32, #tpu.memory_space<vmem>>, %arg6: memref<64x128xbf16, #tpu.memory_space<vmem>>, %arg7: memref<64x128xbf16, #tpu.memory_space<vmem>>) attributes {dimension_semantics = [#tpu.dimension_semantics<parallel>, #tpu.dimension_semantics<parallel>], iteration_bounds = array<i64: 2, 1>, scalar_prefetch = 0 : i64, scratch_operands = 0 : i64, tpu.core_type = #tpu.core_type<tc>, window_params = [{transform_indices = @transform_0, window_bounds = array<i64: 64, 128>}, {transform_indices = @transform_1, window_bounds = array<i64: 128, 128>}, {transform_indices = @transform_2, window_bounds = array<i64: 1, 128>}, {transform_indices = @transform_3, window_bounds = array<i64: 1, 128>}, {transform_indices = @transform_4, window_bounds = array<i64: 64, 128>}, {transform_indices = @transform_5, window_bounds = array<i64: 64, 128>}]} {
    %c0 = arith.constant 0 : index
    %c0_0 = arith.constant 0 : index
    %0 = vector.load %arg2[%c0, %c0_0] : memref<64x128xbf16, #tpu.memory_space<vmem>>, vector<64x128xbf16>
    %c0_1 = arith.constant 0 : index
    %c0_2 = arith.constant 0 : index
    %1 = vector.load %arg3[%c0_1, %c0_2] : memref<128x128xbf16, #tpu.memory_space<vmem>>, vector<128x128xbf16>
    %cst = arith.constant dense<0.000000e+00> : vector<64x128xf32>
    %2 = tpu.matmul %0, %1, %cst {dimension_numbers = #tpu.dot_dimension_numbers<[1], [0], [0], [1], [0, 0, 1, 1], [], []>} : vector<64x128xbf16>, vector<128x128xbf16>, vector<64x128xf32> -> vector<64x128xf32>
    %c0_3 = arith.constant 0 : index
    %c0_4 = arith.constant 0 : index
    %3 = vector.load %arg4[%c0_3, %c0_4] : memref<1x128xf32, #tpu.memory_space<vmem>>, vector<1x128xf32>
    %4 = vector.broadcast %3 : vector<1x128xf32> to vector<64x128xf32>
    %5 = arith.mulf %2, %4 : vector<64x128xf32>
    %c0_5 = arith.constant 0 : index
    %c0_6 = arith.constant 0 : index
    %6 = vector.load %arg5[%c0_5, %c0_6] : memref<1x128xf32, #tpu.memory_space<vmem>>, vector<1x128xf32>
    %7 = vector.broadcast %6 : vector<1x128xf32> to vector<64x128xf32>
    %8 = arith.addf %5, %7 : vector<64x128xf32>
    %c0_7 = arith.constant 0 : index
    %c0_8 = arith.constant 0 : index
    %9 = vector.load %arg6[%c0_7, %c0_8] : memref<64x128xbf16, #tpu.memory_space<vmem>>, vector<64x128xbf16>
    %10 = arith.extf %9 : vector<64x128xbf16> to vector<64x128xf32>
    %11 = arith.addf %8, %10 : vector<64x128xf32>
    %cst_9 = arith.constant 0.000000e+00 : f32
    %12 = vector.broadcast %cst_9 : f32 to vector<64x128xf32>
    %13 = arith.maximumf %11, %12 : vector<64x128xf32>
    %14 = arith.truncf %13 : vector<64x128xf32> to vector<64x128xbf16>
    %c0_10 = arith.constant 0 : index
    %c0_11 = arith.constant 0 : index
    %15 = vector.load %arg7[%c0_10, %c0_11] : memref<64x128xbf16, #tpu.memory_space<vmem>>, vector<64x128xbf16>
    tpu.vector_store %arg7[%c0_10, %c0_11], %14 {strides = array<i32>} : memref<64x128xbf16, #tpu.memory_space<vmem>>, vector<64x128xbf16>,
    return
  }
  func.func @transform_0(%arg0: i32, %arg1: i32) -> (i32, i32) {
    %c0_i32 = arith.constant 0 : i32
    %c0_i32_0 = arith.constant 0 : i32
    return %arg0, %c0_i32 : i32, i32
  }
  func.func @transform_1(%arg0: i32, %arg1: i32) -> (i32, i32) {
    %c0_i32 = arith.constant 0 : i32
    %c0_i32_0 = arith.constant 0 : i32
    return %c0_i32, %arg1 : i32, i32
  }
  func.func @transform_2(%arg0: i32, %arg1: i32) -> (i32, i32) {
    %c0_i32 = arith.constant 0 : i32
    %c0_i32_0 = arith.constant 0 : i32
    return %c0_i32, %arg1 : i32, i32
  }
  func.func @transform_3(%arg0: i32, %arg1: i32) -> (i32, i32) {
    %c0_i32 = arith.constant 0 : i32
    %c0_i32_0 = arith.constant 0 : i32
    return %c0_i32, %arg1 : i32, i32
  }
  func.func @transform_4(%arg0: i32, %arg1: i32) -> (i32, i32) {
    %c0_i32 = arith.constant 0 : i32
    return %arg0, %arg1 : i32, i32
  }
  func.func @transform_5(%arg0: i32, %arg1: i32) -> (i32, i32) {
    %c0_i32 = arith.constant 0 : i32
    return %arg0, %arg1 : i32, i32
  }
}

module attributes {stable_mosaic.version = 11 : i64} {
  func.func @_mm_bn_relu_kernel(%arg0: i32, %arg1: i32, %arg2: memref<32x128xbf16, #tpu.memory_space<vmem>>, %arg3: memref<128x128xbf16, #tpu.memory_space<vmem>>, %arg4: memref<1x128xf32, #tpu.memory_space<vmem>>, %arg5: memref<1x128xf32, #tpu.memory_space<vmem>>, %arg6: memref<32x128xbf16, #tpu.memory_space<vmem>>) attributes {dimension_semantics = [#tpu.dimension_semantics<parallel>, #tpu.dimension_semantics<parallel>], iteration_bounds = array<i64: 1, 1>, scalar_prefetch = 0 : i64, scratch_operands = 0 : i64, tpu.core_type = #tpu.core_type<tc>, window_params = [{transform_indices = @transform_0, window_bounds = array<i64: 32, 128>}, {transform_indices = @transform_1, window_bounds = array<i64: 128, 128>}, {transform_indices = @transform_2, window_bounds = array<i64: 1, 128>}, {transform_indices = @transform_3, window_bounds = array<i64: 1, 128>}, {transform_indices = @transform_4, window_bounds = array<i64: 32, 128>}]} {
    %c0 = arith.constant 0 : index
    %c0_0 = arith.constant 0 : index
    %0 = vector.load %arg2[%c0, %c0_0] : memref<32x128xbf16, #tpu.memory_space<vmem>>, vector<32x128xbf16>
    %c0_1 = arith.constant 0 : index
    %c0_2 = arith.constant 0 : index
    %1 = vector.load %arg3[%c0_1, %c0_2] : memref<128x128xbf16, #tpu.memory_space<vmem>>, vector<128x128xbf16>
    %cst = arith.constant dense<0.000000e+00> : vector<32x128xf32>
    %2 = tpu.matmul %0, %1, %cst {dimension_numbers = #tpu.dot_dimension_numbers<[1], [0], [0], [1], [0, 0, 1, 1], [], []>} : vector<32x128xbf16>, vector<128x128xbf16>, vector<32x128xf32> -> vector<32x128xf32>
    %c0_3 = arith.constant 0 : index
    %c0_4 = arith.constant 0 : index
    %3 = vector.load %arg4[%c0_3, %c0_4] : memref<1x128xf32, #tpu.memory_space<vmem>>, vector<1x128xf32>
    %4 = vector.broadcast %3 : vector<1x128xf32> to vector<32x128xf32>
    %5 = arith.mulf %2, %4 : vector<32x128xf32>
    %c0_5 = arith.constant 0 : index
    %c0_6 = arith.constant 0 : index
    %6 = vector.load %arg5[%c0_5, %c0_6] : memref<1x128xf32, #tpu.memory_space<vmem>>, vector<1x128xf32>
    %7 = vector.broadcast %6 : vector<1x128xf32> to vector<32x128xf32>
    %8 = arith.addf %5, %7 : vector<32x128xf32>
    %cst_7 = arith.constant 0.000000e+00 : f32
    %9 = vector.broadcast %cst_7 : f32 to vector<32x128xf32>
    %10 = arith.maximumf %8, %9 : vector<32x128xf32>
    %11 = arith.truncf %10 : vector<32x128xf32> to vector<32x128xbf16>
    %c0_8 = arith.constant 0 : index
    %c0_9 = arith.constant 0 : index
    %12 = vector.load %arg6[%c0_8, %c0_9] : memref<32x128xbf16, #tpu.memory_space<vmem>>, vector<32x128xbf16>
    tpu.vector_store %arg6[%c0_8, %c0_9], %11 {strides = array<i32>} : memref<32x128xbf16, #tpu.memory_space<vmem>>, vector<32x128xbf16>,
    return
  }
  func.func @transform_0(%arg0: i32, %arg1: i32) -> (i32, i32) {
    %c0_i32 = arith.constant 0 : i32
    %c0_i32_0 = arith.constant 0 : i32
    return %arg0, %c0_i32 : i32, i32
  }
  func.func @transform_1(%arg0: i32, %arg1: i32) -> (i32, i32) {
    %c0_i32 = arith.constant 0 : i32
    %c0_i32_0 = arith.constant 0 : i32
    return %c0_i32, %arg1 : i32, i32
  }
  func.func @transform_2(%arg0: i32, %arg1: i32) -> (i32, i32) {
    %c0_i32 = arith.constant 0 : i32
    %c0_i32_0 = arith.constant 0 : i32
    return %c0_i32, %arg1 : i32, i32
  }
  func.func @transform_3(%arg0: i32, %arg1: i32) -> (i32, i32) {
    %c0_i32 = arith.constant 0 : i32
    %c0_i32_0 = arith.constant 0 : i32
    return %c0_i32, %arg1 : i32, i32
  }
  func.func @transform_4(%arg0: i32, %arg1: i32) -> (i32, i32) {
    %c0_i32 = arith.constant 0 : i32
    return %arg0, %arg1 : i32, i32
  }
}

module attributes {stable_mosaic.version = 11 : i64} {
  func.func @_mm_bn_relu_kernel(%arg0: i32, %arg1: i32, %arg2: memref<16x128xbf16, #tpu.memory_space<vmem>>, %arg3: memref<128x128xbf16, #tpu.memory_space<vmem>>, %arg4: memref<1x128xf32, #tpu.memory_space<vmem>>, %arg5: memref<1x128xf32, #tpu.memory_space<vmem>>, %arg6: memref<16x128xbf16, #tpu.memory_space<vmem>>) attributes {dimension_semantics = [#tpu.dimension_semantics<parallel>, #tpu.dimension_semantics<parallel>], iteration_bounds = array<i64: 1, 1>, scalar_prefetch = 0 : i64, scratch_operands = 0 : i64, tpu.core_type = #tpu.core_type<tc>, window_params = [{transform_indices = @transform_0, window_bounds = array<i64: 16, 128>}, {transform_indices = @transform_1, window_bounds = array<i64: 128, 128>}, {transform_indices = @transform_2, window_bounds = array<i64: 1, 128>}, {transform_indices = @transform_3, window_bounds = array<i64: 1, 128>}, {transform_indices = @transform_4, window_bounds = array<i64: 16, 128>}]} {
    %c0 = arith.constant 0 : index
    %c0_0 = arith.constant 0 : index
    %0 = vector.load %arg2[%c0, %c0_0] : memref<16x128xbf16, #tpu.memory_space<vmem>>, vector<16x128xbf16>
    %c0_1 = arith.constant 0 : index
    %c0_2 = arith.constant 0 : index
    %1 = vector.load %arg3[%c0_1, %c0_2] : memref<128x128xbf16, #tpu.memory_space<vmem>>, vector<128x128xbf16>
    %cst = arith.constant dense<0.000000e+00> : vector<16x128xf32>
    %2 = tpu.matmul %0, %1, %cst {dimension_numbers = #tpu.dot_dimension_numbers<[1], [0], [0], [1], [0, 0, 1, 1], [], []>} : vector<16x128xbf16>, vector<128x128xbf16>, vector<16x128xf32> -> vector<16x128xf32>
    %c0_3 = arith.constant 0 : index
    %c0_4 = arith.constant 0 : index
    %3 = vector.load %arg4[%c0_3, %c0_4] : memref<1x128xf32, #tpu.memory_space<vmem>>, vector<1x128xf32>
    %4 = vector.broadcast %3 : vector<1x128xf32> to vector<16x128xf32>
    %5 = arith.mulf %2, %4 : vector<16x128xf32>
    %c0_5 = arith.constant 0 : index
    %c0_6 = arith.constant 0 : index
    %6 = vector.load %arg5[%c0_5, %c0_6] : memref<1x128xf32, #tpu.memory_space<vmem>>, vector<1x128xf32>
    %7 = vector.broadcast %6 : vector<1x128xf32> to vector<16x128xf32>
    %8 = arith.addf %5, %7 : vector<16x128xf32>
    %cst_7 = arith.constant 0.000000e+00 : f32
    %9 = vector.broadcast %cst_7 : f32 to vector<16x128xf32>
    %10 = arith.maximumf %8, %9 : vector<16x128xf32>
    %11 = arith.truncf %10 : vector<16x128xf32> to vector<16x128xbf16>
    %c0_8 = arith.constant 0 : index
    %c0_9 = arith.constant 0 : index
    %12 = vector.load %arg6[%c0_8, %c0_9] : memref<16x128xbf16, #tpu.memory_space<vmem>>, vector<16x128xbf16>
    tpu.vector_store %arg6[%c0_8, %c0_9], %11 {strides = array<i32>} : memref<16x128xbf16, #tpu.memory_space<vmem>>, vector<16x128xbf16>,
    return
  }
  func.func @transform_0(%arg0: i32, %arg1: i32) -> (i32, i32) {
    %c0_i32 = arith.constant 0 : i32
    %c0_i32_0 = arith.constant 0 : i32
    return %arg0, %c0_i32 : i32, i32
  }
  func.func @transform_1(%arg0: i32, %arg1: i32) -> (i32, i32) {
    %c0_i32 = arith.constant 0 : i32
    %c0_i32_0 = arith.constant 0 : i32
    return %c0_i32, %arg1 : i32, i32
  }
  func.func @transform_2(%arg0: i32, %arg1: i32) -> (i32, i32) {
    %c0_i32 = arith.constant 0 : i32
    %c0_i32_0 = arith.constant 0 : i32
    return %c0_i32, %arg1 : i32, i32
  }
  func.func @transform_3(%arg0: i32, %arg1: i32) -> (i32, i32) {
    %c0_i32 = arith.constant 0 : i32
    %c0_i32_0 = arith.constant 0 : i32
    return %c0_i32, %arg1 : i32, i32
  }
  func.func @transform_4(%arg0: i32, %arg1: i32) -> (i32, i32) {
    %c0_i32 = arith.constant 0 : i32
    return %arg0, %arg1 : i32, i32
  }
}

module attributes {stable_mosaic.version = 11 : i64} {
  func.func @_mm_bn_relu_kernel(%arg0: i32, %arg1: i32, %arg2: memref<16x256xbf16, #tpu.memory_space<vmem>>, %arg3: memref<256x128xbf16, #tpu.memory_space<vmem>>, %arg4: memref<1x128xf32, #tpu.memory_space<vmem>>, %arg5: memref<1x128xf32, #tpu.memory_space<vmem>>, %arg6: memref<16x128xbf16, #tpu.memory_space<vmem>>) attributes {dimension_semantics = [#tpu.dimension_semantics<parallel>, #tpu.dimension_semantics<parallel>], iteration_bounds = array<i64: 1, 1>, scalar_prefetch = 0 : i64, scratch_operands = 0 : i64, tpu.core_type = #tpu.core_type<tc>, window_params = [{transform_indices = @transform_0, window_bounds = array<i64: 16, 256>}, {transform_indices = @transform_1, window_bounds = array<i64: 256, 128>}, {transform_indices = @transform_2, window_bounds = array<i64: 1, 128>}, {transform_indices = @transform_3, window_bounds = array<i64: 1, 128>}, {transform_indices = @transform_4, window_bounds = array<i64: 16, 128>}]} {
    %c0 = arith.constant 0 : index
    %c0_0 = arith.constant 0 : index
    %0 = vector.load %arg2[%c0, %c0_0] : memref<16x256xbf16, #tpu.memory_space<vmem>>, vector<16x256xbf16>
    %c0_1 = arith.constant 0 : index
    %c0_2 = arith.constant 0 : index
    %1 = vector.load %arg3[%c0_1, %c0_2] : memref<256x128xbf16, #tpu.memory_space<vmem>>, vector<256x128xbf16>
    %cst = arith.constant dense<0.000000e+00> : vector<16x128xf32>
    %2 = tpu.matmul %0, %1, %cst {dimension_numbers = #tpu.dot_dimension_numbers<[1], [0], [0], [1], [0, 0, 1, 1], [], []>} : vector<16x256xbf16>, vector<256x128xbf16>, vector<16x128xf32> -> vector<16x128xf32>
    %c0_3 = arith.constant 0 : index
    %c0_4 = arith.constant 0 : index
    %3 = vector.load %arg4[%c0_3, %c0_4] : memref<1x128xf32, #tpu.memory_space<vmem>>, vector<1x128xf32>
    %4 = vector.broadcast %3 : vector<1x128xf32> to vector<16x128xf32>
    %5 = arith.mulf %2, %4 : vector<16x128xf32>
    %c0_5 = arith.constant 0 : index
    %c0_6 = arith.constant 0 : index
    %6 = vector.load %arg5[%c0_5, %c0_6] : memref<1x128xf32, #tpu.memory_space<vmem>>, vector<1x128xf32>
    %7 = vector.broadcast %6 : vector<1x128xf32> to vector<16x128xf32>
    %8 = arith.addf %5, %7 : vector<16x128xf32>
    %cst_7 = arith.constant 0.000000e+00 : f32
    %9 = vector.broadcast %cst_7 : f32 to vector<16x128xf32>
    %10 = arith.maximumf %8, %9 : vector<16x128xf32>
    %11 = arith.truncf %10 : vector<16x128xf32> to vector<16x128xbf16>
    %c0_8 = arith.constant 0 : index
    %c0_9 = arith.constant 0 : index
    %12 = vector.load %arg6[%c0_8, %c0_9] : memref<16x128xbf16, #tpu.memory_space<vmem>>, vector<16x128xbf16>
    tpu.vector_store %arg6[%c0_8, %c0_9], %11 {strides = array<i32>} : memref<16x128xbf16, #tpu.memory_space<vmem>>, vector<16x128xbf16>,
    return
  }
  func.func @transform_0(%arg0: i32, %arg1: i32) -> (i32, i32) {
    %c0_i32 = arith.constant 0 : i32
    %c0_i32_0 = arith.constant 0 : i32
    return %arg0, %c0_i32 : i32, i32
  }
  func.func @transform_1(%arg0: i32, %arg1: i32) -> (i32, i32) {
    %c0_i32 = arith.constant 0 : i32
    %c0_i32_0 = arith.constant 0 : i32
    return %c0_i32, %arg1 : i32, i32
  }
  func.func @transform_2(%arg0: i32, %arg1: i32) -> (i32, i32) {
    %c0_i32 = arith.constant 0 : i32
    %c0_i32_0 = arith.constant 0 : i32
    return %c0_i32, %arg1 : i32, i32
  }
  func.func @transform_3(%arg0: i32, %arg1: i32) -> (i32, i32) {
    %c0_i32 = arith.constant 0 : i32
    %c0_i32_0 = arith.constant 0 : i32
    return %c0_i32, %arg1 : i32, i32
  }
  func.func @transform_4(%arg0: i32, %arg1: i32) -> (i32, i32) {
    %c0_i32 = arith.constant 0 : i32
    return %arg0, %arg1 : i32, i32
  }
}

module attributes {stable_mosaic.version = 11 : i64} {
  func.func @_mm_bn_add_relu_kernel(%arg0: i32, %arg1: i32, %arg2: memref<16x128xbf16, #tpu.memory_space<vmem>>, %arg3: memref<128x128xbf16, #tpu.memory_space<vmem>>, %arg4: memref<1x128xf32, #tpu.memory_space<vmem>>, %arg5: memref<1x128xf32, #tpu.memory_space<vmem>>, %arg6: memref<16x128xbf16, #tpu.memory_space<vmem>>, %arg7: memref<16x128xbf16, #tpu.memory_space<vmem>>) attributes {dimension_semantics = [#tpu.dimension_semantics<parallel>, #tpu.dimension_semantics<parallel>], iteration_bounds = array<i64: 1, 1>, scalar_prefetch = 0 : i64, scratch_operands = 0 : i64, tpu.core_type = #tpu.core_type<tc>, window_params = [{transform_indices = @transform_0, window_bounds = array<i64: 16, 128>}, {transform_indices = @transform_1, window_bounds = array<i64: 128, 128>}, {transform_indices = @transform_2, window_bounds = array<i64: 1, 128>}, {transform_indices = @transform_3, window_bounds = array<i64: 1, 128>}, {transform_indices = @transform_4, window_bounds = array<i64: 16, 128>}, {transform_indices = @transform_5, window_bounds = array<i64: 16, 128>}]} {
    %c0 = arith.constant 0 : index
    %c0_0 = arith.constant 0 : index
    %0 = vector.load %arg2[%c0, %c0_0] : memref<16x128xbf16, #tpu.memory_space<vmem>>, vector<16x128xbf16>
    %c0_1 = arith.constant 0 : index
    %c0_2 = arith.constant 0 : index
    %1 = vector.load %arg3[%c0_1, %c0_2] : memref<128x128xbf16, #tpu.memory_space<vmem>>, vector<128x128xbf16>
    %cst = arith.constant dense<0.000000e+00> : vector<16x128xf32>
    %2 = tpu.matmul %0, %1, %cst {dimension_numbers = #tpu.dot_dimension_numbers<[1], [0], [0], [1], [0, 0, 1, 1], [], []>} : vector<16x128xbf16>, vector<128x128xbf16>, vector<16x128xf32> -> vector<16x128xf32>
    %c0_3 = arith.constant 0 : index
    %c0_4 = arith.constant 0 : index
    %3 = vector.load %arg4[%c0_3, %c0_4] : memref<1x128xf32, #tpu.memory_space<vmem>>, vector<1x128xf32>
    %4 = vector.broadcast %3 : vector<1x128xf32> to vector<16x128xf32>
    %5 = arith.mulf %2, %4 : vector<16x128xf32>
    %c0_5 = arith.constant 0 : index
    %c0_6 = arith.constant 0 : index
    %6 = vector.load %arg5[%c0_5, %c0_6] : memref<1x128xf32, #tpu.memory_space<vmem>>, vector<1x128xf32>
    %7 = vector.broadcast %6 : vector<1x128xf32> to vector<16x128xf32>
    %8 = arith.addf %5, %7 : vector<16x128xf32>
    %c0_7 = arith.constant 0 : index
    %c0_8 = arith.constant 0 : index
    %9 = vector.load %arg6[%c0_7, %c0_8] : memref<16x128xbf16, #tpu.memory_space<vmem>>, vector<16x128xbf16>
    %10 = arith.extf %9 : vector<16x128xbf16> to vector<16x128xf32>
    %11 = arith.addf %8, %10 : vector<16x128xf32>
    %cst_9 = arith.constant 0.000000e+00 : f32
    %12 = vector.broadcast %cst_9 : f32 to vector<16x128xf32>
    %13 = arith.maximumf %11, %12 : vector<16x128xf32>
    %14 = arith.truncf %13 : vector<16x128xf32> to vector<16x128xbf16>
    %c0_10 = arith.constant 0 : index
    %c0_11 = arith.constant 0 : index
    %15 = vector.load %arg7[%c0_10, %c0_11] : memref<16x128xbf16, #tpu.memory_space<vmem>>, vector<16x128xbf16>
    tpu.vector_store %arg7[%c0_10, %c0_11], %14 {strides = array<i32>} : memref<16x128xbf16, #tpu.memory_space<vmem>>, vector<16x128xbf16>,
    return
  }
  func.func @transform_0(%arg0: i32, %arg1: i32) -> (i32, i32) {
    %c0_i32 = arith.constant 0 : i32
    %c0_i32_0 = arith.constant 0 : i32
    return %arg0, %c0_i32 : i32, i32
  }
  func.func @transform_1(%arg0: i32, %arg1: i32) -> (i32, i32) {
    %c0_i32 = arith.constant 0 : i32
    %c0_i32_0 = arith.constant 0 : i32
    return %c0_i32, %arg1 : i32, i32
  }
  func.func @transform_2(%arg0: i32, %arg1: i32) -> (i32, i32) {
    %c0_i32 = arith.constant 0 : i32
    %c0_i32_0 = arith.constant 0 : i32
    return %c0_i32, %arg1 : i32, i32
  }
  func.func @transform_3(%arg0: i32, %arg1: i32) -> (i32, i32) {
    %c0_i32 = arith.constant 0 : i32
    %c0_i32_0 = arith.constant 0 : i32
    return %c0_i32, %arg1 : i32, i32
  }
  func.func @transform_4(%arg0: i32, %arg1: i32) -> (i32, i32) {
    %c0_i32 = arith.constant 0 : i32
    return %arg0, %arg1 : i32, i32
  }
  func.func @transform_5(%arg0: i32, %arg1: i32) -> (i32, i32) {
    %c0_i32 = arith.constant 0 : i32
    return %arg0, %arg1 : i32, i32
  }
}

module attributes {stable_mosaic.version = 11 : i64} {
  func.func @_mm_bn_kernel(%arg0: i32, %arg1: i32, %arg2: memref<16x128xbf16, #tpu.memory_space<vmem>>, %arg3: memref<128x128xbf16, #tpu.memory_space<vmem>>, %arg4: memref<1x128xf32, #tpu.memory_space<vmem>>, %arg5: memref<1x128xf32, #tpu.memory_space<vmem>>, %arg6: memref<16x128xbf16, #tpu.memory_space<vmem>>) attributes {dimension_semantics = [#tpu.dimension_semantics<parallel>, #tpu.dimension_semantics<parallel>], iteration_bounds = array<i64: 1, 1>, scalar_prefetch = 0 : i64, scratch_operands = 0 : i64, tpu.core_type = #tpu.core_type<tc>, window_params = [{transform_indices = @transform_0, window_bounds = array<i64: 16, 128>}, {transform_indices = @transform_1, window_bounds = array<i64: 128, 128>}, {transform_indices = @transform_2, window_bounds = array<i64: 1, 128>}, {transform_indices = @transform_3, window_bounds = array<i64: 1, 128>}, {transform_indices = @transform_4, window_bounds = array<i64: 16, 128>}]} {
    %c0 = arith.constant 0 : index
    %c0_0 = arith.constant 0 : index
    %0 = vector.load %arg2[%c0, %c0_0] : memref<16x128xbf16, #tpu.memory_space<vmem>>, vector<16x128xbf16>
    %c0_1 = arith.constant 0 : index
    %c0_2 = arith.constant 0 : index
    %1 = vector.load %arg3[%c0_1, %c0_2] : memref<128x128xbf16, #tpu.memory_space<vmem>>, vector<128x128xbf16>
    %cst = arith.constant dense<0.000000e+00> : vector<16x128xf32>
    %2 = tpu.matmul %0, %1, %cst {dimension_numbers = #tpu.dot_dimension_numbers<[1], [0], [0], [1], [0, 0, 1, 1], [], []>} : vector<16x128xbf16>, vector<128x128xbf16>, vector<16x128xf32> -> vector<16x128xf32>
    %c0_3 = arith.constant 0 : index
    %c0_4 = arith.constant 0 : index
    %3 = vector.load %arg4[%c0_3, %c0_4] : memref<1x128xf32, #tpu.memory_space<vmem>>, vector<1x128xf32>
    %4 = vector.broadcast %3 : vector<1x128xf32> to vector<16x128xf32>
    %5 = arith.mulf %2, %4 : vector<16x128xf32>
    %c0_5 = arith.constant 0 : index
    %c0_6 = arith.constant 0 : index
    %6 = vector.load %arg5[%c0_5, %c0_6] : memref<1x128xf32, #tpu.memory_space<vmem>>, vector<1x128xf32>
    %7 = vector.broadcast %6 : vector<1x128xf32> to vector<16x128xf32>
    %8 = arith.addf %5, %7 : vector<16x128xf32>
    %9 = arith.truncf %8 : vector<16x128xf32> to vector<16x128xbf16>
    %c0_7 = arith.constant 0 : index
    %c0_8 = arith.constant 0 : index
    %10 = vector.load %arg6[%c0_7, %c0_8] : memref<16x128xbf16, #tpu.memory_space<vmem>>, vector<16x128xbf16>
    tpu.vector_store %arg6[%c0_7, %c0_8], %9 {strides = array<i32>} : memref<16x128xbf16, #tpu.memory_space<vmem>>, vector<16x128xbf16>,
    return
  }
  func.func @transform_0(%arg0: i32, %arg1: i32) -> (i32, i32) {
    %c0_i32 = arith.constant 0 : i32
    %c0_i32_0 = arith.constant 0 : i32
    return %arg0, %c0_i32 : i32, i32
  }
  func.func @transform_1(%arg0: i32, %arg1: i32) -> (i32, i32) {
    %c0_i32 = arith.constant 0 : i32
    %c0_i32_0 = arith.constant 0 : i32
    return %c0_i32, %arg1 : i32, i32
  }
  func.func @transform_2(%arg0: i32, %arg1: i32) -> (i32, i32) {
    %c0_i32 = arith.constant 0 : i32
    %c0_i32_0 = arith.constant 0 : i32
    return %c0_i32, %arg1 : i32, i32
  }
  func.func @transform_3(%arg0: i32, %arg1: i32) -> (i32, i32) {
    %c0_i32 = arith.constant 0 : i32
    %c0_i32_0 = arith.constant 0 : i32
    return %c0_i32, %arg1 : i32, i32
  }
  func.func @transform_4(%arg0: i32, %arg1: i32) -> (i32, i32) {
    %c0_i32 = arith.constant 0 : i32
    return %arg0, %arg1 : i32, i32
  }
}

module attributes {stable_mosaic.version = 11 : i64} {
  func.func @_mm_bn_relu_kernel(%arg0: i32, %arg1: i32, %arg2: memref<16x384xbf16, #tpu.memory_space<vmem>>, %arg3: memref<384x128xbf16, #tpu.memory_space<vmem>>, %arg4: memref<1x128xf32, #tpu.memory_space<vmem>>, %arg5: memref<1x128xf32, #tpu.memory_space<vmem>>, %arg6: memref<16x128xbf16, #tpu.memory_space<vmem>>) attributes {dimension_semantics = [#tpu.dimension_semantics<parallel>, #tpu.dimension_semantics<parallel>], iteration_bounds = array<i64: 1, 1>, scalar_prefetch = 0 : i64, scratch_operands = 0 : i64, tpu.core_type = #tpu.core_type<tc>, window_params = [{transform_indices = @transform_0, window_bounds = array<i64: 16, 384>}, {transform_indices = @transform_1, window_bounds = array<i64: 384, 128>}, {transform_indices = @transform_2, window_bounds = array<i64: 1, 128>}, {transform_indices = @transform_3, window_bounds = array<i64: 1, 128>}, {transform_indices = @transform_4, window_bounds = array<i64: 16, 128>}]} {
    %c0 = arith.constant 0 : index
    %c0_0 = arith.constant 0 : index
    %0 = vector.load %arg2[%c0, %c0_0] : memref<16x384xbf16, #tpu.memory_space<vmem>>, vector<16x384xbf16>
    %c0_1 = arith.constant 0 : index
    %c0_2 = arith.constant 0 : index
    %1 = vector.load %arg3[%c0_1, %c0_2] : memref<384x128xbf16, #tpu.memory_space<vmem>>, vector<384x128xbf16>
    %cst = arith.constant dense<0.000000e+00> : vector<16x128xf32>
    %2 = tpu.matmul %0, %1, %cst {dimension_numbers = #tpu.dot_dimension_numbers<[1], [0], [0], [1], [0, 0, 1, 1], [], []>} : vector<16x384xbf16>, vector<384x128xbf16>, vector<16x128xf32> -> vector<16x128xf32>
    %c0_3 = arith.constant 0 : index
    %c0_4 = arith.constant 0 : index
    %3 = vector.load %arg4[%c0_3, %c0_4] : memref<1x128xf32, #tpu.memory_space<vmem>>, vector<1x128xf32>
    %4 = vector.broadcast %3 : vector<1x128xf32> to vector<16x128xf32>
    %5 = arith.mulf %2, %4 : vector<16x128xf32>
    %c0_5 = arith.constant 0 : index
    %c0_6 = arith.constant 0 : index
    %6 = vector.load %arg5[%c0_5, %c0_6] : memref<1x128xf32, #tpu.memory_space<vmem>>, vector<1x128xf32>
    %7 = vector.broadcast %6 : vector<1x128xf32> to vector<16x128xf32>
    %8 = arith.addf %5, %7 : vector<16x128xf32>
    %cst_7 = arith.constant 0.000000e+00 : f32
    %9 = vector.broadcast %cst_7 : f32 to vector<16x128xf32>
    %10 = arith.maximumf %8, %9 : vector<16x128xf32>
    %11 = arith.truncf %10 : vector<16x128xf32> to vector<16x128xbf16>
    %c0_8 = arith.constant 0 : index
    %c0_9 = arith.constant 0 : index
    %12 = vector.load %arg6[%c0_8, %c0_9] : memref<16x128xbf16, #tpu.memory_space<vmem>>, vector<16x128xbf16>
    tpu.vector_store %arg6[%c0_8, %c0_9], %11 {strides = array<i32>} : memref<16x128xbf16, #tpu.memory_space<vmem>>, vector<16x128xbf16>,
    return
  }
  func.func @transform_0(%arg0: i32, %arg1: i32) -> (i32, i32) {
    %c0_i32 = arith.constant 0 : i32
    %c0_i32_0 = arith.constant 0 : i32
    return %arg0, %c0_i32 : i32, i32
  }
  func.func @transform_1(%arg0: i32, %arg1: i32) -> (i32, i32) {
    %c0_i32 = arith.constant 0 : i32
    %c0_i32_0 = arith.constant 0 : i32
    return %c0_i32, %arg1 : i32, i32
  }
  func.func @transform_2(%arg0: i32, %arg1: i32) -> (i32, i32) {
    %c0_i32 = arith.constant 0 : i32
    %c0_i32_0 = arith.constant 0 : i32
    return %c0_i32, %arg1 : i32, i32
  }
  func.func @transform_3(%arg0: i32, %arg1: i32) -> (i32, i32) {
    %c0_i32 = arith.constant 0 : i32
    %c0_i32_0 = arith.constant 0 : i32
    return %c0_i32, %arg1 : i32, i32
  }
  func.func @transform_4(%arg0: i32, %arg1: i32) -> (i32, i32) {
    %c0_i32 = arith.constant 0 : i32
    return %arg0, %arg1 : i32, i32
  }
}

module attributes {stable_mosaic.version = 11 : i64} {
  func.func @_mm_bn_add_relu_kernel(%arg0: i32, %arg1: i32, %arg2: memref<16x256xbf16, #tpu.memory_space<vmem>>, %arg3: memref<256x128xbf16, #tpu.memory_space<vmem>>, %arg4: memref<1x128xf32, #tpu.memory_space<vmem>>, %arg5: memref<1x128xf32, #tpu.memory_space<vmem>>, %arg6: memref<16x128xbf16, #tpu.memory_space<vmem>>, %arg7: memref<16x128xbf16, #tpu.memory_space<vmem>>) attributes {dimension_semantics = [#tpu.dimension_semantics<parallel>, #tpu.dimension_semantics<parallel>], iteration_bounds = array<i64: 1, 1>, scalar_prefetch = 0 : i64, scratch_operands = 0 : i64, tpu.core_type = #tpu.core_type<tc>, window_params = [{transform_indices = @transform_0, window_bounds = array<i64: 16, 256>}, {transform_indices = @transform_1, window_bounds = array<i64: 256, 128>}, {transform_indices = @transform_2, window_bounds = array<i64: 1, 128>}, {transform_indices = @transform_3, window_bounds = array<i64: 1, 128>}, {transform_indices = @transform_4, window_bounds = array<i64: 16, 128>}, {transform_indices = @transform_5, window_bounds = array<i64: 16, 128>}]} {
    %c0 = arith.constant 0 : index
    %c0_0 = arith.constant 0 : index
    %0 = vector.load %arg2[%c0, %c0_0] : memref<16x256xbf16, #tpu.memory_space<vmem>>, vector<16x256xbf16>
    %c0_1 = arith.constant 0 : index
    %c0_2 = arith.constant 0 : index
    %1 = vector.load %arg3[%c0_1, %c0_2] : memref<256x128xbf16, #tpu.memory_space<vmem>>, vector<256x128xbf16>
    %cst = arith.constant dense<0.000000e+00> : vector<16x128xf32>
    %2 = tpu.matmul %0, %1, %cst {dimension_numbers = #tpu.dot_dimension_numbers<[1], [0], [0], [1], [0, 0, 1, 1], [], []>} : vector<16x256xbf16>, vector<256x128xbf16>, vector<16x128xf32> -> vector<16x128xf32>
    %c0_3 = arith.constant 0 : index
    %c0_4 = arith.constant 0 : index
    %3 = vector.load %arg4[%c0_3, %c0_4] : memref<1x128xf32, #tpu.memory_space<vmem>>, vector<1x128xf32>
    %4 = vector.broadcast %3 : vector<1x128xf32> to vector<16x128xf32>
    %5 = arith.mulf %2, %4 : vector<16x128xf32>
    %c0_5 = arith.constant 0 : index
    %c0_6 = arith.constant 0 : index
    %6 = vector.load %arg5[%c0_5, %c0_6] : memref<1x128xf32, #tpu.memory_space<vmem>>, vector<1x128xf32>
    %7 = vector.broadcast %6 : vector<1x128xf32> to vector<16x128xf32>
    %8 = arith.addf %5, %7 : vector<16x128xf32>
    %c0_7 = arith.constant 0 : index
    %c0_8 = arith.constant 0 : index
    %9 = vector.load %arg6[%c0_7, %c0_8] : memref<16x128xbf16, #tpu.memory_space<vmem>>, vector<16x128xbf16>
    %10 = arith.extf %9 : vector<16x128xbf16> to vector<16x128xf32>
    %11 = arith.addf %8, %10 : vector<16x128xf32>
    %cst_9 = arith.constant 0.000000e+00 : f32
    %12 = vector.broadcast %cst_9 : f32 to vector<16x128xf32>
    %13 = arith.maximumf %11, %12 : vector<16x128xf32>
    %14 = arith.truncf %13 : vector<16x128xf32> to vector<16x128xbf16>
    %c0_10 = arith.constant 0 : index
    %c0_11 = arith.constant 0 : index
    %15 = vector.load %arg7[%c0_10, %c0_11] : memref<16x128xbf16, #tpu.memory_space<vmem>>, vector<16x128xbf16>
    tpu.vector_store %arg7[%c0_10, %c0_11], %14 {strides = array<i32>} : memref<16x128xbf16, #tpu.memory_space<vmem>>, vector<16x128xbf16>,
    return
  }
  func.func @transform_0(%arg0: i32, %arg1: i32) -> (i32, i32) {
    %c0_i32 = arith.constant 0 : i32
    %c0_i32_0 = arith.constant 0 : i32
    return %arg0, %c0_i32 : i32, i32
  }
  func.func @transform_1(%arg0: i32, %arg1: i32) -> (i32, i32) {
    %c0_i32 = arith.constant 0 : i32
    %c0_i32_0 = arith.constant 0 : i32
    return %c0_i32, %arg1 : i32, i32
  }
  func.func @transform_2(%arg0: i32, %arg1: i32) -> (i32, i32) {
    %c0_i32 = arith.constant 0 : i32
    %c0_i32_0 = arith.constant 0 : i32
    return %c0_i32, %arg1 : i32, i32
  }
  func.func @transform_3(%arg0: i32, %arg1: i32) -> (i32, i32) {
    %c0_i32 = arith.constant 0 : i32
    %c0_i32_0 = arith.constant 0 : i32
    return %c0_i32, %arg1 : i32, i32
  }
  func.func @transform_4(%arg0: i32, %arg1: i32) -> (i32, i32) {
    %c0_i32 = arith.constant 0 : i32
    return %arg0, %arg1 : i32, i32
  }
  func.func @transform_5(%arg0: i32, %arg1: i32) -> (i32, i32) {
    %c0_i32 = arith.constant 0 : i32
    return %arg0, %arg1 : i32, i32
  }
}

module attributes {stable_mosaic.version = 11 : i64} {
  func.func @_mm_bn_relu_kernel(%arg0: i32, %arg1: i32, %arg2: memref<16x640xbf16, #tpu.memory_space<vmem>>, %arg3: memref<640x128xbf16, #tpu.memory_space<vmem>>, %arg4: memref<1x128xf32, #tpu.memory_space<vmem>>, %arg5: memref<1x128xf32, #tpu.memory_space<vmem>>, %arg6: memref<16x128xbf16, #tpu.memory_space<vmem>>) attributes {dimension_semantics = [#tpu.dimension_semantics<parallel>, #tpu.dimension_semantics<parallel>], iteration_bounds = array<i64: 1, 2>, scalar_prefetch = 0 : i64, scratch_operands = 0 : i64, tpu.core_type = #tpu.core_type<tc>, window_params = [{transform_indices = @transform_0, window_bounds = array<i64: 16, 640>}, {transform_indices = @transform_1, window_bounds = array<i64: 640, 128>}, {transform_indices = @transform_2, window_bounds = array<i64: 1, 128>}, {transform_indices = @transform_3, window_bounds = array<i64: 1, 128>}, {transform_indices = @transform_4, window_bounds = array<i64: 16, 128>}]} {
    %c0 = arith.constant 0 : index
    %c0_0 = arith.constant 0 : index
    %0 = vector.load %arg2[%c0, %c0_0] : memref<16x640xbf16, #tpu.memory_space<vmem>>, vector<16x640xbf16>
    %c0_1 = arith.constant 0 : index
    %c0_2 = arith.constant 0 : index
    %1 = vector.load %arg3[%c0_1, %c0_2] : memref<640x128xbf16, #tpu.memory_space<vmem>>, vector<640x128xbf16>
    %cst = arith.constant dense<0.000000e+00> : vector<16x128xf32>
    %2 = tpu.matmul %0, %1, %cst {dimension_numbers = #tpu.dot_dimension_numbers<[1], [0], [0], [1], [0, 0, 1, 1], [], []>} : vector<16x640xbf16>, vector<640x128xbf16>, vector<16x128xf32> -> vector<16x128xf32>
    %c0_3 = arith.constant 0 : index
    %c0_4 = arith.constant 0 : index
    %3 = vector.load %arg4[%c0_3, %c0_4] : memref<1x128xf32, #tpu.memory_space<vmem>>, vector<1x128xf32>
    %4 = vector.broadcast %3 : vector<1x128xf32> to vector<16x128xf32>
    %5 = arith.mulf %2, %4 : vector<16x128xf32>
    %c0_5 = arith.constant 0 : index
    %c0_6 = arith.constant 0 : index
    %6 = vector.load %arg5[%c0_5, %c0_6] : memref<1x128xf32, #tpu.memory_space<vmem>>, vector<1x128xf32>
    %7 = vector.broadcast %6 : vector<1x128xf32> to vector<16x128xf32>
    %8 = arith.addf %5, %7 : vector<16x128xf32>
    %cst_7 = arith.constant 0.000000e+00 : f32
    %9 = vector.broadcast %cst_7 : f32 to vector<16x128xf32>
    %10 = arith.maximumf %8, %9 : vector<16x128xf32>
    %11 = arith.truncf %10 : vector<16x128xf32> to vector<16x128xbf16>
    %c0_8 = arith.constant 0 : index
    %c0_9 = arith.constant 0 : index
    %12 = vector.load %arg6[%c0_8, %c0_9] : memref<16x128xbf16, #tpu.memory_space<vmem>>, vector<16x128xbf16>
    tpu.vector_store %arg6[%c0_8, %c0_9], %11 {strides = array<i32>} : memref<16x128xbf16, #tpu.memory_space<vmem>>, vector<16x128xbf16>,
    return
  }
  func.func @transform_0(%arg0: i32, %arg1: i32) -> (i32, i32) {
    %c0_i32 = arith.constant 0 : i32
    %c0_i32_0 = arith.constant 0 : i32
    return %arg0, %c0_i32 : i32, i32
  }
  func.func @transform_1(%arg0: i32, %arg1: i32) -> (i32, i32) {
    %c0_i32 = arith.constant 0 : i32
    %c0_i32_0 = arith.constant 0 : i32
    return %c0_i32, %arg1 : i32, i32
  }
  func.func @transform_2(%arg0: i32, %arg1: i32) -> (i32, i32) {
    %c0_i32 = arith.constant 0 : i32
    %c0_i32_0 = arith.constant 0 : i32
    return %c0_i32, %arg1 : i32, i32
  }
  func.func @transform_3(%arg0: i32, %arg1: i32) -> (i32, i32) {
    %c0_i32 = arith.constant 0 : i32
    %c0_i32_0 = arith.constant 0 : i32
    return %c0_i32, %arg1 : i32, i32
  }
  func.func @transform_4(%arg0: i32, %arg1: i32) -> (i32, i32) {
    %c0_i32 = arith.constant 0 : i32
    return %arg0, %arg1 : i32, i32
  }
}

module attributes {stable_mosaic.version = 11 : i64} {
  func.func @_mm_bn_add_relu_kernel(%arg0: i32, %arg1: i32, %arg2: memref<16x512xbf16, #tpu.memory_space<vmem>>, %arg3: memref<512x128xbf16, #tpu.memory_space<vmem>>, %arg4: memref<1x128xf32, #tpu.memory_space<vmem>>, %arg5: memref<1x128xf32, #tpu.memory_space<vmem>>, %arg6: memref<16x128xbf16, #tpu.memory_space<vmem>>, %arg7: memref<16x128xbf16, #tpu.memory_space<vmem>>) attributes {dimension_semantics = [#tpu.dimension_semantics<parallel>, #tpu.dimension_semantics<parallel>], iteration_bounds = array<i64: 1, 1>, scalar_prefetch = 0 : i64, scratch_operands = 0 : i64, tpu.core_type = #tpu.core_type<tc>, window_params = [{transform_indices = @transform_0, window_bounds = array<i64: 16, 512>}, {transform_indices = @transform_1, window_bounds = array<i64: 512, 128>}, {transform_indices = @transform_2, window_bounds = array<i64: 1, 128>}, {transform_indices = @transform_3, window_bounds = array<i64: 1, 128>}, {transform_indices = @transform_4, window_bounds = array<i64: 16, 128>}, {transform_indices = @transform_5, window_bounds = array<i64: 16, 128>}]} {
    %c0 = arith.constant 0 : index
    %c0_0 = arith.constant 0 : index
    %0 = vector.load %arg2[%c0, %c0_0] : memref<16x512xbf16, #tpu.memory_space<vmem>>, vector<16x512xbf16>
    %c0_1 = arith.constant 0 : index
    %c0_2 = arith.constant 0 : index
    %1 = vector.load %arg3[%c0_1, %c0_2] : memref<512x128xbf16, #tpu.memory_space<vmem>>, vector<512x128xbf16>
    %cst = arith.constant dense<0.000000e+00> : vector<16x128xf32>
    %2 = tpu.matmul %0, %1, %cst {dimension_numbers = #tpu.dot_dimension_numbers<[1], [0], [0], [1], [0, 0, 1, 1], [], []>} : vector<16x512xbf16>, vector<512x128xbf16>, vector<16x128xf32> -> vector<16x128xf32>
    %c0_3 = arith.constant 0 : index
    %c0_4 = arith.constant 0 : index
    %3 = vector.load %arg4[%c0_3, %c0_4] : memref<1x128xf32, #tpu.memory_space<vmem>>, vector<1x128xf32>
    %4 = vector.broadcast %3 : vector<1x128xf32> to vector<16x128xf32>
    %5 = arith.mulf %2, %4 : vector<16x128xf32>
    %c0_5 = arith.constant 0 : index
    %c0_6 = arith.constant 0 : index
    %6 = vector.load %arg5[%c0_5, %c0_6] : memref<1x128xf32, #tpu.memory_space<vmem>>, vector<1x128xf32>
    %7 = vector.broadcast %6 : vector<1x128xf32> to vector<16x128xf32>
    %8 = arith.addf %5, %7 : vector<16x128xf32>
    %c0_7 = arith.constant 0 : index
    %c0_8 = arith.constant 0 : index
    %9 = vector.load %arg6[%c0_7, %c0_8] : memref<16x128xbf16, #tpu.memory_space<vmem>>, vector<16x128xbf16>
    %10 = arith.extf %9 : vector<16x128xbf16> to vector<16x128xf32>
    %11 = arith.addf %8, %10 : vector<16x128xf32>
    %cst_9 = arith.constant 0.000000e+00 : f32
    %12 = vector.broadcast %cst_9 : f32 to vector<16x128xf32>
    %13 = arith.maximumf %11, %12 : vector<16x128xf32>
    %14 = arith.truncf %13 : vector<16x128xf32> to vector<16x128xbf16>
    %c0_10 = arith.constant 0 : index
    %c0_11 = arith.constant 0 : index
    %15 = vector.load %arg7[%c0_10, %c0_11] : memref<16x128xbf16, #tpu.memory_space<vmem>>, vector<16x128xbf16>
    tpu.vector_store %arg7[%c0_10, %c0_11], %14 {strides = array<i32>} : memref<16x128xbf16, #tpu.memory_space<vmem>>, vector<16x128xbf16>,
    return
  }
  func.func @transform_0(%arg0: i32, %arg1: i32) -> (i32, i32) {
    %c0_i32 = arith.constant 0 : i32
    %c0_i32_0 = arith.constant 0 : i32
    return %arg0, %c0_i32 : i32, i32
  }
  func.func @transform_1(%arg0: i32, %arg1: i32) -> (i32, i32) {
    %c0_i32 = arith.constant 0 : i32
    %c0_i32_0 = arith.constant 0 : i32
    return %c0_i32, %arg1 : i32, i32
  }
  func.func @transform_2(%arg0: i32, %arg1: i32) -> (i32, i32) {
    %c0_i32 = arith.constant 0 : i32
    %c0_i32_0 = arith.constant 0 : i32
    return %c0_i32, %arg1 : i32, i32
  }
  func.func @transform_3(%arg0: i32, %arg1: i32) -> (i32, i32) {
    %c0_i32 = arith.constant 0 : i32
    %c0_i32_0 = arith.constant 0 : i32
    return %c0_i32, %arg1 : i32, i32
  }
  func.func @transform_4(%arg0: i32, %arg1: i32) -> (i32, i32) {
    %c0_i32 = arith.constant 0 : i32
    return %arg0, %arg1 : i32, i32
  }
  func.func @transform_5(%arg0: i32, %arg1: i32) -> (i32, i32) {
    %c0_i32 = arith.constant 0 : i32
    return %arg0, %arg1 : i32, i32
  }
}

module attributes {stable_mosaic.version = 11 : i64} {
  func.func @_gap_kernel(%arg0: i32, %arg1: memref<2x8x64xbf16, #tpu.memory_space<vmem>>, %arg2: memref<2x64xf32, #tpu.memory_space<vmem>>) attributes {dimension_semantics = [#tpu.dimension_semantics<arbitrary>], iteration_bounds = array<i64: 1>, scalar_prefetch = 0 : i64, scratch_operands = 0 : i64, tpu.core_type = #tpu.core_type<tc>, window_params = [{transform_indices = @transform_0, window_bounds = array<i64: 2, 8, 64>}, {pipeline_mode = #tpu.pipeline_mode<synchronous>, transform_indices = @transform_1, window_bounds = array<i64: 2, 64>}]} {
    %c0_i32 = arith.constant 0 : i32
    %0 = arith.cmpi eq, %arg0, %c0_i32 : i32
    %1 = arith.extui %0 : i1 to i32
    %c0_i32_0 = arith.constant 0 : i32
    %2 = arith.cmpi ne, %1, %c0_i32_0 : i32
    scf.if %2 {
      %cst_9 = arith.constant 0.000000e+00 : f32
      %12 = vector.broadcast %cst_9 : f32 to vector<2x64xf32>
      %c0_10 = arith.constant 0 : index
      %c0_11 = arith.constant 0 : index
      %13 = vector.load %arg2[%c0_10, %c0_11] : memref<2x64xf32, #tpu.memory_space<vmem>>, vector<2x64xf32>
      tpu.vector_store %arg2[%c0_10, %c0_11], %12 {strides = array<i32>} : memref<2x64xf32, #tpu.memory_space<vmem>>, vector<2x64xf32>,
    } else {
    }
    %c0 = arith.constant 0 : index
    %c0_1 = arith.constant 0 : index
    %3 = vector.load %arg2[%c0, %c0_1] : memref<2x64xf32, #tpu.memory_space<vmem>>, vector<2x64xf32>
    %c0_2 = arith.constant 0 : index
    %c0_3 = arith.constant 0 : index
    %c0_4 = arith.constant 0 : index
    %4 = vector.load %arg1[%c0_2, %c0_3, %c0_4] : memref<2x8x64xbf16, #tpu.memory_space<vmem>>, vector<2x8x64xbf16>
    %5 = arith.extf %4 : vector<2x8x64xbf16> to vector<2x8x64xf32>
    %cst = arith.constant dense<0.000000e+00> : vector<2x64xf32>
    %6 = vector.multi_reduction <add>, %5, %cst [1] : vector<2x8x64xf32> to vector<2x64xf32>
    %7 = arith.addf %3, %6 : vector<2x64xf32>
    %c0_5 = arith.constant 0 : index
    %c0_6 = arith.constant 0 : index
    %8 = vector.load %arg2[%c0_5, %c0_6] : memref<2x64xf32, #tpu.memory_space<vmem>>, vector<2x64xf32>
    tpu.vector_store %arg2[%c0_5, %c0_6], %7 {strides = array<i32>} : memref<2x64xf32, #tpu.memory_space<vmem>>, vector<2x64xf32>,
    %c0_i32_7 = arith.constant 0 : i32
    %9 = arith.cmpi eq, %arg0, %c0_i32_7 : i32
    %10 = arith.extui %9 : i1 to i32
    %c0_i32_8 = arith.constant 0 : i32
    %11 = arith.cmpi ne, %10, %c0_i32_8 : i32
    scf.if %11 {
      %c0_9 = arith.constant 0 : index
      %c0_10 = arith.constant 0 : index
      %12 = vector.load %arg2[%c0_9, %c0_10] : memref<2x64xf32, #tpu.memory_space<vmem>>, vector<2x64xf32>
      %cst_11 = arith.constant 1.000000e+00 : f32
      %13 = vector.broadcast %cst_11 : f32 to vector<2x64xf32>
      %14 = arith.mulf %12, %13 : vector<2x64xf32>
      %c0_12 = arith.constant 0 : index
      %c0_13 = arith.constant 0 : index
      %15 = vector.load %arg2[%c0_12, %c0_13] : memref<2x64xf32, #tpu.memory_space<vmem>>, vector<2x64xf32>
      tpu.vector_store %arg2[%c0_12, %c0_13], %14 {strides = array<i32>} : memref<2x64xf32, #tpu.memory_space<vmem>>, vector<2x64xf32>,
    } else {
    }
    return
  }
  func.func @transform_0(%arg0: i32) -> (i32, i32, i32) {
    %c0_i32 = arith.constant 0 : i32
    %c0_i32_0 = arith.constant 0 : i32
    %c0_i32_1 = arith.constant 0 : i32
    return %c0_i32, %arg0, %c0_i32_0 : i32, i32, i32
  }
  func.func @transform_1(%arg0: i32) -> (i32, i32) {
    %c0_i32 = arith.constant 0 : i32
    %c0_i32_0 = arith.constant 0 : i32
    %c0_i32_1 = arith.constant 0 : i32
    return %c0_i32, %c0_i32_0 : i32, i32
  }
}

</mosaic_0001>

<bundles_post_ra>
// kernel: _lambda_.22
= control target key start
LH: loop header
LB: loop body
LE: loop exit
PB: predicated region body
PF: predicated region fallthrough
CT: control target
= control target key end

     0   :  { %s2261_s15 = smov 0   ;;  %s2263_s16 = smov 0   ;;  %s2643_s0 = inlined_call_operand.vmem [shape: bf16[1024,256], index: 0, kind: input, shape index: {}]   ;;  %s2644_s1 = inlined_call_operand.vmem [shape: bf16[256,128], index: 1, kind: input, shape index: {}]   ;;  %s2645_s2 = inlined_call_operand.vmem [shape: f32[1,128], index: 2, kind: input, shape index: {}]   ;;  %s2646_s3 = inlined_call_operand.vmem [shape: f32[1,128], index: 3, kind: input, shape index: {}]   ;;  %s2647_s4 = inlined_call_operand.vmem [shape: bf16[1024,128], index: 4, kind: output, shape index: {}]  }
   0x1   :  { %s2265_s17 = smov 0  }
   0x2 LB: > { %s26_s18 = sadd.s32 1, %s2230_s16  ;;  %p1568_p0 = scmp.ge.s32.totalorder %s2234_s17, 1  ;;  %s2234_s17 = sphi %s2265_s17, %s14_s17   ;;  %s2230_s16 = sphi %s2263_s16, %s2649_s16   ;;  %s2226_s15 = sphi %s2261_s15, %s2648_s15  }
   0x3   : > { %p28_p1 = scmp.ge.s32.totalorder %s26_s18, 2  ;;  %p203_p2 = scmp.lt.s32.totalorder %s2234_s17, 3 }
   0x5   : > { %s2651_s18 = smov (%p28_p1, %s26_s18), 0  ;;  %p204_p3 = pnand %p1568_p0, %p203_p2 }
   0x6   : > { %s1569_s5 = sshll.u32 (!%p204_p3), %s2226_s15, 6 }
   0x7   : > { %207 = sbr.rel (%p204_p3) target bundleno = 436 (0x1b4), region = 36  ;;  %p244_p4 = scmp.lt.s32.totalorder (!%p204_p3), %s1569_s5, 127 }
   0xc   : > { %v1968_v0 = vld [vmem:[%s2644_s1 + $0x38] sm:$0xff]  ;;  %v1967_v2 = vld [vmem:[%s2644_s1 + $0x30] sm:$0xff]  ;;  %v1966_v4 = vld [vmem:[%s2644_s1 + $0x28] sm:$0xff]  ;;  %s2653_s5 = smov (!%p244_p4, %s1569_s5), 127 }
   0xd   : > { %v1976_v1 = vld [vmem:[%s2644_s1 + $0x78] sm:$0xff]  ;;  %781 = vmatpush.bf16.msra.mxu0 %v1968_v0  ;;  %2168 = vmatpush.bf16.msra.mxu2 %v1968_v0  ;;  %v1975_v3 = vld [vmem:[%s2644_s1 + $0x70] sm:$0xff]  ;;  %v1974_v5 = vld [vmem:[%s2644_s1 + $0x68] sm:$0xff]  ;;  %s1896_s21 = sshll.u32 %s2653_s5, 3  ;;  %s1573_s12 = sshll.u32 %s2653_s5, 2 }
   0xe   : > { %950 = vmatpush.bf16.msra.mxu1 %v1976_v1  ;;  %2176 = vmatpush.bf16.msra.mxu3 %v1976_v1  ;;  %v1965_v6 = vld [vmem:[%s2644_s1 + $0x20] sm:$0xff]  ;;  %v1964_v8 = vld [vmem:[%s2644_s1 + $0x18] sm:$0xff]  ;;  %v1963_v10 = vld [vmem:[%s2644_s1 + $0x10] sm:$0xff]  ;;  %s2327_s26 = scalar_lea.vmem %s2643_s0, %s1896_s21  ;;  %s2437_s15 = scalar_lea.vmem %s2647_s4, %s1573_s12 }
   0xf   : > { %v1973_v7 = vld [vmem:[%s2644_s1 + $0x60] sm:$0xff]  ;;  %v1972_v9 = vld [vmem:[%s2644_s1 + $0x58] sm:$0xff]  ;;  %v1971_v11 = vld [vmem:[%s2644_s1 + $0x50] sm:$0xff] }
  0x10   : > { %v1962_v12 = vld [vmem:[%s2644_s1 + $0x8] sm:$0xff]  ;;  %v1961_v14 = vld [vmem:[%s2644_s1] sm:$0xff]  ;;  %v1584_v28 = vld [vmem:[%s2327_s26 + $0x10] sm:$0xf] }
  0x11   : > { %782 = vmatpush.bf16.msra.mxu0 %v1967_v2  ;;  %2169 = vmatpush.bf16.msra.mxu2 %v1967_v2  ;;  %v1970_v13 = vld [vmem:[%s2644_s1 + $0x48] sm:$0xff]  ;;  %v1969_v15 = vld [vmem:[%s2644_s1 + $0x40] sm:$0xff]  ;;  %v1900_v29 = vld [vmem:[%s2327_s26 + $0x14] sm:$0xf0] }
  0x12   : > { %951 = vmatpush.bf16.msra.mxu1 %v1975_v3  ;;  %2177 = vmatpush.bf16.msra.mxu3 %v1975_v3  ;;  %v1576_v16 = vld [vmem:[%s2327_s26] sm:$0xf]  ;;  %v1898_v17 = vld [vmem:[%s2327_s26 + $0x4] sm:$0xf0]  ;;  %v1897_v20 = vld [vmem:[%s2327_s26 + $0x4] sm:$0xf]  ;;  %v1585_v36 = vor.u32 %v1900_v29, %v1584_v28 }
  0x13   : > { %v1704_v18 = vld [vmem:[%s2327_s26 + $0x100] sm:$0xf]  ;;  %v1930_v19 = vld [vmem:[%s2327_s26 + $0x104] sm:$0xf0]  ;;  %v1578_v21 = vld [vmem:[%s2327_s26 + $0x8] sm:$0xf0]  ;;  %v1577_v24 = vor.u32 %v1898_v17, %v1576_v16 }
  0x14   : > { %v1929_v22 = vld [vmem:[%s2327_s26 + $0x104] sm:$0xf]  ;;  %v1706_v23 = vld [vmem:[%s2327_s26 + $0x108] sm:$0xf0]  ;;  %v1705_v25 = vor.u32 %v1930_v19, %v1704_v18  ;;  %v1581_v26 = vor.u32 %v1897_v20, %v1578_v21  ;;  %v1712_v30 = vld [vmem:[%s2327_s26 + $0x110] sm:$0xf] }
  0x15   : > { %783 = vmatpush.bf16.msra.mxu0 %v1966_v4  ;;  %2170 = vmatpush.bf16.msra.mxu2 %v1966_v4  ;;  %v1709_v27 = vor.u32 %v1929_v22, %v1706_v23  ;;  %v1932_v31 = vld [vmem:[%s2327_s26 + $0x114] sm:$0xf0]  ;;  %v1899_v32 = vld [vmem:[%s2327_s26 + $0x14] sm:$0xf]  ;;  %v1586_v33 = vld [vmem:[%s2327_s26 + $0x18] sm:$0xf0] }
  0x16   : > { %952 = vmatpush.bf16.msra.mxu1 %v1974_v5  ;;  %2178 = vmatpush.bf16.msra.mxu3 %v1974_v5  ;;  %v1931_v34 = vld [vmem:[%s2327_s26 + $0x114] sm:$0xf]  ;;  %v1714_v35 = vld [vmem:[%s2327_s26 + $0x118] sm:$0xf0]  ;;  %v1713_v37 = vor.u32 %v1932_v31, %v1712_v30  ;;  %v1589_v38 = vor.u32 %v1899_v32, %v1586_v33  ;;  %v1592_v40 = vld [vmem:[%s2327_s26 + $0x20] sm:$0xf] }
  0x17   : > { %v1717_v39 = vor.u32 %v1931_v34, %v1714_v35  ;;  %v1902_v41 = vld [vmem:[%s2327_s26 + $0x24] sm:$0xf0]  ;;  %v1720_v42 = vld [vmem:[%s2327_s26 + $0x120] sm:$0xf]  ;;  %v1901_v44 = vld [vmem:[%s2327_s26 + $0x24] sm:$0xf] }
  0x18   : > { %v1934_v43 = vld [vmem:[%s2327_s26 + $0x124] sm:$0xf0]  ;;  %v1594_v45 = vld [vmem:[%s2327_s26 + $0x28] sm:$0xf0]  ;;  %v1933_v46 = vld [vmem:[%s2327_s26 + $0x124] sm:$0xf]  ;;  %v1593_v48 = vor.u32 %v1902_v41, %v1592_v40 }
  0x19   : > { %784 = vmatpush.bf16.msra.mxu0 %v1965_v6  ;;  %2171 = vmatpush.bf16.msra.mxu2 %v1965_v6  ;;  %v1722_v47 = vld [vmem:[%s2327_s26 + $0x128] sm:$0xf0]  ;;  %v1721_v49 = vor.u32 %v1934_v43, %v1720_v42  ;;  %v1597_v50 = vor.u32 %v1901_v44, %v1594_v45  ;;  %v1600_v52 = vld [vmem:[%s2327_s26 + $0x30] sm:$0xf]  ;;  %v1904_v53 = vld [vmem:[%s2327_s26 + $0x34] sm:$0xf0] }
  0x1a   : > { %953 = vmatpush.bf16.msra.mxu1 %v1973_v7  ;;  %2179 = vmatpush.bf16.msra.mxu3 %v1973_v7  ;;  %v1725_v51 = vor.u32 %v1933_v46, %v1722_v47  ;;  %v1728_v54 = vld [vmem:[%s2327_s26 + $0x130] sm:$0xf]  ;;  %v1936_v55 = vld [vmem:[%s2327_s26 + $0x134] sm:$0xf0]  ;;  %v1903_v56 = vld [vmem:[%s2327_s26 + $0x34] sm:$0xf]  ;;  %v1601_v60 = vor.u32 %v1904_v53, %v1600_v52 }
  0x1b   : > { %v1602_v57 = vld [vmem:[%s2327_s26 + $0x38] sm:$0xf0]  ;;  %v1935_v58 = vld [vmem:[%s2327_s26 + $0x134] sm:$0xf]  ;;  %v1729_v61 = vor.u32 %v1936_v55, %v1728_v54  ;;  %v1608_v0 = vld [vmem:[%s2327_s26 + $0x40] sm:$0xf] }
  0x1c   : > { %v1730_v59 = vld [vmem:[%s2327_s26 + $0x138] sm:$0xf0]  ;;  %v1605_v62 = vor.u32 %v1903_v56, %v1602_v57  ;;  %v1906_v1 = vld [vmem:[%s2327_s26 + $0x44] sm:$0xf0]  ;;  %v1736_v2 = vld [vmem:[%s2327_s26 + $0x140] sm:$0xf] }
  0x1d   : > { %785 = vmatpush.bf16.msra.mxu0 %v1964_v8  ;;  %2172 = vmatpush.bf16.msra.mxu2 %v1964_v8  ;;  %v1733_v63 = vor.u32 %v1935_v58, %v1730_v59  ;;  %v1938_v3 = vld [vmem:[%s2327_s26 + $0x144] sm:$0xf0]  ;;  %v1905_v4 = vld [vmem:[%s2327_s26 + $0x44] sm:$0xf]  ;;  %v1610_v5 = vld [vmem:[%s2327_s26 + $0x48] sm:$0xf0]  ;;  %v1609_v8 = vor.u32 %v1906_v1, %v1608_v0 }
  0x1e   : > { %954 = vmatpush.bf16.msra.mxu1 %v1972_v9  ;;  %2180 = vmatpush.bf16.msra.mxu3 %v1972_v9  ;;  %v1937_v6 = vld [vmem:[%s2327_s26 + $0x144] sm:$0xf]  ;;  %v1738_v7 = vld [vmem:[%s2327_s26 + $0x148] sm:$0xf0]  ;;  %v1737_v9 = vor.u32 %v1938_v3, %v1736_v2  ;;  %v1907_v16 = vld [vmem:[%s2327_s26 + $0x54] sm:$0xf] }
  0x1f   : > { %v1618_v17 = vld [vmem:[%s2327_s26 + $0x58] sm:$0xf0]  ;;  %v1939_v18 = vld [vmem:[%s2327_s26 + $0x154] sm:$0xf]  ;;  %v1909_v28 = vld [vmem:[%s2327_s26 + $0x64] sm:$0xf] }
  0x20   : > { %v1746_v19 = vld [vmem:[%s2327_s26 + $0x158] sm:$0xf0]  ;;  %v1621_v22 = vor.u32 %v1907_v16, %v1618_v17  ;;  %v1626_v29 = vld [vmem:[%s2327_s26 + $0x68] sm:$0xf0]  ;;  %v1941_v30 = vld [vmem:[%s2327_s26 + $0x164] sm:$0xf] }
  0x21   : > { %786 = vmatpush.bf16.msra.mxu0 %v1963_v10  ;;  %2173 = vmatpush.bf16.msra.mxu2 %v1963_v10  ;;  %v1613_v10 = vor.u32 %v1905_v4, %v1610_v5  ;;  %v1749_v23 = vor.u32 %v1939_v18, %v1746_v19  ;;  %v1754_v31 = vld [vmem:[%s2327_s26 + $0x168] sm:$0xf0]  ;;  %v1629_v34 = vor.u32 %v1909_v28, %v1626_v29  ;;  %v1911_v40 = vld [vmem:[%s2327_s26 + $0x74] sm:$0xf]  ;;  %v1634_v41 = vld [vmem:[%s2327_s26 + $0x78] sm:$0xf0] }
  0x22   : > { %955 = vmatpush.bf16.msra.mxu1 %v1971_v11  ;;  %2181 = vmatpush.bf16.msra.mxu3 %v1971_v11  ;;  %v1741_v11 = vor.u32 %v1937_v6, %v1738_v7  ;;  %v1757_v35 = vor.u32 %v1941_v30, %v1754_v31  ;;  %v1943_v42 = vld [vmem:[%s2327_s26 + $0x174] sm:$0xf]  ;;  %v1762_v43 = vld [vmem:[%s2327_s26 + $0x178] sm:$0xf0]  ;;  %v1637_v46 = vor.u32 %v1911_v40, %v1634_v41  ;;  %v1913_v52 = vld [vmem:[%s2327_s26 + $0x84] sm:$0xf] }
  0x23   : > { %v1765_v47 = vor.u32 %v1943_v42, %v1762_v43  ;;  %v1642_v53 = vld [vmem:[%s2327_s26 + $0x88] sm:$0xf0]  ;;  %v1945_v54 = vld [vmem:[%s2327_s26 + $0x184] sm:$0xf]  ;;  %v2419_v3 = vld [vmem:[%s2646_s3] ss:$0 sm:$0xff] }
  0x24   : > { %v1770_v55 = vld [vmem:[%s2327_s26 + $0x188] sm:$0xf0]  ;;  %v1645_v59 = vor.u32 %v1913_v52, %v1642_v53  ;;  %v1947_v16 = vld [vmem:[%s2327_s26 + $0x194] sm:$0xf]  ;;  %v1778_v17 = vld [vmem:[%s2327_s26 + $0x198] sm:$0xf0] }
  0x25   : > { %787 = vmatpush.bf16.msra.mxu0 %v1962_v12  ;;  %2174 = vmatpush.bf16.msra.mxu2 %v1962_v12  ;;  %v1616_v12 = vld [vmem:[%s2327_s26 + $0x50] sm:$0xf]  ;;  %v1781_v29 = vor.u32 %v1947_v16, %v1778_v17  ;;  %v1917_v52 = vld [vmem:[%s2327_s26 + $0xa4] sm:$0xf]  ;;  %v1658_v53 = vld [vmem:[%s2327_s26 + $0xa8] sm:$0xf0] }
  0x26   : > { %956 = vmatpush.bf16.msra.mxu1 %v1970_v13  ;;  %2182 = vmatpush.bf16.msra.mxu3 %v1970_v13  ;;  %v1908_v13 = vld [vmem:[%s2327_s26 + $0x54] sm:$0xf0] }
  0x27   : > { %v1617_v20 = vor.u32 %v1908_v13, %v1616_v12  ;;  %v1948_v13 = vld [vmem:[%s2327_s26 + $0x194] sm:$0xf0] }
  0x29   : > { %788 = vmatpush.bf16.msra.mxu0 %v1961_v14  ;;  %2175 = vmatpush.bf16.msra.mxu2 %v1961_v14  ;;  %v1744_v14 = vld [vmem:[%s2327_s26 + $0x150] sm:$0xf] }
  0x2a   : > { %957 = vmatpush.bf16.msra.mxu1 %v1969_v15  ;;  %2183 = vmatpush.bf16.msra.mxu3 %v1969_v15  ;;  %v1940_v15 = vld [vmem:[%s2327_s26 + $0x154] sm:$0xf0] }
  0x2b   : > { %v1745_v21 = vor.u32 %v1940_v15, %v1744_v14  ;;  %v1915_v14 = vld [vmem:[%s2327_s26 + $0x94] sm:$0xf]  ;;  %v1650_v15 = vld [vmem:[%s2327_s26 + $0x98] sm:$0xf0] }
  0x2c   : > { %789 = vmatmul.bf16.vlgmr.msra.gmra.mxu0 %v1577_v24  ;;  %869 = vmatmul.bf16.vlgmr.msra.gmra.mxu2 %v1705_v25  ;;  %v1624_v24 = vld [vmem:[%s2327_s26 + $0x60] sm:$0xf]  ;;  %v1910_v25 = vld [vmem:[%s2327_s26 + $0x64] sm:$0xf0] }
  0x2d   : > { %958 = vmatmul.bf16.vlgmr.msra.gmra.mxu1 %v1581_v26  ;;  %1038 = vmatmul.bf16.vlgmr.msra.gmra.mxu3 %v1709_v27  ;;  %v1752_v26 = vld [vmem:[%s2327_s26 + $0x160] sm:$0xf]  ;;  %v1942_v27 = vld [vmem:[%s2327_s26 + $0x164] sm:$0xf0]  ;;  %v1625_v32 = vor.u32 %v1910_v25, %v1624_v24  ;;  %v1653_v24 = vor.u32 %v1915_v14, %v1650_v15 }
  0x2e   : > { %v1753_v33 = vor.u32 %v1942_v27, %v1752_v26 }
  0x3c   : > { %794 = vmatmul.bf16.gmra.mxu0 %v1585_v36  ;;  %874 = vmatmul.bf16.gmra.mxu2 %v1713_v37  ;;  %v1632_v36 = vld [vmem:[%s2327_s26 + $0x70] sm:$0xf]  ;;  %v1912_v37 = vld [vmem:[%s2327_s26 + $0x74] sm:$0xf0] }
  0x3d   : > { %963 = vmatmul.bf16.gmra.mxu1 %v1589_v38  ;;  %1043 = vmatmul.bf16.gmra.mxu3 %v1717_v39  ;;  %v1760_v38 = vld [vmem:[%s2327_s26 + $0x170] sm:$0xf]  ;;  %v1944_v39 = vld [vmem:[%s2327_s26 + $0x174] sm:$0xf0]  ;;  %v1633_v44 = vor.u32 %v1912_v37, %v1632_v36 }
  0x3e   : > { %v1761_v45 = vor.u32 %v1944_v39, %v1760_v38 }
  0x4c   : > { %799 = vmatmul.bf16.gmra.mxu0 %v1593_v48  ;;  %879 = vmatmul.bf16.gmra.mxu2 %v1721_v49  ;;  %v1640_v48 = vld [vmem:[%s2327_s26 + $0x80] sm:$0xf]  ;;  %v1914_v49 = vld [vmem:[%s2327_s26 + $0x84] sm:$0xf0] }
  0x4d   : > { %968 = vmatmul.bf16.gmra.mxu1 %v1597_v50  ;;  %1048 = vmatmul.bf16.gmra.mxu3 %v1725_v51  ;;  %v1768_v50 = vld [vmem:[%s2327_s26 + $0x180] sm:$0xf]  ;;  %v1946_v51 = vld [vmem:[%s2327_s26 + $0x184] sm:$0xf0]  ;;  %v1641_v56 = vor.u32 %v1914_v49, %v1640_v48 }
  0x4e   : > { %v1769_v57 = vor.u32 %v1946_v51, %v1768_v50  ;;  %v1784_v48 = vld [vmem:[%s2327_s26 + $0x1a0] sm:$0xf]  ;;  %v1950_v51 = vld [vmem:[%s2327_s26 + $0x1a4] sm:$0xf0] }
  0x5c   : > { %804 = vmatmul.bf16.gmra.mxu0 %v1601_v60  ;;  %884 = vmatmul.bf16.gmra.mxu2 %v1729_v61  ;;  %v1773_v60 = vor.u32 %v1945_v54, %v1770_v55  ;;  %v1949_v54 = vld [vmem:[%s2327_s26 + $0x1a4] sm:$0xf]  ;;  %v1786_v55 = vld [vmem:[%s2327_s26 + $0x1a8] sm:$0xf0] }
  0x5d   : > { %973 = vmatmul.bf16.gmra.mxu1 %v1605_v62  ;;  %1053 = vmatmul.bf16.gmra.mxu3 %v1733_v63  ;;  %v2413_v63 = vld [vmem:[%s2645_s2] ss:$0 sm:$0xff] }
  0x6c   : > { %809 = vmatmul.bf16.gmra.mxu0 %v1609_v8  ;;  %889 = vmatmul.bf16.gmra.mxu2 %v1737_v9  ;;  %v1648_v8 = vld [vmem:[%s2327_s26 + $0x90] sm:$0xf]  ;;  %v1916_v9 = vld [vmem:[%s2327_s26 + $0x94] sm:$0xf0] }
  0x6d   : > { %978 = vmatmul.bf16.gmra.mxu1 %v1613_v10  ;;  %1058 = vmatmul.bf16.gmra.mxu3 %v1741_v11  ;;  %v1776_v10 = vld [vmem:[%s2327_s26 + $0x190] sm:$0xf] }
  0x7c   : > { %814 = vmatmul.bf16.gmra.mxu0 %v1617_v20  ;;  %894 = vmatmul.bf16.gmra.mxu2 %v1745_v21 }
  0x7d   : > { %983 = vmatmul.bf16.gmra.mxu1 %v1621_v22  ;;  %1063 = vmatmul.bf16.gmra.mxu3 %v1749_v23  ;;  %v1649_v22 = vor.u32 %v1916_v9, %v1648_v8  ;;  %v1777_v23 = vor.u32 %v1948_v13, %v1776_v10 }
  0x8c   : > { %819 = vmatmul.bf16.gmra.mxu0 %v1625_v32  ;;  %899 = vmatmul.bf16.gmra.mxu2 %v1753_v33 }
  0x8d   : > { %988 = vmatmul.bf16.gmra.mxu1 %v1629_v34  ;;  %1068 = vmatmul.bf16.gmra.mxu3 %v1757_v35 }
  0x9c   : > { %824 = vmatmul.bf16.gmra.mxu0 %v1633_v44  ;;  %904 = vmatmul.bf16.gmra.mxu2 %v1761_v45 }
  0x9d   : > { %993 = vmatmul.bf16.gmra.mxu1 %v1637_v46  ;;  %1073 = vmatmul.bf16.gmra.mxu3 %v1765_v47  ;;  %v1656_v46 = vld [vmem:[%s2327_s26 + $0xa0] sm:$0xf]  ;;  %v1918_v47 = vld [vmem:[%s2327_s26 + $0xa4] sm:$0xf0] }
  0xa9   : > { %v790_v58 = vpop.f32.mrf.mxu0 }
  0xaa   : > { %v959_v61 = vpop.f32.mrf.mxu1 }
  0xab   : > { %v960_v62 = vadd.f32 %v959_v61, %v790_v58  ;;  %v1785_v61 = vor.u32 %v1950_v51, %v1784_v48 }
  0xac   : > { %829 = vmatmul.bf16.gmra.mxu0 %v1641_v56  ;;  %909 = vmatmul.bf16.gmra.mxu2 %v1769_v57 }
  0xad   : > { %998 = vmatmul.bf16.gmra.mxu1 %v1645_v59  ;;  %1078 = vmatmul.bf16.gmra.mxu3 %v1773_v60  ;;  %v1123_v2 = vmul.f32 %v2413_v63, %v960_v62  ;;  %v1657_v60 = vor.u32 %v1918_v47, %v1656_v46  ;;  %v1661_v62 = vor.u32 %v1917_v52, %v1658_v53 }
  0xaf   : > { %v870_v0 = vpop.f32.mrf.mxu2  ;;  %v1191_v11 = vadd.f32 %v2419_v3, %v1123_v2 }
  0xb0   : > { %v1039_v1 = vpop.f32.mrf.mxu3 }
  0xb1   : > { %v792_v4 = vpop.f32.mrf.mxu0  ;;  %v1040_v6 = vadd.f32 %v1039_v1, %v870_v0  ;;  %v1255_v25 = vmax.f32 %v1191_v11, 0.0 }
  0xb2   : > { %v961_v5 = vpop.f32.mrf.mxu1 }
  0xb3   : > { %v962_v7 = vadd.f32 %v961_v5, %v792_v4  ;;  %v1155_v18 = vmul.f32 %v2413_v63, %v1040_v6  ;;  %v1789_v5 = vor.u32 %v1949_v54, %v1786_v55 }
  0xb5   : > { %v1124_v12 = vmul.f32 %v2413_v63, %v962_v7  ;;  %v1223_v31 = vadd.f32 %v2419_v3, %v1155_v18 }
  0xb7   : > { %v1192_v19 = vadd.f32 %v2419_v3, %v1124_v12  ;;  %v872_v20 = vpop.f32.mrf.mxu2  ;;  %v1287_v36 = vmax.f32 %v1223_v31, 0.0  ;;  %v1794_v31 = vld [vmem:[%s2327_s26 + $0x1b8] sm:$0xf0] }
  0xb8   : > { %v1041_v21 = vpop.f32.mrf.mxu3 }
  0xb9   : > { %v1256_v26 = vmax.f32 %v1192_v19, 0.0  ;;  %v1042_v27 = vadd.f32 %v1041_v21, %v872_v20  ;;  %v795_v28 = vpop.f32.mrf.mxu0 }
  0xba   : > { %v964_v30 = vpop.f32.mrf.mxu1 }
  0xbb   : > { %v1980_v32 = vpack.c.bf16 %v1256_v26, %v1255_v25  ;;  %v1156_v33 = vmul.f32 %v2413_v63, %v1042_v27  ;;  %v965_v35 = vadd.f32 %v964_v30, %v795_v28  ;;  %v1952_v27 = vld [vmem:[%s2327_s26 + $0x1b4] sm:$0xf0]  ;;  %v1919_v28 = vld [vmem:[%s2327_s26 + $0xb4] sm:$0xf] }
  0xbc   : > { %834 = vmatmul.bf16.gmra.mxu0 %v1649_v22  ;;  %914 = vmatmul.bf16.gmra.mxu2 %v1777_v23  ;;  %v1664_v22 = vld [vmem:[%s2327_s26 + $0xb0] sm:$0xf]  ;;  %v1920_v23 = vld [vmem:[%s2327_s26 + $0xb4] sm:$0xf0]  ;;  %v1951_v30 = vld [vmem:[%s2327_s26 + $0x1b4] sm:$0xf] }
  0xbd   : > { %1981 = vst [vmem:[%s2437_s15] sm:$0xff] %v1980_v32   ;;  %v1224_v34 = vadd.f32 %v2419_v3, %v1156_v33  ;;  %1003 = vmatmul.bf16.gmra.mxu1 %v1653_v24  ;;  %1083 = vmatmul.bf16.gmra.mxu3 %v1781_v29  ;;  %v1125_v41 = vmul.f32 %v2413_v63, %v965_v35  ;;  %v1792_v24 = vld [vmem:[%s2327_s26 + $0x1b0] sm:$0xf]  ;;  %v1666_v29 = vld [vmem:[%s2327_s26 + $0xb8] sm:$0xf0] }
  0xbf   : > { %v1288_v37 = vmax.f32 %v1224_v34, 0.0  ;;  %v875_v38 = vpop.f32.mrf.mxu2  ;;  %v1193_v49 = vadd.f32 %v2419_v3, %v1125_v41 }
  0xc0   : > { %v1044_v39 = vpop.f32.mrf.mxu3 }
  0xc1   : > { %v2060_v40 = vpack.c.bf16 %v1288_v37, %v1287_v36  ;;  %v797_v42 = vpop.f32.mrf.mxu0  ;;  %v1045_v44 = vadd.f32 %v1044_v39, %v875_v38  ;;  %v1257_v0 = vmax.f32 %v1193_v49, 0.0  ;;  %v1665_v36 = vor.u32 %v1920_v23, %v1664_v22 }
  0xc2   : > { %v966_v43 = vpop.f32.mrf.mxu1  ;;  %v1793_v37 = vor.u32 %v1952_v27, %v1792_v24  ;;  %v1669_v38 = vor.u32 %v1919_v28, %v1666_v29 }
  0xc3   : > { %2152 = vst [vmem:[%s2437_s15 + $0x80] sm:$0xff] %v2060_v40   ;;  %v967_v45 = vadd.f32 %v966_v43, %v797_v42  ;;  %v1157_v56 = vmul.f32 %v2413_v63, %v1045_v44  ;;  %v1797_v43 = vor.u32 %v1951_v30, %v1794_v31 }
  0xc5   : > { %v1126_v50 = vmul.f32 %v2413_v63, %v967_v45  ;;  %v1225_v7 = vadd.f32 %v2419_v3, %v1157_v56 }
  0xc7   : > { %v1194_v57 = vadd.f32 %v2419_v3, %v1126_v50  ;;  %v877_v58 = vpop.f32.mrf.mxu2  ;;  %v1289_v12 = vmax.f32 %v1225_v7, 0.0  ;;  %v1802_v7 = vld [vmem:[%s2327_s26 + $0x1c8] sm:$0xf0] }
  0xc8   : > { %v1046_v59 = vpop.f32.mrf.mxu3 }
  0xc9   : > { %v1258_v1 = vmax.f32 %v1194_v57, 0.0  ;;  %v1047_v2 = vadd.f32 %v1046_v59, %v877_v58  ;;  %v800_v4 = vpop.f32.mrf.mxu0 }
  0xca   : > { %v969_v6 = vpop.f32.mrf.mxu1 }
  0xcb   : > { %v1985_v8 = vpack.c.bf16 %v1258_v1, %v1257_v0  ;;  %v1158_v9 = vmul.f32 %v2413_v63, %v1047_v2  ;;  %v970_v11 = vadd.f32 %v969_v6, %v800_v4  ;;  %v1954_v2 = vld [vmem:[%s2327_s26 + $0x1c4] sm:$0xf0]  ;;  %v1921_v4 = vld [vmem:[%s2327_s26 + $0xc4] sm:$0xf] }
  0xcc   : > { %839 = vmatmul.bf16.gmra.mxu0 %v1657_v60  ;;  %919 = vmatmul.bf16.gmra.mxu2 %v1785_v61  ;;  %v1672_v60 = vld [vmem:[%s2327_s26 + $0xc0] sm:$0xf]  ;;  %v1922_v61 = vld [vmem:[%s2327_s26 + $0xc4] sm:$0xf0]  ;;  %v1953_v6 = vld [vmem:[%s2327_s26 + $0x1c4] sm:$0xf] }
  0xcd   : > { %2137 = vst [vmem:[%s2437_s15 + $0x8] sm:$0xff] %v1985_v8   ;;  %v1226_v10 = vadd.f32 %v2419_v3, %v1158_v9  ;;  %1008 = vmatmul.bf16.gmra.mxu1 %v1661_v62  ;;  %1088 = vmatmul.bf16.gmra.mxu3 %v1789_v5  ;;  %v1127_v17 = vmul.f32 %v2413_v63, %v970_v11  ;;  %v1800_v62 = vld [vmem:[%s2327_s26 + $0x1c0] sm:$0xf]  ;;  %v1674_v5 = vld [vmem:[%s2327_s26 + $0xc8] sm:$0xf0] }
  0xcf   : > { %v1290_v13 = vmax.f32 %v1226_v10, 0.0  ;;  %v880_v14 = vpop.f32.mrf.mxu2  ;;  %v1195_v25 = vadd.f32 %v2419_v3, %v1127_v17 }
  0xd0   : > { %v1049_v15 = vpop.f32.mrf.mxu3 }
  0xd1   : > { %v2065_v16 = vpack.c.bf16 %v1290_v13, %v1289_v12  ;;  %v802_v18 = vpop.f32.mrf.mxu0  ;;  %v1050_v20 = vadd.f32 %v1049_v15, %v880_v14  ;;  %v1259_v39 = vmax.f32 %v1195_v25, 0.0  ;;  %v1673_v12 = vor.u32 %v1922_v61, %v1672_v60 }
  0xd2   : > { %v971_v19 = vpop.f32.mrf.mxu1  ;;  %v1801_v13 = vor.u32 %v1954_v2, %v1800_v62  ;;  %v1677_v14 = vor.u32 %v1921_v4, %v1674_v5 }
  0xd3   : > { %2153 = vst [vmem:[%s2437_s15 + $0x88] sm:$0xff] %v2065_v16   ;;  %v972_v21 = vadd.f32 %v971_v19, %v802_v18  ;;  %v1159_v32 = vmul.f32 %v2413_v63, %v1050_v20  ;;  %v1805_v19 = vor.u32 %v1953_v6, %v1802_v7 }
  0xd5   : > { %v1128_v26 = vmul.f32 %v2413_v63, %v972_v21  ;;  %v1227_v45 = vadd.f32 %v2419_v3, %v1159_v32 }
  0xd7   : > { %v1196_v33 = vadd.f32 %v2419_v3, %v1128_v26  ;;  %v882_v34 = vpop.f32.mrf.mxu2  ;;  %v1291_v50 = vmax.f32 %v1227_v45, 0.0  ;;  %v1810_v45 = vld [vmem:[%s2327_s26 + $0x1d8] sm:$0xf0] }
  0xd8   : > { %v1051_v35 = vpop.f32.mrf.mxu3 }
  0xd9   : > { %v1260_v40 = vmax.f32 %v1196_v33, 0.0  ;;  %v1052_v41 = vadd.f32 %v1051_v35, %v882_v34  ;;  %v805_v42 = vpop.f32.mrf.mxu0 }
  0xda   : > { %v974_v44 = vpop.f32.mrf.mxu1 }
  0xdb   : > { %v1990_v46 = vpack.c.bf16 %v1260_v40, %v1259_v39  ;;  %v1160_v47 = vmul.f32 %v2413_v63, %v1052_v41  ;;  %v975_v49 = vadd.f32 %v974_v44, %v805_v42  ;;  %v1956_v41 = vld [vmem:[%s2327_s26 + $0x1d4] sm:$0xf0]  ;;  %v1923_v42 = vld [vmem:[%s2327_s26 + $0xd4] sm:$0xf] }
  0xdc   : > { %844 = vmatmul.bf16.gmra.mxu0 %v1665_v36  ;;  %924 = vmatmul.bf16.gmra.mxu2 %v1793_v37  ;;  %v1680_v36 = vld [vmem:[%s2327_s26 + $0xd0] sm:$0xf]  ;;  %v1924_v37 = vld [vmem:[%s2327_s26 + $0xd4] sm:$0xf0]  ;;  %v1955_v44 = vld [vmem:[%s2327_s26 + $0x1d4] sm:$0xf] }
  0xdd   : > { %2138 = vst [vmem:[%s2437_s15 + $0x10] sm:$0xff] %v1990_v46   ;;  %v1228_v48 = vadd.f32 %v2419_v3, %v1160_v47  ;;  %1013 = vmatmul.bf16.gmra.mxu1 %v1669_v38  ;;  %1093 = vmatmul.bf16.gmra.mxu3 %v1797_v43  ;;  %v1129_v55 = vmul.f32 %v2413_v63, %v975_v49  ;;  %v1808_v38 = vld [vmem:[%s2327_s26 + $0x1d0] sm:$0xf]  ;;  %v1682_v43 = vld [vmem:[%s2327_s26 + $0xd8] sm:$0xf0] }
  0xdf   : > { %v1292_v51 = vmax.f32 %v1228_v48, 0.0  ;;  %v885_v52 = vpop.f32.mrf.mxu2  ;;  %v1197_v0 = vadd.f32 %v2419_v3, %v1129_v55 }
  0xe0   : > { %v1054_v53 = vpop.f32.mrf.mxu3 }
  0xe1   : > { %v2070_v54 = vpack.c.bf16 %v1292_v51, %v1291_v50  ;;  %v807_v56 = vpop.f32.mrf.mxu0  ;;  %v1055_v58 = vadd.f32 %v1054_v53, %v885_v52  ;;  %v1261_v15 = vmax.f32 %v1197_v0, 0.0  ;;  %v1681_v50 = vor.u32 %v1924_v37, %v1680_v36 }
  0xe2   : > { %v976_v57 = vpop.f32.mrf.mxu1  ;;  %v1809_v51 = vor.u32 %v1956_v41, %v1808_v38  ;;  %v1685_v52 = vor.u32 %v1923_v42, %v1682_v43 }
  0xe3   : > { %2154 = vst [vmem:[%s2437_s15 + $0x90] sm:$0xff] %v2070_v54   ;;  %v977_v59 = vadd.f32 %v976_v57, %v807_v56  ;;  %v1161_v8 = vmul.f32 %v2413_v63, %v1055_v58  ;;  %v1813_v57 = vor.u32 %v1955_v44, %v1810_v45 }
  0xe5   : > { %v1130_v1 = vmul.f32 %v2413_v63, %v977_v59  ;;  %v1229_v21 = vadd.f32 %v2419_v3, %v1161_v8 }
  0xe7   : > { %v1198_v9 = vadd.f32 %v2419_v3, %v1130_v1  ;;  %v887_v10 = vpop.f32.mrf.mxu2  ;;  %v1293_v26 = vmax.f32 %v1229_v21, 0.0  ;;  %v1818_v21 = vld [vmem:[%s2327_s26 + $0x1e8] sm:$0xf0] }
  0xe8   : > { %v1056_v11 = vpop.f32.mrf.mxu3 }
  0xe9   : > { %v1262_v16 = vmax.f32 %v1198_v9, 0.0  ;;  %v1057_v17 = vadd.f32 %v1056_v11, %v887_v10  ;;  %v810_v18 = vpop.f32.mrf.mxu0 }
  0xea   : > { %v979_v20 = vpop.f32.mrf.mxu1 }
  0xeb   : > { %v1995_v22 = vpack.c.bf16 %v1262_v16, %v1261_v15  ;;  %v1162_v23 = vmul.f32 %v2413_v63, %v1057_v17  ;;  %v980_v25 = vadd.f32 %v979_v20, %v810_v18  ;;  %v1958_v17 = vld [vmem:[%s2327_s26 + $0x1e4] sm:$0xf0]  ;;  %v1925_v18 = vld [vmem:[%s2327_s26 + $0xe4] sm:$0xf] }
  0xec   : > { %849 = vmatmul.bf16.gmra.mxu0 %v1673_v12  ;;  %929 = vmatmul.bf16.gmra.mxu2 %v1801_v13  ;;  %v1688_v12 = vld [vmem:[%s2327_s26 + $0xe0] sm:$0xf]  ;;  %v1926_v13 = vld [vmem:[%s2327_s26 + $0xe4] sm:$0xf0]  ;;  %v1957_v20 = vld [vmem:[%s2327_s26 + $0x1e4] sm:$0xf] }
  0xed   : > { %2139 = vst [vmem:[%s2437_s15 + $0x18] sm:$0xff] %v1995_v22   ;;  %v1230_v24 = vadd.f32 %v2419_v3, %v1162_v23  ;;  %1018 = vmatmul.bf16.gmra.mxu1 %v1677_v14  ;;  %1098 = vmatmul.bf16.gmra.mxu3 %v1805_v19  ;;  %v1131_v31 = vmul.f32 %v2413_v63, %v980_v25  ;;  %v1816_v14 = vld [vmem:[%s2327_s26 + $0x1e0] sm:$0xf]  ;;  %v1690_v19 = vld [vmem:[%s2327_s26 + $0xe8] sm:$0xf0] }
  0xef   : > { %v1294_v27 = vmax.f32 %v1230_v24, 0.0  ;;  %v890_v28 = vpop.f32.mrf.mxu2  ;;  %v1199_v39 = vadd.f32 %v2419_v3, %v1131_v31 }
  0xf0   : > { %v1059_v29 = vpop.f32.mrf.mxu3 }
  0xf1   : > { %v2075_v30 = vpack.c.bf16 %v1294_v27, %v1293_v26  ;;  %v812_v32 = vpop.f32.mrf.mxu0  ;;  %v1060_v34 = vadd.f32 %v1059_v29, %v890_v28  ;;  %v1263_v53 = vmax.f32 %v1199_v39, 0.0  ;;  %v1689_v26 = vor.u32 %v1926_v13, %v1688_v12 }
  0xf2   : > { %v981_v33 = vpop.f32.mrf.mxu1  ;;  %v1817_v27 = vor.u32 %v1958_v17, %v1816_v14  ;;  %v1693_v28 = vor.u32 %v1925_v18, %v1690_v19 }
  0xf3   : > { %2155 = vst [vmem:[%s2437_s15 + $0x98] sm:$0xff] %v2075_v30   ;;  %v982_v35 = vadd.f32 %v981_v33, %v812_v32  ;;  %v1163_v46 = vmul.f32 %v2413_v63, %v1060_v34  ;;  %v1821_v33 = vor.u32 %v1957_v20, %v1818_v21 }
  0xf5   : > { %v1132_v40 = vmul.f32 %v2413_v63, %v982_v35  ;;  %v1231_v59 = vadd.f32 %v2419_v3, %v1163_v46 }
  0xf7   : > { %v1200_v47 = vadd.f32 %v2419_v3, %v1132_v40  ;;  %v892_v48 = vpop.f32.mrf.mxu2  ;;  %v1295_v1 = vmax.f32 %v1231_v59, 0.0  ;;  %v1826_v59 = vld [vmem:[%s2327_s26 + $0x1f8] sm:$0xf0] }
  0xf8   : > { %v1061_v49 = vpop.f32.mrf.mxu3 }
  0xf9   : > { %v1264_v54 = vmax.f32 %v1200_v47, 0.0  ;;  %v1062_v55 = vadd.f32 %v1061_v49, %v892_v48  ;;  %v815_v56 = vpop.f32.mrf.mxu0 }
  0xfa   : > { %v984_v58 = vpop.f32.mrf.mxu1 }
  0xfb   : > { %v2000_v60 = vpack.c.bf16 %v1264_v54, %v1263_v53  ;;  %v1164_v61 = vmul.f32 %v2413_v63, %v1062_v55  ;;  %v985_v0 = vadd.f32 %v984_v58, %v815_v56  ;;  %v1960_v55 = vld [vmem:[%s2327_s26 + $0x1f4] sm:$0xf0]  ;;  %v1927_v56 = vld [vmem:[%s2327_s26 + $0xf4] sm:$0xf] }
  0xfc   : > { %854 = vmatmul.bf16.gmra.mxu0 %v1681_v50  ;;  %934 = vmatmul.bf16.gmra.mxu2 %v1809_v51  ;;  %v1696_v50 = vld [vmem:[%s2327_s26 + $0xf0] sm:$0xf]  ;;  %v1928_v51 = vld [vmem:[%s2327_s26 + $0xf4] sm:$0xf0]  ;;  %v1959_v58 = vld [vmem:[%s2327_s26 + $0x1f4] sm:$0xf] }
  0xfd   : > { %2140 = vst [vmem:[%s2437_s15 + $0x20] sm:$0xff] %v2000_v60   ;;  %v1232_v62 = vadd.f32 %v2419_v3, %v1164_v61  ;;  %1023 = vmatmul.bf16.gmra.mxu1 %v1685_v52  ;;  %1103 = vmatmul.bf16.gmra.mxu3 %v1813_v57  ;;  %v1133_v7 = vmul.f32 %v2413_v63, %v985_v0  ;;  %v1824_v52 = vld [vmem:[%s2327_s26 + $0x1f0] sm:$0xf]  ;;  %v1698_v57 = vld [vmem:[%s2327_s26 + $0xf8] sm:$0xf0] }
  0xff   : > { %v1296_v2 = vmax.f32 %v1232_v62, 0.0  ;;  %v895_v4 = vpop.f32.mrf.mxu2  ;;  %v1201_v15 = vadd.f32 %v2419_v3, %v1133_v7 }
 0x100   : > { %v1064_v5 = vpop.f32.mrf.mxu3 }
 0x101   : > { %v2080_v6 = vpack.c.bf16 %v1296_v2, %v1295_v1  ;;  %v817_v8 = vpop.f32.mrf.mxu0  ;;  %v1065_v10 = vadd.f32 %v1064_v5, %v895_v4  ;;  %v1265_v29 = vmax.f32 %v1201_v15, 0.0  ;;  %v1697_v1 = vor.u32 %v1928_v51, %v1696_v50 }
 0x102   : > { %v986_v9 = vpop.f32.mrf.mxu1  ;;  %v1825_v2 = vor.u32 %v1960_v55, %v1824_v52  ;;  %v1701_v4 = vor.u32 %v1927_v56, %v1698_v57 }
 0x103   : > { %2156 = vst [vmem:[%s2437_s15 + $0xa0] sm:$0xff] %v2080_v6   ;;  %v987_v11 = vadd.f32 %v986_v9, %v817_v8  ;;  %v1165_v22 = vmul.f32 %v2413_v63, %v1065_v10  ;;  %v1829_v9 = vor.u32 %v1959_v58, %v1826_v59 }
 0x105   : > { %v1134_v16 = vmul.f32 %v2413_v63, %v987_v11  ;;  %v1233_v35 = vadd.f32 %v2419_v3, %v1165_v22 }
 0x107   : > { %v1202_v23 = vadd.f32 %v2419_v3, %v1134_v16  ;;  %v897_v24 = vpop.f32.mrf.mxu2  ;;  %v1297_v40 = vmax.f32 %v1233_v35, 0.0 }
 0x108   : > { %v1066_v25 = vpop.f32.mrf.mxu3 }
 0x109   : > { %v1266_v30 = vmax.f32 %v1202_v23, 0.0  ;;  %v1067_v31 = vadd.f32 %v1066_v25, %v897_v24  ;;  %v820_v32 = vpop.f32.mrf.mxu0 }
 0x10a   : > { %v989_v34 = vpop.f32.mrf.mxu1 }
 0x10b   : > { %v2005_v36 = vpack.c.bf16 %v1266_v30, %v1265_v29  ;;  %v1166_v37 = vmul.f32 %v2413_v63, %v1067_v31  ;;  %v990_v39 = vadd.f32 %v989_v34, %v820_v32 }
 0x10c   : > { %859 = vmatmul.bf16.gmra.mxu0 %v1689_v26  ;;  %939 = vmatmul.bf16.gmra.mxu2 %v1817_v27 }
 0x10d   : > { %2141 = vst [vmem:[%s2437_s15 + $0x28] sm:$0xff] %v2005_v36   ;;  %v1234_v38 = vadd.f32 %v2419_v3, %v1166_v37  ;;  %1028 = vmatmul.bf16.gmra.mxu1 %v1693_v28  ;;  %1108 = vmatmul.bf16.gmra.mxu3 %v1821_v33  ;;  %v1135_v45 = vmul.f32 %v2413_v63, %v990_v39 }
 0x10f   : > { %v1298_v41 = vmax.f32 %v1234_v38, 0.0  ;;  %v900_v42 = vpop.f32.mrf.mxu2  ;;  %v1203_v53 = vadd.f32 %v2419_v3, %v1135_v45 }
 0x110   : > { %v1069_v43 = vpop.f32.mrf.mxu3 }
 0x111   : > { %v2085_v44 = vpack.c.bf16 %v1298_v41, %v1297_v40  ;;  %v822_v46 = vpop.f32.mrf.mxu0  ;;  %v1070_v48 = vadd.f32 %v1069_v43, %v900_v42  ;;  %v1267_v5 = vmax.f32 %v1203_v53, 0.0 }
 0x112   : > { %v991_v47 = vpop.f32.mrf.mxu1 }
 0x113   : > { %2157 = vst [vmem:[%s2437_s15 + $0xa8] sm:$0xff] %v2085_v44   ;;  %v992_v49 = vadd.f32 %v991_v47, %v822_v46  ;;  %v1167_v60 = vmul.f32 %v2413_v63, %v1070_v48 }
 0x115   : > { %v1136_v54 = vmul.f32 %v2413_v63, %v992_v49  ;;  %v1235_v11 = vadd.f32 %v2419_v3, %v1167_v60 }
 0x117   : > { %v1204_v61 = vadd.f32 %v2419_v3, %v1136_v54  ;;  %v902_v62 = vpop.f32.mrf.mxu2  ;;  %v1299_v16 = vmax.f32 %v1235_v11, 0.0 }
 0x118   : > { %v1071_v0 = vpop.f32.mrf.mxu3 }
 0x119   : > { %v1268_v6 = vmax.f32 %v1204_v61, 0.0  ;;  %v1072_v7 = vadd.f32 %v1071_v0, %v902_v62  ;;  %v825_v8 = vpop.f32.mrf.mxu0 }
 0x11a   : > { %v994_v10 = vpop.f32.mrf.mxu1 }
 0x11b   : > { %v2010_v12 = vpack.c.bf16 %v1268_v6, %v1267_v5  ;;  %v1168_v13 = vmul.f32 %v2413_v63, %v1072_v7  ;;  %v995_v15 = vadd.f32 %v994_v10, %v825_v8 }
 0x11c   : > { %864 = vmatmul.bf16.gmra.mxu0 %v1697_v1  ;;  %944 = vmatmul.bf16.gmra.mxu2 %v1825_v2 }
 0x11d   : > { %2142 = vst [vmem:[%s2437_s15 + $0x30] sm:$0xff] %v2010_v12   ;;  %v1236_v14 = vadd.f32 %v2419_v3, %v1168_v13  ;;  %1033 = vmatmul.bf16.gmra.mxu1 %v1701_v4  ;;  %1113 = vmatmul.bf16.gmra.mxu3 %v1829_v9  ;;  %v1137_v21 = vmul.f32 %v2413_v63, %v995_v15 }
 0x11f   : > { %v1300_v17 = vmax.f32 %v1236_v14, 0.0  ;;  %v905_v18 = vpop.f32.mrf.mxu2  ;;  %v1205_v26 = vadd.f32 %v2419_v3, %v1137_v21 }
 0x120   : > { %v1074_v19 = vpop.f32.mrf.mxu3 }
 0x121   : > { %v2090_v20 = vpack.c.bf16 %v1300_v17, %v1299_v16  ;;  %v827_v22 = vpop.f32.mrf.mxu0  ;;  %v1075_v24 = vadd.f32 %v1074_v19, %v905_v18  ;;  %v1269_v32 = vmax.f32 %v1205_v26, 0.0 }
 0x122   : > { %v996_v23 = vpop.f32.mrf.mxu1 }
 0x123   : > { %2158 = vst [vmem:[%s2437_s15 + $0xb0] sm:$0xff] %v2090_v20   ;;  %v997_v25 = vadd.f32 %v996_v23, %v827_v22  ;;  %v1169_v28 = vmul.f32 %v2413_v63, %v1075_v24 }
 0x125   : > { %v1138_v27 = vmul.f32 %v2413_v63, %v997_v25  ;;  %v1237_v37 = vadd.f32 %v2419_v3, %v1169_v28 }
 0x127   : > { %v1206_v29 = vadd.f32 %v2419_v3, %v1138_v27  ;;  %v907_v30 = vpop.f32.mrf.mxu2  ;;  %v1301_v42 = vmax.f32 %v1237_v37, 0.0 }
 0x128   : > { %v1076_v31 = vpop.f32.mrf.mxu3 }
 0x129   : > { %v1270_v33 = vmax.f32 %v1206_v29, 0.0  ;;  %v1077_v34 = vadd.f32 %v1076_v31, %v907_v30  ;;  %v830_v35 = vpop.f32.mrf.mxu0 }
 0x12a   : > { %v999_v36 = vpop.f32.mrf.mxu1 }
 0x12b   : > { %v2015_v38 = vpack.c.bf16 %v1270_v33, %v1269_v32  ;;  %v1170_v39 = vmul.f32 %v2413_v63, %v1077_v34  ;;  %v1000_v41 = vadd.f32 %v999_v36, %v830_v35 }
 0x12d   : > { %2143 = vst [vmem:[%s2437_s15 + $0x38] sm:$0xff] %v2015_v38   ;;  %v1238_v40 = vadd.f32 %v2419_v3, %v1170_v39  ;;  %v1139_v47 = vmul.f32 %v2413_v63, %v1000_v41 }
 0x12f   : > { %v1302_v43 = vmax.f32 %v1238_v40, 0.0  ;;  %v910_v44 = vpop.f32.mrf.mxu2  ;;  %v1207_v52 = vadd.f32 %v2419_v3, %v1139_v47 }
 0x130   : > { %v1079_v45 = vpop.f32.mrf.mxu3 }
 0x131   : > { %v2095_v46 = vpack.c.bf16 %v1302_v43, %v1301_v42  ;;  %v832_v48 = vpop.f32.mrf.mxu0  ;;  %v1080_v50 = vadd.f32 %v1079_v45, %v910_v44  ;;  %v1271_v58 = vmax.f32 %v1207_v52, 0.0 }
 0x132   : > { %v1001_v49 = vpop.f32.mrf.mxu1 }
 0x133   : > { %2159 = vst [vmem:[%s2437_s15 + $0xb8] sm:$0xff] %v2095_v46   ;;  %v1002_v51 = vadd.f32 %v1001_v49, %v832_v48  ;;  %v1171_v54 = vmul.f32 %v2413_v63, %v1080_v50 }
 0x135   : > { %v1140_v53 = vmul.f32 %v2413_v63, %v1002_v51  ;;  %v1239_v0 = vadd.f32 %v2419_v3, %v1171_v54 }
 0x137   : > { %v1208_v55 = vadd.f32 %v2419_v3, %v1140_v53  ;;  %v912_v56 = vpop.f32.mrf.mxu2  ;;  %v1303_v6 = vmax.f32 %v1239_v0, 0.0 }
 0x138   : > { %v1081_v57 = vpop.f32.mrf.mxu3 }
 0x139   : > { %v1272_v59 = vmax.f32 %v1208_v55, 0.0  ;;  %v1082_v60 = vadd.f32 %v1081_v57, %v912_v56  ;;  %v835_v61 = vpop.f32.mrf.mxu0 }
 0x13a   : > { %v1004_v62 = vpop.f32.mrf.mxu1 }
 0x13b   : > { %v2020_v1 = vpack.c.bf16 %v1272_v59, %v1271_v58  ;;  %v1172_v2 = vmul.f32 %v2413_v63, %v1082_v60  ;;  %v1005_v5 = vadd.f32 %v1004_v62, %v835_v61 }
 0x13d   : > { %2144 = vst [vmem:[%s2437_s15 + $0x40] sm:$0xff] %v2020_v1   ;;  %v1240_v4 = vadd.f32 %v2419_v3, %v1172_v2  ;;  %v1141_v11 = vmul.f32 %v2413_v63, %v1005_v5 }
 0x13f   : > { %v1304_v7 = vmax.f32 %v1240_v4, 0.0  ;;  %v915_v8 = vpop.f32.mrf.mxu2  ;;  %v1209_v16 = vadd.f32 %v2419_v3, %v1141_v11 }
 0x140   : > { %v1084_v9 = vpop.f32.mrf.mxu3 }
 0x141   : > { %v2100_v10 = vpack.c.bf16 %v1304_v7, %v1303_v6  ;;  %v837_v12 = vpop.f32.mrf.mxu0  ;;  %v1085_v14 = vadd.f32 %v1084_v9, %v915_v8  ;;  %v1273_v22 = vmax.f32 %v1209_v16, 0.0 }
 0x142   : > { %v1006_v13 = vpop.f32.mrf.mxu1 }
 0x143   : > { %2160 = vst [vmem:[%s2437_s15 + $0xc0] sm:$0xff] %v2100_v10   ;;  %v1007_v15 = vadd.f32 %v1006_v13, %v837_v12  ;;  %v1173_v18 = vmul.f32 %v2413_v63, %v1085_v14 }
 0x145   : > { %v1142_v17 = vmul.f32 %v2413_v63, %v1007_v15  ;;  %v1241_v27 = vadd.f32 %v2419_v3, %v1173_v18 }
 0x147   : > { %v1210_v19 = vadd.f32 %v2419_v3, %v1142_v17  ;;  %v917_v20 = vpop.f32.mrf.mxu2  ;;  %v1305_v32 = vmax.f32 %v1241_v27, 0.0 }
 0x148   : > { %v1086_v21 = vpop.f32.mrf.mxu3 }
 0x149   : > { %v1274_v23 = vmax.f32 %v1210_v19, 0.0  ;;  %v1087_v24 = vadd.f32 %v1086_v21, %v917_v20  ;;  %v840_v25 = vpop.f32.mrf.mxu0 }
 0x14a   : > { %v1009_v26 = vpop.f32.mrf.mxu1 }
 0x14b   : > { %v2025_v28 = vpack.c.bf16 %v1274_v23, %v1273_v22  ;;  %v1174_v29 = vmul.f32 %v2413_v63, %v1087_v24  ;;  %v1010_v31 = vadd.f32 %v1009_v26, %v840_v25 }
 0x14d   : > { %2145 = vst [vmem:[%s2437_s15 + $0x48] sm:$0xff] %v2025_v28   ;;  %v1242_v30 = vadd.f32 %v2419_v3, %v1174_v29  ;;  %v1143_v37 = vmul.f32 %v2413_v63, %v1010_v31 }
 0x14f   : > { %v1306_v33 = vmax.f32 %v1242_v30, 0.0  ;;  %v920_v34 = vpop.f32.mrf.mxu2  ;;  %v1211_v42 = vadd.f32 %v2419_v3, %v1143_v37 }
 0x150   : > { %v1089_v35 = vpop.f32.mrf.mxu3 }
 0x151   : > { %v2105_v36 = vpack.c.bf16 %v1306_v33, %v1305_v32  ;;  %v842_v38 = vpop.f32.mrf.mxu0  ;;  %v1090_v40 = vadd.f32 %v1089_v35, %v920_v34  ;;  %v1275_v48 = vmax.f32 %v1211_v42, 0.0 }
 0x152   : > { %v1011_v39 = vpop.f32.mrf.mxu1 }
 0x153   : > { %2161 = vst [vmem:[%s2437_s15 + $0xc8] sm:$0xff] %v2105_v36   ;;  %v1012_v41 = vadd.f32 %v1011_v39, %v842_v38  ;;  %v1175_v44 = vmul.f32 %v2413_v63, %v1090_v40 }
 0x155   : > { %v1144_v43 = vmul.f32 %v2413_v63, %v1012_v41  ;;  %v1243_v53 = vadd.f32 %v2419_v3, %v1175_v44 }
 0x157   : > { %v1212_v45 = vadd.f32 %v2419_v3, %v1144_v43  ;;  %v922_v46 = vpop.f32.mrf.mxu2  ;;  %v1307_v58 = vmax.f32 %v1243_v53, 0.0 }
 0x158   : > { %v1091_v47 = vpop.f32.mrf.mxu3 }
 0x159   : > { %v1276_v49 = vmax.f32 %v1212_v45, 0.0  ;;  %v1092_v50 = vadd.f32 %v1091_v47, %v922_v46  ;;  %v845_v51 = vpop.f32.mrf.mxu0 }
 0x15a   : > { %v1014_v52 = vpop.f32.mrf.mxu1 }
 0x15b   : > { %v2030_v54 = vpack.c.bf16 %v1276_v49, %v1275_v48  ;;  %v1176_v55 = vmul.f32 %v2413_v63, %v1092_v50  ;;  %v1015_v57 = vadd.f32 %v1014_v52, %v845_v51 }
 0x15d   : > { %2146 = vst [vmem:[%s2437_s15 + $0x50] sm:$0xff] %v2030_v54   ;;  %v1244_v56 = vadd.f32 %v2419_v3, %v1176_v55  ;;  %v1145_v0 = vmul.f32 %v2413_v63, %v1015_v57 }
 0x15f   : > { %v1308_v59 = vmax.f32 %v1244_v56, 0.0  ;;  %v925_v60 = vpop.f32.mrf.mxu2  ;;  %v1213_v6 = vadd.f32 %v2419_v3, %v1145_v0 }
 0x160   : > { %v1094_v61 = vpop.f32.mrf.mxu3 }
 0x161   : > { %v2110_v62 = vpack.c.bf16 %v1308_v59, %v1307_v58  ;;  %v847_v1 = vpop.f32.mrf.mxu0  ;;  %v1095_v4 = vadd.f32 %v1094_v61, %v925_v60  ;;  %v1277_v12 = vmax.f32 %v1213_v6, 0.0 }
 0x162   : > { %v1016_v2 = vpop.f32.mrf.mxu1 }
 0x163   : > { %2162 = vst [vmem:[%s2437_s15 + $0xd0] sm:$0xff] %v2110_v62   ;;  %v1017_v5 = vadd.f32 %v1016_v2, %v847_v1  ;;  %v1177_v8 = vmul.f32 %v2413_v63, %v1095_v4 }
 0x165   : > { %v1146_v7 = vmul.f32 %v2413_v63, %v1017_v5  ;;  %v1245_v17 = vadd.f32 %v2419_v3, %v1177_v8 }
 0x167   : > { %v1214_v9 = vadd.f32 %v2419_v3, %v1146_v7  ;;  %v927_v10 = vpop.f32.mrf.mxu2  ;;  %v1309_v22 = vmax.f32 %v1245_v17, 0.0 }
 0x168   : > { %v1096_v11 = vpop.f32.mrf.mxu3 }
 0x169   : > { %v1278_v13 = vmax.f32 %v1214_v9, 0.0  ;;  %v1097_v14 = vadd.f32 %v1096_v11, %v927_v10  ;;  %v850_v15 = vpop.f32.mrf.mxu0 }
 0x16a   : > { %v1019_v16 = vpop.f32.mrf.mxu1 }
 0x16b   : > { %v2035_v18 = vpack.c.bf16 %v1278_v13, %v1277_v12  ;;  %v1178_v19 = vmul.f32 %v2413_v63, %v1097_v14  ;;  %v1020_v21 = vadd.f32 %v1019_v16, %v850_v15 }
 0x16d   : > { %2147 = vst [vmem:[%s2437_s15 + $0x58] sm:$0xff] %v2035_v18   ;;  %v1246_v20 = vadd.f32 %v2419_v3, %v1178_v19  ;;  %v1147_v27 = vmul.f32 %v2413_v63, %v1020_v21 }
 0x16f   : > { %v1310_v23 = vmax.f32 %v1246_v20, 0.0  ;;  %v930_v24 = vpop.f32.mrf.mxu2  ;;  %v1215_v32 = vadd.f32 %v2419_v3, %v1147_v27 }
 0x170   : > { %v1099_v25 = vpop.f32.mrf.mxu3 }
 0x171   : > { %v2115_v26 = vpack.c.bf16 %v1310_v23, %v1309_v22  ;;  %v852_v28 = vpop.f32.mrf.mxu0  ;;  %v1100_v30 = vadd.f32 %v1099_v25, %v930_v24  ;;  %v1279_v38 = vmax.f32 %v1215_v32, 0.0  ;;  %v2210_v23 = vld [vmem:[%s2645_s2] ss:$0 sm:$0xff] }
 0x172   : > { %v1021_v29 = vpop.f32.mrf.mxu1 }
 0x173   : > { %2163 = vst [vmem:[%s2437_s15 + $0xd8] sm:$0xff] %v2115_v26   ;;  %v1022_v31 = vadd.f32 %v1021_v29, %v852_v28  ;;  %v1179_v34 = vmul.f32 %v2413_v63, %v1100_v30  ;;  %v2211_v26 = vld [vmem:[%s2646_s3] ss:$0 sm:$0xff] }
 0x175   : > { %v1148_v33 = vmul.f32 %v2413_v63, %v1022_v31  ;;  %v1247_v43 = vadd.f32 %v2419_v3, %v1179_v34 }
 0x177   : > { %v1216_v35 = vadd.f32 %v2419_v3, %v1148_v33  ;;  %v932_v36 = vpop.f32.mrf.mxu2  ;;  %v1311_v48 = vmax.f32 %v1247_v43, 0.0 }
 0x178   : > { %v1101_v37 = vpop.f32.mrf.mxu3 }
 0x179   : > { %v1280_v39 = vmax.f32 %v1216_v35, 0.0  ;;  %v1102_v40 = vadd.f32 %v1101_v37, %v932_v36  ;;  %v855_v41 = vpop.f32.mrf.mxu0 }
 0x17a   : > { %v1024_v42 = vpop.f32.mrf.mxu1 }
 0x17b   : > { %v2040_v44 = vpack.c.bf16 %v1280_v39, %v1279_v38  ;;  %v1180_v45 = vmul.f32 %v2413_v63, %v1102_v40  ;;  %v1025_v47 = vadd.f32 %v1024_v42, %v855_v41 }
 0x17d   : > { %2148 = vst [vmem:[%s2437_s15 + $0x60] sm:$0xff] %v2040_v44   ;;  %v1248_v46 = vadd.f32 %v2419_v3, %v1180_v45  ;;  %v1149_v53 = vmul.f32 %v2413_v63, %v1025_v47 }
 0x17f   : > { %v1312_v49 = vmax.f32 %v1248_v46, 0.0  ;;  %v935_v50 = vpop.f32.mrf.mxu2  ;;  %v1217_v58 = vadd.f32 %v2419_v3, %v1149_v53 }
 0x180   : > { %v1104_v51 = vpop.f32.mrf.mxu3 }
 0x181   : > { %v2120_v52 = vpack.c.bf16 %v1312_v49, %v1311_v48  ;;  %v857_v54 = vpop.f32.mrf.mxu0  ;;  %v1105_v56 = vadd.f32 %v1104_v51, %v935_v50  ;;  %v1281_v1 = vmax.f32 %v1217_v58, 0.0 }
 0x182   : > { %v1026_v55 = vpop.f32.mrf.mxu1 }
 0x183   : > { %2164 = vst [vmem:[%s2437_s15 + $0xe0] sm:$0xff] %v2120_v52   ;;  %v1027_v57 = vadd.f32 %v1026_v55, %v857_v54  ;;  %v1181_v60 = vmul.f32 %v2413_v63, %v1105_v56 }
 0x185   : > { %v1150_v59 = vmul.f32 %v2413_v63, %v1027_v57  ;;  %v1249_v7 = vadd.f32 %v2419_v3, %v1181_v60 }
 0x187   : > { %v1218_v61 = vadd.f32 %v2419_v3, %v1150_v59  ;;  %v937_v62 = vpop.f32.mrf.mxu2  ;;  %v1313_v12 = vmax.f32 %v1249_v7, 0.0 }
 0x188   : > { %v1106_v0 = vpop.f32.mrf.mxu3 }
 0x189   : > { %v1282_v2 = vmax.f32 %v1218_v61, 0.0  ;;  %v1107_v4 = vadd.f32 %v1106_v0, %v937_v62  ;;  %v860_v5 = vpop.f32.mrf.mxu0 }
 0x18a   : > { %v1029_v6 = vpop.f32.mrf.mxu1 }
 0x18b   : > { %v2045_v8 = vpack.c.bf16 %v1282_v2, %v1281_v1  ;;  %v1182_v9 = vmul.f32 %v2413_v63, %v1107_v4  ;;  %v1030_v11 = vadd.f32 %v1029_v6, %v860_v5 }
 0x18d   : > { %2149 = vst [vmem:[%s2437_s15 + $0x68] sm:$0xff] %v2045_v8   ;;  %v1250_v10 = vadd.f32 %v2419_v3, %v1182_v9  ;;  %v1151_v17 = vmul.f32 %v2413_v63, %v1030_v11 }
 0x18f   : > { %v1314_v13 = vmax.f32 %v1250_v10, 0.0  ;;  %v940_v14 = vpop.f32.mrf.mxu2  ;;  %v1219_v22 = vadd.f32 %v2419_v3, %v1151_v17 }
 0x190   : > { %v1109_v15 = vpop.f32.mrf.mxu3 }
 0x191   : > { %v2125_v16 = vpack.c.bf16 %v1314_v13, %v1313_v12  ;;  %v862_v18 = vpop.f32.mrf.mxu0  ;;  %v1110_v20 = vadd.f32 %v1109_v15, %v940_v14  ;;  %v1283_v29 = vmax.f32 %v1219_v22, 0.0 }
 0x192   : > { %v1031_v19 = vpop.f32.mrf.mxu1 }
 0x193   : > { %2165 = vst [vmem:[%s2437_s15 + $0xe8] sm:$0xff] %v2125_v16   ;;  %v1032_v21 = vadd.f32 %v1031_v19, %v862_v18  ;;  %v1183_v25 = vmul.f32 %v2210_v23, %v1110_v20 }
 0x195   : > { %v1152_v24 = vmul.f32 %v2210_v23, %v1032_v21  ;;  %v1251_v33 = vadd.f32 %v2211_v26, %v1183_v25 }
 0x197   : > { %v1220_v27 = vadd.f32 %v2211_v26, %v1152_v24  ;;  %v942_v63 = vpop.f32.mrf.mxu2  ;;  %v1315_v38 = vmax.f32 %v1251_v33, 0.0 }
 0x198   : > { %v1111_v28 = vpop.f32.mrf.mxu3 }
 0x199   : > { %v1284_v30 = vmax.f32 %v1220_v27, 0.0  ;;  %v1112_v31 = vadd.f32 %v1111_v28, %v942_v63  ;;  %v865_v32 = vpop.f32.mrf.mxu0 }
 0x19a   : > { %v1034_v3 = vpop.f32.mrf.mxu1 }
 0x19b   : > { %v2050_v34 = vpack.c.bf16 %v1284_v30, %v1283_v29  ;;  %v1184_v35 = vmul.f32 %v2210_v23, %v1112_v31  ;;  %v1035_v37 = vadd.f32 %v1034_v3, %v865_v32 }
 0x19d   : > { %2150 = vst [vmem:[%s2437_s15 + $0x70] sm:$0xff] %v2050_v34   ;;  %v1252_v36 = vadd.f32 %v2211_v26, %v1184_v35  ;;  %v1153_v43 = vmul.f32 %v2210_v23, %v1035_v37 }
 0x19f   : > { %v1316_v39 = vmax.f32 %v1252_v36, 0.0  ;;  %v945_v40 = vpop.f32.mrf.mxu2  ;;  %v1221_v48 = vadd.f32 %v2211_v26, %v1153_v43 }
 0x1a0   : > { %v1114_v41 = vpop.f32.mrf.mxu3 }
 0x1a1   : > { %v2130_v42 = vpack.c.bf16 %v1316_v39, %v1315_v38  ;;  %v867_v44 = vpop.f32.mrf.mxu0  ;;  %v1115_v46 = vadd.f32 %v1114_v41, %v945_v40  ;;  %v1285_v54 = vmax.f32 %v1221_v48, 0.0 }
 0x1a2   : > { %v1036_v45 = vpop.f32.mrf.mxu1 }
 0x1a3   : > { %2166 = vst [vmem:[%s2437_s15 + $0xf0] sm:$0xff] %v2130_v42   ;;  %v1037_v47 = vadd.f32 %v1036_v45, %v867_v44  ;;  %v1185_v50 = vmul.f32 %v2210_v23, %v1115_v46 }
 0x1a5   : > { %v1154_v49 = vmul.f32 %v2210_v23, %v1037_v47  ;;  %v1253_v57 = vadd.f32 %v2211_v26, %v1185_v50 }
 0x1a7   : > { %v1222_v51 = vadd.f32 %v2211_v26, %v1154_v49  ;;  %v947_v52 = vpop.f32.mrf.mxu2  ;;  %v1317_v61 = vmax.f32 %v1253_v57, 0.0 }
 0x1a8   : > { %v1116_v53 = vpop.f32.mrf.mxu3 }
 0x1a9   : > { %v1286_v55 = vmax.f32 %v1222_v51, 0.0  ;;  %v1117_v56 = vadd.f32 %v1116_v53, %v947_v52 }
 0x1ab   : > { %v2055_v58 = vpack.c.bf16 %v1286_v55, %v1285_v54  ;;  %v1186_v59 = vmul.f32 %v2210_v23, %v1117_v56 }
 0x1ad   : > { %2151 = vst [vmem:[%s2437_s15 + $0x78] sm:$0xff] %v2055_v58   ;;  %v1254_v60 = vadd.f32 %v2211_v26, %v1186_v59 }
 0x1af   : > { %v1318_v62 = vmax.f32 %v1254_v60, 0.0 }
 0x1b1   : > { %v2135_v0 = vpack.c.bf16 %v1318_v62, %v1317_v61 }
 0x1b3   : > { %2167 = vst [vmem:[%s2437_s15 + $0xf8] sm:$0xff] %v2135_v0  }
 0x1b4 PF: > { %s14_s17 = sadd.s32 1, %s2234_s17   ;;  %s2648_s15 = smov %s2230_s16 }
 0x1b5   : > { %p11_p5 = scmp.ge.s32.totalorder %s14_s17, 4   ;;  %s2649_s16 = smov %s2651_s18 }
 0x1b7   :  { %13 = sbr.rel (!%p11_p5) target bundleno = 2 (0x2), region = 75 }

// kernel: _lambda_.23
= control target key start
LH: loop header
LB: loop body
LE: loop exit
PB: predicated region body
PF: predicated region fallthrough
CT: control target
= control target key end

     0   :  { %s2957_s15 = smov 0   ;;  %s2959_s16 = smov 0   ;;  %s3589_s0 = inlined_call_operand.vmem [shape: bf16[1024,384], index: 0, kind: input, shape index: {}]   ;;  %s3590_s1 = inlined_call_operand.vmem [shape: bf16[384,128], index: 1, kind: input, shape index: {}]   ;;  %s3591_s2 = inlined_call_operand.vmem [shape: f32[1,128], index: 2, kind: input, shape index: {}]   ;;  %s3592_s3 = inlined_call_operand.vmem [shape: f32[1,128], index: 3, kind: input, shape index: {}]   ;;  %s3593_s4 = inlined_call_operand.vmem [shape: bf16[1024,128], index: 4, kind: output, shape index: {}]  }
   0x1   :  { %s2961_s17 = smov 0  }
   0x2 LB: > { %s26_s18 = sadd.s32 1, %s2926_s16  ;;  %p2057_p0 = scmp.ge.s32.totalorder %s2930_s17, 1  ;;  %s2930_s17 = sphi %s2961_s17, %s14_s17   ;;  %s2926_s16 = sphi %s2959_s16, %s3595_s16   ;;  %s2922_s15 = sphi %s2957_s15, %s3594_s15  }
   0x3   : > { %p28_p1 = scmp.ge.s32.totalorder %s26_s18, 2  ;;  %p203_p2 = scmp.lt.s32.totalorder %s2930_s17, 3 }
   0x5   : > { %s3597_s18 = smov (%p28_p1, %s26_s18), 0  ;;  %p204_p3 = pnand %p2057_p0, %p203_p2 }
   0x6   : > { %s2058_s11 = sshll.u32 (!%p204_p3), %s2922_s15, 6 }
   0x7   : > { %207 = sbr.rel (%p204_p3) target bundleno = 565 (0x235), region = 36  ;;  %p244_p4 = scmp.lt.s32.totalorder (!%p204_p3), %s2058_s11, 127 }
   0xc   : > { %v2647_v0 = vld [vmem:[%s3590_s1 + $0x38] sm:$0xff]  ;;  %v2646_v3 = vld [vmem:[%s3590_s1 + $0x30] sm:$0xff]  ;;  %v2645_v6 = vld [vmem:[%s3590_s1 + $0x28] sm:$0xff]  ;;  %s3599_s11 = smov (!%p244_p4, %s2058_s11), 127 }
   0xd   : > { %v2983_v1 = vld [vmem:[%s3590_s1 + $0x78] sm:$0xff]  ;;  %1101 = vmatpush.bf16.msra.mxu0 %v2647_v0  ;;  %2855 = vmatpush.bf16.msra.mxu3 %v2647_v0  ;;  %v2998_v4 = vld [vmem:[%s3590_s1 + $0x70] sm:$0xff]  ;;  %v3013_v7 = vld [vmem:[%s3590_s1 + $0x68] sm:$0xff]  ;;  %s2879_s29 = smul.u32 12, %s3599_s11  ;;  %s2061_s5 = sshll.u32 %s3599_s11, 2 }
   0xe   : > { %v2988_v2 = vld [vmem:[%s3590_s1 + $0xb8] sm:$0xff]  ;;  %1270 = vmatpush.bf16.msra.mxu1 %v2983_v1  ;;  %v3003_v5 = vld [vmem:[%s3590_s1 + $0xb0] sm:$0xff]  ;;  %v3018_v8 = vld [vmem:[%s3590_s1 + $0xa8] sm:$0xff]  ;;  %s3210_s11 = scalar_lea.vmem %s3593_s4, %s2061_s5 }
   0xf   : > { %1439 = vmatpush.bf16.msra.mxu2 %v2988_v2  ;;  %v2644_v9 = vld [vmem:[%s3590_s1 + $0x20] sm:$0xff]  ;;  %v2643_v12 = vld [vmem:[%s3590_s1 + $0x18] sm:$0xff]  ;;  %v2642_v15 = vld [vmem:[%s3590_s1 + $0x10] sm:$0xff]  ;;  %s3070_s13 = scalar_lea.vmem %s3589_s0, %s2879_s29 }
  0x10   : > { %v3027_v10 = vld [vmem:[%s3590_s1 + $0x60] sm:$0xff]  ;;  %v2651_v13 = vld [vmem:[%s3590_s1 + $0x58] sm:$0xff]  ;;  %v2650_v16 = vld [vmem:[%s3590_s1 + $0x50] sm:$0xff] }
  0x11   : > { %1102 = vmatpush.bf16.msra.mxu0 %v2646_v3  ;;  %2856 = vmatpush.bf16.msra.mxu3 %v2646_v3  ;;  %v3034_v11 = vld [vmem:[%s3590_s1 + $0xa0] sm:$0xff]  ;;  %v3049_v14 = vld [vmem:[%s3590_s1 + $0x98] sm:$0xff]  ;;  %v3062_v17 = vld [vmem:[%s3590_s1 + $0x90] sm:$0xff] }
  0x12   : > { %1271 = vmatpush.bf16.msra.mxu1 %v2998_v4  ;;  %v2641_v18 = vld [vmem:[%s3590_s1 + $0x8] sm:$0xff]  ;;  %v2640_v21 = vld [vmem:[%s3590_s1] sm:$0xff]  ;;  %v2066_v29 = vld [vmem:[%s3070_s13 + $0xc] sm:$0xf0] }
  0x13   : > { %1440 = vmatpush.bf16.msra.mxu2 %v3003_v5  ;;  %v2649_v19 = vld [vmem:[%s3590_s1 + $0x48] sm:$0xff]  ;;  %v2648_v22 = vld [vmem:[%s3590_s1 + $0x40] sm:$0xff]  ;;  %v2546_v31 = vld [vmem:[%s3070_s13 + $0x10] sm:$0xf0] }
  0x14   : > { %v3079_v20 = vld [vmem:[%s3590_s1 + $0x88] sm:$0xff]  ;;  %v3090_v23 = vld [vmem:[%s3590_s1 + $0x80] sm:$0xff]  ;;  %v2076_v36 = vld [vmem:[%s3070_s13 + $0x18] sm:$0xf] }
  0x15   : > { %1103 = vmatpush.bf16.msra.mxu0 %v2645_v6  ;;  %2857 = vmatpush.bf16.msra.mxu3 %v2645_v6  ;;  %v2064_v24 = vld [vmem:[%s3070_s13] sm:$0xf]  ;;  %v2545_v25 = vld [vmem:[%s3070_s13 + $0x8] sm:$0xf0]  ;;  %v2544_v28 = vld [vmem:[%s3070_s13 + $0x4] sm:$0xf] }
  0x16   : > { %1272 = vmatpush.bf16.msra.mxu1 %v3013_v7  ;;  %v2352_v26 = vld [vmem:[%s3070_s13 + $0x240] sm:$0xf]  ;;  %v2617_v27 = vld [vmem:[%s3070_s13 + $0x248] sm:$0xf0]  ;;  %v2072_v30 = vld [vmem:[%s3070_s13 + $0x8] sm:$0xf]  ;;  %v2065_v32 = vor.u32 %v2545_v25, %v2064_v24  ;;  %v2069_v34 = vor.u32 %v2544_v28, %v2066_v29 }
  0x17   : > { %1441 = vmatpush.bf16.msra.mxu2 %v3018_v8  ;;  %v2353_v33 = vor.u32 %v2617_v27, %v2352_v26  ;;  %v2073_v35 = vor.u32 %v2546_v31, %v2072_v30  ;;  %v2548_v37 = vld [vmem:[%s3070_s13 + $0x20] sm:$0xf0]  ;;  %v2364_v38 = vld [vmem:[%s3070_s13 + $0x258] sm:$0xf]  ;;  %v2547_v40 = vld [vmem:[%s3070_s13 + $0x1c] sm:$0xf] }
  0x18   : > { %v2620_v39 = vld [vmem:[%s3070_s13 + $0x260] sm:$0xf0]  ;;  %v2078_v41 = vld [vmem:[%s3070_s13 + $0x24] sm:$0xf0]  ;;  %v2084_v42 = vld [vmem:[%s3070_s13 + $0x20] sm:$0xf]  ;;  %v2077_v44 = vor.u32 %v2548_v37, %v2076_v36 }
  0x19   : > { %1104 = vmatpush.bf16.msra.mxu0 %v2644_v9  ;;  %2858 = vmatpush.bf16.msra.mxu3 %v2644_v9  ;;  %v2549_v43 = vld [vmem:[%s3070_s13 + $0x28] sm:$0xf0]  ;;  %v2365_v45 = vor.u32 %v2620_v39, %v2364_v38  ;;  %v2081_v46 = vor.u32 %v2547_v40, %v2078_v41  ;;  %v2088_v48 = vld [vmem:[%s3070_s13 + $0x30] sm:$0xf]  ;;  %v2551_v49 = vld [vmem:[%s3070_s13 + $0x38] sm:$0xf0] }
  0x1a   : > { %1273 = vmatpush.bf16.msra.mxu1 %v3027_v10  ;;  %v2085_v47 = vor.u32 %v2549_v43, %v2084_v42  ;;  %v2376_v50 = vld [vmem:[%s3070_s13 + $0x270] sm:$0xf]  ;;  %v2623_v51 = vld [vmem:[%s3070_s13 + $0x278] sm:$0xf0]  ;;  %v2550_v52 = vld [vmem:[%s3070_s13 + $0x34] sm:$0xf]  ;;  %v2089_v56 = vor.u32 %v2551_v49, %v2088_v48 }
  0x1b   : > { %1442 = vmatpush.bf16.msra.mxu2 %v3034_v11  ;;  %v2090_v53 = vld [vmem:[%s3070_s13 + $0x3c] sm:$0xf0]  ;;  %v2096_v54 = vld [vmem:[%s3070_s13 + $0x38] sm:$0xf]  ;;  %v2552_v55 = vld [vmem:[%s3070_s13 + $0x40] sm:$0xf0]  ;;  %v2377_v57 = vor.u32 %v2623_v51, %v2376_v50 }
  0x1c   : > { %v2093_v58 = vor.u32 %v2550_v52, %v2090_v53  ;;  %v2097_v59 = vor.u32 %v2552_v55, %v2096_v54  ;;  %v2100_v60 = vld [vmem:[%s3070_s13 + $0x48] sm:$0xf]  ;;  %v2554_v61 = vld [vmem:[%s3070_s13 + $0x50] sm:$0xf0]  ;;  %v2553_v0 = vld [vmem:[%s3070_s13 + $0x4c] sm:$0xf] }
  0x1d   : > { %1105 = vmatpush.bf16.msra.mxu0 %v2643_v12  ;;  %2859 = vmatpush.bf16.msra.mxu3 %v2643_v12  ;;  %v2388_v62 = vld [vmem:[%s3070_s13 + $0x288] sm:$0xf]  ;;  %v2626_v63 = vld [vmem:[%s3070_s13 + $0x290] sm:$0xf0]  ;;  %v2555_v3 = vld [vmem:[%s3070_s13 + $0x58] sm:$0xf0] }
  0x1e   : > { %1274 = vmatpush.bf16.msra.mxu1 %v2651_v13  ;;  %v2557_v9 = vld [vmem:[%s3070_s13 + $0x68] sm:$0xf0]  ;;  %v2556_v12 = vld [vmem:[%s3070_s13 + $0x64] sm:$0xf]  ;;  %v2559_v25 = vld [vmem:[%s3070_s13 + $0x7c] sm:$0xf] }
  0x1f   : > { %1443 = vmatpush.bf16.msra.mxu2 %v3049_v14  ;;  %v2632_v24 = vld [vmem:[%s3070_s13 + $0x2c0] sm:$0xf0]  ;;  %v2132_v26 = vld [vmem:[%s3070_s13 + $0x80] sm:$0xf]  ;;  %v2561_v27 = vld [vmem:[%s3070_s13 + $0x88] sm:$0xf0] }
  0x20   : > { %v2133_v31 = vor.u32 %v2561_v27, %v2132_v26  ;;  %v2562_v36 = vld [vmem:[%s3070_s13 + $0x94] sm:$0xf]  ;;  %v2138_v37 = vld [vmem:[%s3070_s13 + $0x9c] sm:$0xf0]  ;;  %v2144_v38 = vld [vmem:[%s3070_s13 + $0x98] sm:$0xf] }
  0x21   : > { %1106 = vmatpush.bf16.msra.mxu0 %v2642_v15  ;;  %2860 = vmatpush.bf16.msra.mxu3 %v2642_v15  ;;  %v2558_v15 = vld [vmem:[%s3070_s13 + $0x70] sm:$0xf0]  ;;  %v2564_v39 = vld [vmem:[%s3070_s13 + $0xa0] sm:$0xf0]  ;;  %v2141_v42 = vor.u32 %v2562_v36, %v2138_v37  ;;  %v2565_v48 = vld [vmem:[%s3070_s13 + $0xac] sm:$0xf] }
  0x22   : > { %1275 = vmatpush.bf16.msra.mxu1 %v2650_v16  ;;  %v2145_v43 = vor.u32 %v2564_v39, %v2144_v38  ;;  %v2150_v49 = vld [vmem:[%s3070_s13 + $0xb4] sm:$0xf0]  ;;  %v2156_v50 = vld [vmem:[%s3070_s13 + $0xb0] sm:$0xf]  ;;  %v2567_v51 = vld [vmem:[%s3070_s13 + $0xb8] sm:$0xf0] }
  0x23   : > { %1444 = vmatpush.bf16.msra.mxu2 %v3062_v17  ;;  %v2153_v54 = vor.u32 %v2565_v48, %v2150_v49  ;;  %v2157_v55 = vor.u32 %v2567_v51, %v2156_v50  ;;  %v2622_v48 = vld [vmem:[%s3070_s13 + $0x274] sm:$0xf]  ;;  %v2378_v49 = vld [vmem:[%s3070_s13 + $0x27c] sm:$0xf0]  ;;  %v2192_v51 = vld [vmem:[%s3070_s13 + $0xf8] sm:$0xf] }
  0x24   : > { %v2186_v50 = vld [vmem:[%s3070_s13 + $0xfc] sm:$0xf0] }
  0x25   : > { %1107 = vmatpush.bf16.msra.mxu0 %v2641_v18  ;;  %2861 = vmatpush.bf16.msra.mxu3 %v2641_v18 }
  0x26   : > { %1276 = vmatpush.bf16.msra.mxu1 %v2649_v19 }
  0x27   : > { %1445 = vmatpush.bf16.msra.mxu2 %v3079_v20 }
  0x29   : > { %1108 = vmatpush.bf16.msra.mxu0 %v2640_v21  ;;  %2862 = vmatpush.bf16.msra.mxu3 %v2640_v21  ;;  %v2560_v21 = vld [vmem:[%s3070_s13 + $0x80] sm:$0xf0] }
  0x2a   : > { %1277 = vmatpush.bf16.msra.mxu1 %v2648_v22 }
  0x2b   : > { %1446 = vmatpush.bf16.msra.mxu2 %v3090_v23 }
  0x2c   : > { %1109 = vmatmul.bf16.vlgmr.msra.gmra.mxu0 %v2065_v32  ;;  %1229 = vmatmul.bf16.vlgmr.msra.gmra.mxu3 %v2353_v33  ;;  %v2136_v32 = vld [vmem:[%s3070_s13 + $0x90] sm:$0xf]  ;;  %v2563_v33 = vld [vmem:[%s3070_s13 + $0x98] sm:$0xf0] }
  0x2d   : > { %2863 = vmatpush.bf16.msrb.mxu3 %v2983_v1  ;;  %1278 = vmatmul.bf16.vlgmr.msra.gmra.mxu1 %v2069_v34  ;;  %v2102_v1 = vld [vmem:[%s3070_s13 + $0x54] sm:$0xf0]  ;;  %v2424_v34 = vld [vmem:[%s3070_s13 + $0x2d0] sm:$0xf]  ;;  %v2137_v40 = vor.u32 %v2563_v33, %v2136_v32 }
  0x2e   : > { %1447 = vmatmul.bf16.vlgmr.msra.gmra.mxu2 %v2073_v35  ;;  %v2105_v6 = vor.u32 %v2553_v0, %v2102_v1  ;;  %v2635_v35 = vld [vmem:[%s3070_s13 + $0x2d8] sm:$0xf0] }
  0x2f   : > { %v2425_v41 = vor.u32 %v2635_v35, %v2424_v34 }
  0x31   : > { %2864 = vmatpush.bf16.msrb.mxu3 %v2998_v4  ;;  %v2101_v4 = vor.u32 %v2554_v61, %v2100_v60  ;;  %v2354_v60 = vld [vmem:[%s3070_s13 + $0x24c] sm:$0xf0] }
  0x32   : > { %v2162_v61 = vld [vmem:[%s3070_s13 + $0xcc] sm:$0xf0] }
  0x35   : > { %2865 = vmatpush.bf16.msrb.mxu3 %v3013_v7 }
  0x39   : > { %2866 = vmatpush.bf16.msrb.mxu3 %v3027_v10  ;;  %v2400_v10 = vld [vmem:[%s3070_s13 + $0x2a0] sm:$0xf] }
  0x3c   : > { %1114 = vmatmul.bf16.gmra.mxu0 %v2077_v44  ;;  %1234 = vmatmul.bf16.gmra.mxu3 %v2365_v45  ;;  %v2148_v44 = vld [vmem:[%s3070_s13 + $0xa8] sm:$0xf]  ;;  %v2566_v45 = vld [vmem:[%s3070_s13 + $0xb0] sm:$0xf0] }
  0x3d   : > { %2867 = vmatpush.bf16.msrb.mxu3 %v2651_v13  ;;  %1283 = vmatmul.bf16.gmra.mxu1 %v2081_v46  ;;  %v2114_v13 = vld [vmem:[%s3070_s13 + $0x6c] sm:$0xf0]  ;;  %v2436_v46 = vld [vmem:[%s3070_s13 + $0x2e8] sm:$0xf]  ;;  %v2149_v52 = vor.u32 %v2566_v45, %v2148_v44 }
  0x3e   : > { %1452 = vmatmul.bf16.gmra.mxu2 %v2085_v47  ;;  %v2117_v18 = vor.u32 %v2556_v12, %v2114_v13  ;;  %v2638_v47 = vld [vmem:[%s3070_s13 + $0x2f0] sm:$0xf0]  ;;  %v3183_v12 = vld [vmem:[%s3591_s2] ss:$0 sm:$0xff]  ;;  %v2172_v13 = vld [vmem:[%s3070_s13 + $0xd8] sm:$0xf] }
  0x3f   : > { %v2437_v53 = vor.u32 %v2638_v47, %v2436_v46  ;;  %v2184_v45 = vld [vmem:[%s3070_s13 + $0xf0] sm:$0xf]  ;;  %v2575_v46 = vld [vmem:[%s3070_s13 + $0xf8] sm:$0xf0]  ;;  %v2574_v47 = vld [vmem:[%s3070_s13 + $0xf4] sm:$0xf] }
  0x41   : > { %2868 = vmatpush.bf16.msrb.mxu3 %v2650_v16 }
  0x45   : > { %2869 = vmatpush.bf16.msrb.mxu3 %v2649_v19 }
  0x49   : > { %2870 = vmatpush.bf16.msrb.mxu3 %v2648_v22  ;;  %v2412_v22 = vld [vmem:[%s3070_s13 + $0x2b8] sm:$0xf] }
  0x4a   : > { %v2413_v29 = vor.u32 %v2632_v24, %v2412_v22  ;;  %v3197_v22 = vld [vmem:[%s3592_s3] ss:$0 sm:$0xff] }
  0x4c   : > { %1119 = vmatmul.bf16.gmra.mxu0 %v2089_v56  ;;  %1239 = vmatmul.bf16.gmra.mxu3 %v2377_v57  ;;  %v2160_v56 = vld [vmem:[%s3070_s13 + $0xc0] sm:$0xf]  ;;  %v2569_v57 = vld [vmem:[%s3070_s13 + $0xc8] sm:$0xf0] }
  0x4d   : > { %2871 = vmatpush.bf16.msra.mxu3 %v2988_v2  ;;  %1288 = vmatmul.bf16.gmra.mxu1 %v2093_v58  ;;  %v2108_v2 = vld [vmem:[%s3070_s13 + $0x50] sm:$0xf]  ;;  %v2568_v58 = vld [vmem:[%s3070_s13 + $0xc4] sm:$0xf]  ;;  %v2161_v0 = vor.u32 %v2569_v57, %v2160_v56  ;;  %v2185_v57 = vor.u32 %v2575_v46, %v2184_v45 }
  0x4e   : > { %1457 = vmatmul.bf16.gmra.mxu2 %v2097_v59  ;;  %v2109_v7 = vor.u32 %v2555_v3, %v2108_v2  ;;  %v2616_v59 = vld [vmem:[%s3070_s13 + $0x244] sm:$0xf]  ;;  %v2165_v3 = vor.u32 %v2568_v58, %v2162_v61  ;;  %v2381_v58 = vor.u32 %v2622_v48, %v2378_v49  ;;  %v2189_v61 = vor.u32 %v2574_v47, %v2186_v50  ;;  %v2208_v48 = vld [vmem:[%s3070_s13 + $0x120] sm:$0xf]  ;;  %v2581_v49 = vld [vmem:[%s3070_s13 + $0x128] sm:$0xf0] }
  0x4f   : > { %v2357_v1 = vor.u32 %v2616_v59, %v2354_v60  ;;  %v2580_v50 = vld [vmem:[%s3070_s13 + $0x124] sm:$0xf] }
  0x51   : > { %2872 = vmatpush.bf16.msra.mxu3 %v3003_v5  ;;  %v2389_v5 = vor.u32 %v2626_v63, %v2388_v62  ;;  %v2168_v62 = vld [vmem:[%s3070_s13 + $0xc8] sm:$0xf]  ;;  %v2570_v63 = vld [vmem:[%s3070_s13 + $0xd0] sm:$0xf0] }
  0x55   : > { %2873 = vmatpush.bf16.msra.mxu3 %v3018_v8  ;;  %v2112_v8 = vld [vmem:[%s3070_s13 + $0x60] sm:$0xf] }
  0x56   : > { %v2113_v16 = vor.u32 %v2557_v9, %v2112_v8 }
  0x59   : > { %2874 = vmatpush.bf16.msra.mxu3 %v3034_v11  ;;  %v2629_v11 = vld [vmem:[%s3070_s13 + $0x2a8] sm:$0xf0] }
  0x5c   : > { %1124 = vmatmul.bf16.gmra.mxu0 %v2101_v4  ;;  %1244 = vmatmul.bf16.gmra.mxu3 %v2389_v5  ;;  %v2169_v4 = vor.u32 %v2570_v63, %v2168_v62 }
  0x5d   : > { %2875 = vmatpush.bf16.msra.mxu3 %v3049_v14  ;;  %1293 = vmatmul.bf16.gmra.mxu1 %v2105_v6  ;;  %v2120_v14 = vld [vmem:[%s3070_s13 + $0x68] sm:$0xf] }
  0x5e   : > { %1462 = vmatmul.bf16.gmra.mxu2 %v2109_v7  ;;  %v2121_v19 = vor.u32 %v2558_v15, %v2120_v14  ;;  %v2572_v14 = vld [vmem:[%s3070_s13 + $0xe0] sm:$0xf0]  ;;  %v2571_v15 = vld [vmem:[%s3070_s13 + $0xdc] sm:$0xf] }
  0x5f   : > { %v2173_v26 = vor.u32 %v2572_v14, %v2172_v13  ;;  %v2196_v14 = vld [vmem:[%s3070_s13 + $0x108] sm:$0xf] }
  0x61   : > { %2876 = vmatpush.bf16.msra.mxu3 %v3062_v17  ;;  %v2401_v17 = vor.u32 %v2629_v11, %v2400_v10 }
  0x65   : > { %2877 = vmatpush.bf16.msra.mxu3 %v3079_v20  ;;  %v2124_v20 = vld [vmem:[%s3070_s13 + $0x78] sm:$0xf] }
  0x66   : > { %v2125_v28 = vor.u32 %v2560_v21, %v2124_v20  ;;  %v2573_v20 = vld [vmem:[%s3070_s13 + $0xe8] sm:$0xf0] }
  0x69   : > { %2878 = vmatpush.bf16.msra.mxu3 %v3090_v23  ;;  %v2126_v23 = vld [vmem:[%s3070_s13 + $0x84] sm:$0xf0] }
  0x6a   : > { %v2129_v30 = vor.u32 %v2559_v25, %v2126_v23 }
  0x6c   : > { %1129 = vmatmul.bf16.gmra.mxu0 %v2113_v16  ;;  %1249 = vmatmul.bf16.gmra.mxu3 %v2401_v17  ;;  %v2619_v16 = vld [vmem:[%s3070_s13 + $0x25c] sm:$0xf]  ;;  %v2366_v17 = vld [vmem:[%s3070_s13 + $0x264] sm:$0xf0] }
  0x6d   : > { %1298 = vmatmul.bf16.gmra.mxu1 %v2117_v18  ;;  %v2174_v18 = vld [vmem:[%s3070_s13 + $0xe4] sm:$0xf0]  ;;  %v2369_v27 = vor.u32 %v2619_v16, %v2366_v17  ;;  %v2577_v16 = vld [vmem:[%s3070_s13 + $0x10c] sm:$0xf] }
  0x6e   : > { %1467 = vmatmul.bf16.gmra.mxu2 %v2121_v19  ;;  %v2180_v19 = vld [vmem:[%s3070_s13 + $0xe0] sm:$0xf]  ;;  %v2625_v17 = vld [vmem:[%s3070_s13 + $0x28c] sm:$0xf] }
  0x7c   : > { %1134 = vmatmul.bf16.gmra.mxu0 %v2125_v28  ;;  %1254 = vmatmul.bf16.gmra.mxu3 %v2413_v29 }
  0x7d   : > { %1303 = vmatmul.bf16.gmra.mxu1 %v2129_v30  ;;  %v2177_v30 = vor.u32 %v2571_v15, %v2174_v18  ;;  %v2578_v15 = vld [vmem:[%s3070_s13 + $0x110] sm:$0xf0]  ;;  %v2390_v18 = vld [vmem:[%s3070_s13 + $0x294] sm:$0xf0] }
  0x7e   : > { %1472 = vmatmul.bf16.gmra.mxu2 %v2133_v31  ;;  %v2181_v31 = vor.u32 %v2573_v20, %v2180_v19  ;;  %v2198_v19 = vld [vmem:[%s3070_s13 + $0x114] sm:$0xf0]  ;;  %v2204_v20 = vld [vmem:[%s3070_s13 + $0x110] sm:$0xf] }
  0x8c   : > { %1139 = vmatmul.bf16.gmra.mxu0 %v2137_v40  ;;  %1259 = vmatmul.bf16.gmra.mxu3 %v2425_v41 }
  0x8d   : > { %1308 = vmatmul.bf16.gmra.mxu1 %v2141_v42 }
  0x8e   : > { %1477 = vmatmul.bf16.gmra.mxu2 %v2145_v43 }
  0x9c   : > { %1144 = vmatmul.bf16.gmra.mxu0 %v2149_v52  ;;  %1264 = vmatmul.bf16.gmra.mxu3 %v2437_v53  ;;  %v2576_v52 = vld [vmem:[%s3070_s13 + $0x100] sm:$0xf0] }
  0x9d   : > { %1313 = vmatmul.bf16.gmra.mxu1 %v2153_v54  ;;  %v2193_v62 = vor.u32 %v2576_v52, %v2192_v51  ;;  %v2628_v51 = vld [vmem:[%s3070_s13 + $0x2a4] sm:$0xf]  ;;  %v2402_v52 = vld [vmem:[%s3070_s13 + $0x2ac] sm:$0xf0] }
  0x9e   : > { %1482 = vmatmul.bf16.gmra.mxu2 %v2157_v55 }
  0xa9   : > { %v1110_v2 = vpop.f32.mrf.mxu0 }
  0xaa   : > { %v1279_v5 = vpop.f32.mrf.mxu1 }
  0xab   : > { %v1280_v6 = vadd.f32 %v1279_v5, %v1110_v2 }
  0xac   : > { %1149 = vmatmul.bf16.gmra.mxu0 %v2161_v0  ;;  %1398 = vmatmul.bf16.vlgmr.msrb.gmra.mxu3 %v2357_v1 }
  0xad   : > { %1318 = vmatmul.bf16.gmra.mxu1 %v2165_v3 }
  0xae   : > { %1487 = vmatmul.bf16.gmra.mxu2 %v2169_v4 }
  0xaf   : > { %v3178_v7 = vpop.f32.mrf.mxu3 }
  0xb1   : > { %v1448_v8 = vpop.f32.mrf.mxu2  ;;  %v1112_v9 = vpop.f32.mrf.mxu0 }
  0xb2   : > { %v1281_v10 = vpop.f32.mrf.mxu1  ;;  %v1449_v11 = vadd.f32 %v1448_v8, %v1280_v6 }
  0xb3   : > { %v1282_v24 = vadd.f32 %v1281_v10, %v1112_v9 }
  0xb4   : > { %v1612_v21 = vmul.f32 %v3183_v12, %v1449_v11 }
  0xb6   : > { %v1680_v33 = vadd.f32 %v3197_v22, %v1612_v21  ;;  %v2579_v21 = vld [vmem:[%s3070_s13 + $0x118] sm:$0xf0] }
  0xb7   : > { %v3199_v25 = vpop.f32.mrf.mxu3 }
  0xb8   : > { %v1744_v36 = vmax.f32 %v1680_v33, 0.0  ;;  %v2205_v33 = vor.u32 %v2579_v21, %v2204_v20  ;;  %v2584_v20 = vld [vmem:[%s3070_s13 + $0x140] sm:$0xf0]  ;;  %v2583_v21 = vld [vmem:[%s3070_s13 + $0x13c] sm:$0xf] }
  0xb9   : > { %v1450_v23 = vpop.f32.mrf.mxu2  ;;  %v1115_v29 = vpop.f32.mrf.mxu0 }
  0xba   : > { %v1451_v28 = vadd.f32 %v1450_v23, %v1282_v24  ;;  %v1284_v32 = vpop.f32.mrf.mxu1 }
  0xbb   : > { %v1285_v38 = vadd.f32 %v1284_v32, %v1115_v29  ;;  %v2393_v29 = vor.u32 %v2625_v17, %v2390_v18  ;;  %v2201_v32 = vor.u32 %v2577_v16, %v2198_v19  ;;  %v2220_v19 = vld [vmem:[%s3070_s13 + $0x138] sm:$0xf] }
  0xbc   : > { %v1613_v34 = vmul.f32 %v3183_v12, %v1451_v28  ;;  %1154 = vmatmul.bf16.gmra.mxu0 %v2173_v26  ;;  %1403 = vmatmul.bf16.gmra.mxu3 %v2369_v27  ;;  %v2197_v28 = vor.u32 %v2578_v15, %v2196_v14 }
  0xbd   : > { %1323 = vmatmul.bf16.gmra.mxu1 %v2177_v30 }
  0xbe   : > { %v1681_v35 = vadd.f32 %v3197_v22, %v1613_v34  ;;  %1492 = vmatmul.bf16.gmra.mxu2 %v2181_v31 }
  0xbf   : > { %v3205_v39 = vpop.f32.mrf.mxu3 }
  0xc0   : > { %v1745_v37 = vmax.f32 %v1681_v35, 0.0 }
  0xc1   : > { %v1453_v40 = vpop.f32.mrf.mxu2  ;;  %v1117_v42 = vpop.f32.mrf.mxu0 }
  0xc2   : > { %v2667_v41 = vpack.c.bf16 %v1745_v37, %v1744_v36  ;;  %v1286_v43 = vpop.f32.mrf.mxu1  ;;  %v1454_v44 = vadd.f32 %v1453_v40, %v1285_v38 }
  0xc3   : > { %v1287_v54 = vadd.f32 %v1286_v43, %v1117_v42 }
  0xc4   : > { %2668 = vst [vmem:[%s3210_s11] sm:$0xff] %v2667_v41   ;;  %v1614_v53 = vmul.f32 %v3183_v12, %v1454_v44 }
  0xc6   : > { %v1682_v0 = vadd.f32 %v3197_v22, %v1614_v53  ;;  %v2210_v53 = vld [vmem:[%s3070_s13 + $0x12c] sm:$0xf0] }
  0xc7   : > { %v3222_v55 = vpop.f32.mrf.mxu3 }
  0xc8   : > { %v1746_v3 = vmax.f32 %v1682_v0, 0.0 }
  0xc9   : > { %v1455_v56 = vpop.f32.mrf.mxu2  ;;  %v1120_v60 = vpop.f32.mrf.mxu0 }
  0xca   : > { %v1456_v59 = vadd.f32 %v1455_v56, %v1287_v54  ;;  %v1289_v63 = vpop.f32.mrf.mxu1  ;;  %v2216_v54 = vld [vmem:[%s3070_s13 + $0x128] sm:$0xf]  ;;  %v2582_v56 = vld [vmem:[%s3070_s13 + $0x130] sm:$0xf0] }
  0xcb   : > { %v1290_v5 = vadd.f32 %v1289_v63, %v1120_v60 }
  0xcc   : > { %v1615_v1 = vmul.f32 %v3183_v12, %v1456_v59  ;;  %1159 = vmatmul.bf16.gmra.mxu0 %v2185_v57  ;;  %1408 = vmatmul.bf16.gmra.mxu3 %v2381_v58 }
  0xcd   : > { %1328 = vmatmul.bf16.gmra.mxu1 %v2189_v61  ;;  %v2209_v61 = vor.u32 %v2581_v49, %v2208_v48 }
  0xce   : > { %v1683_v2 = vadd.f32 %v3197_v22, %v1615_v1  ;;  %1497 = vmatmul.bf16.gmra.mxu2 %v2193_v62  ;;  %v2405_v62 = vor.u32 %v2628_v51, %v2402_v52  ;;  %v2213_v1 = vor.u32 %v2580_v50, %v2210_v53 }
  0xcf   : > { %v3227_v6 = vpop.f32.mrf.mxu3 }
  0xd0   : > { %v1747_v4 = vmax.f32 %v1683_v2, 0.0  ;;  %v2217_v2 = vor.u32 %v2582_v56, %v2216_v54  ;;  %v2232_v56 = vld [vmem:[%s3070_s13 + $0x150] sm:$0xf] }
  0xd1   : > { %v1458_v8 = vpop.f32.mrf.mxu2  ;;  %v1122_v10 = vpop.f32.mrf.mxu0 }
  0xd2   : > { %v2672_v9 = vpack.c.bf16 %v1747_v4, %v1746_v3  ;;  %v1291_v11 = vpop.f32.mrf.mxu1  ;;  %v1459_v13 = vadd.f32 %v1458_v8, %v1290_v5 }
  0xd3   : > { %v1292_v23 = vadd.f32 %v1291_v11, %v1122_v10 }
  0xd4   : > { %2824 = vst [vmem:[%s3210_s11 + $0x8] sm:$0xff] %v2672_v9   ;;  %v1616_v24 = vmul.f32 %v3183_v12, %v1459_v13 }
  0xd6   : > { %v1684_v35 = vadd.f32 %v3197_v22, %v1616_v24  ;;  %v2631_v24 = vld [vmem:[%s3070_s13 + $0x2bc] sm:$0xf] }
  0xd7   : > { %v3239_v26 = vpop.f32.mrf.mxu3 }
  0xd8   : > { %v1748_v38 = vmax.f32 %v1684_v35, 0.0 }
  0xd9   : > { %v1460_v27 = vpop.f32.mrf.mxu2  ;;  %v1125_v31 = vpop.f32.mrf.mxu0 }
  0xda   : > { %v1461_v30 = vadd.f32 %v1460_v27, %v1292_v23  ;;  %v1294_v34 = vpop.f32.mrf.mxu1  ;;  %v2414_v23 = vld [vmem:[%s3070_s13 + $0x2c4] sm:$0xf0] }
  0xdb   : > { %v1295_v41 = vadd.f32 %v1294_v34, %v1125_v31  ;;  %v2222_v27 = vld [vmem:[%s3070_s13 + $0x144] sm:$0xf0]  ;;  %v2221_v34 = vor.u32 %v2584_v20, %v2220_v19  ;;  %v2417_v35 = vor.u32 %v2631_v24, %v2414_v23 }
  0xdc   : > { %v1617_v36 = vmul.f32 %v3183_v12, %v1461_v30  ;;  %1164 = vmatmul.bf16.gmra.mxu0 %v2197_v28  ;;  %1413 = vmatmul.bf16.gmra.mxu3 %v2393_v29  ;;  %v2228_v28 = vld [vmem:[%s3070_s13 + $0x140] sm:$0xf]  ;;  %v2585_v29 = vld [vmem:[%s3070_s13 + $0x148] sm:$0xf0] }
  0xdd   : > { %1333 = vmatmul.bf16.gmra.mxu1 %v2201_v32 }
  0xde   : > { %v1685_v37 = vadd.f32 %v3197_v22, %v1617_v36  ;;  %1502 = vmatmul.bf16.gmra.mxu2 %v2205_v33 }
  0xdf   : > { %v3244_v42 = vpop.f32.mrf.mxu3 }
  0xe0   : > { %v1749_v40 = vmax.f32 %v1685_v37, 0.0 }
  0xe1   : > { %v1463_v43 = vpop.f32.mrf.mxu2  ;;  %v1127_v45 = vpop.f32.mrf.mxu0 }
  0xe2   : > { %v2677_v44 = vpack.c.bf16 %v1749_v40, %v1748_v38  ;;  %v1296_v46 = vpop.f32.mrf.mxu1  ;;  %v1464_v47 = vadd.f32 %v1463_v43, %v1295_v41  ;;  %v2225_v38 = vor.u32 %v2583_v21, %v2222_v27  ;;  %v2229_v40 = vor.u32 %v2585_v29, %v2228_v28 }
  0xe3   : > { %v1297_v58 = vadd.f32 %v1296_v46, %v1127_v45 }
  0xe4   : > { %2825 = vst [vmem:[%s3210_s11 + $0x10] sm:$0xff] %v2677_v44   ;;  %v1618_v57 = vmul.f32 %v3183_v12, %v1464_v47 }
  0xe6   : > { %v1686_v4 = vadd.f32 %v3197_v22, %v1618_v57  ;;  %v2587_v57 = vld [vmem:[%s3070_s13 + $0x158] sm:$0xf0] }
  0xe7   : > { %v3256_v59 = vpop.f32.mrf.mxu3 }
  0xe8   : > { %v1750_v9 = vmax.f32 %v1686_v4, 0.0 }
  0xe9   : > { %v1465_v60 = vpop.f32.mrf.mxu2  ;;  %v1130_v0 = vpop.f32.mrf.mxu0 }
  0xea   : > { %v1466_v63 = vadd.f32 %v1465_v60, %v1297_v58  ;;  %v1299_v3 = vpop.f32.mrf.mxu1  ;;  %v2586_v58 = vld [vmem:[%s3070_s13 + $0x154] sm:$0xf] }
  0xeb   : > { %v1300_v11 = vadd.f32 %v1299_v3, %v1130_v0  ;;  %v2634_v60 = vld [vmem:[%s3070_s13 + $0x2d4] sm:$0xf]  ;;  %v2588_v0 = vld [vmem:[%s3070_s13 + $0x160] sm:$0xf0] }
  0xec   : > { %v1619_v5 = vmul.f32 %v3183_v12, %v1466_v63  ;;  %1169 = vmatmul.bf16.gmra.mxu0 %v2209_v61  ;;  %1418 = vmatmul.bf16.gmra.mxu3 %v2405_v62  ;;  %v2426_v61 = vld [vmem:[%s3070_s13 + $0x2dc] sm:$0xf0]  ;;  %v2240_v63 = vld [vmem:[%s3070_s13 + $0x158] sm:$0xf] }
  0xed   : > { %1338 = vmatmul.bf16.gmra.mxu1 %v2213_v1  ;;  %v2234_v62 = vld [vmem:[%s3070_s13 + $0x15c] sm:$0xf0] }
  0xee   : > { %v1687_v8 = vadd.f32 %v3197_v22, %v1619_v5  ;;  %1507 = vmatmul.bf16.gmra.mxu2 %v2217_v2  ;;  %v2233_v5 = vor.u32 %v2587_v57, %v2232_v56 }
  0xef   : > { %v3261_v13 = vpop.f32.mrf.mxu3 }
  0xf0   : > { %v1751_v10 = vmax.f32 %v1687_v8, 0.0  ;;  %v2429_v8 = vor.u32 %v2634_v60, %v2426_v61 }
  0xf1   : > { %v1468_v14 = vpop.f32.mrf.mxu2  ;;  %v1132_v16 = vpop.f32.mrf.mxu0 }
  0xf2   : > { %v2682_v15 = vpack.c.bf16 %v1751_v10, %v1750_v9  ;;  %v1301_v17 = vpop.f32.mrf.mxu1  ;;  %v1469_v18 = vadd.f32 %v1468_v14, %v1300_v11  ;;  %v2237_v11 = vor.u32 %v2586_v58, %v2234_v62  ;;  %v2241_v14 = vor.u32 %v2588_v0, %v2240_v63 }
  0xf3   : > { %v1302_v31 = vadd.f32 %v1301_v17, %v1132_v16 }
  0xf4   : > { %2826 = vst [vmem:[%s3210_s11 + $0x18] sm:$0xff] %v2682_v15   ;;  %v1620_v30 = vmul.f32 %v3183_v12, %v1469_v18 }
  0xf6   : > { %v1688_v43 = vadd.f32 %v3197_v22, %v1620_v30 }
  0xf7   : > { %v3273_v32 = vpop.f32.mrf.mxu3 }
  0xf8   : > { %v1752_v46 = vmax.f32 %v1688_v43, 0.0 }
  0xf9   : > { %v1470_v33 = vpop.f32.mrf.mxu2  ;;  %v1135_v37 = vpop.f32.mrf.mxu0 }
  0xfa   : > { %v1471_v36 = vadd.f32 %v1470_v33, %v1302_v31  ;;  %v1304_v41 = vpop.f32.mrf.mxu1  ;;  %v2244_v31 = vld [vmem:[%s3070_s13 + $0x168] sm:$0xf]  ;;  %v2590_v33 = vld [vmem:[%s3070_s13 + $0x170] sm:$0xf0] }
  0xfb   : > { %v1305_v48 = vadd.f32 %v1304_v41, %v1135_v37  ;;  %v2246_v37 = vld [vmem:[%s3070_s13 + $0x174] sm:$0xf0] }
  0xfc   : > { %v1621_v44 = vmul.f32 %v3183_v12, %v1471_v36  ;;  %1174 = vmatmul.bf16.gmra.mxu0 %v2221_v34  ;;  %1423 = vmatmul.bf16.gmra.mxu3 %v2417_v35  ;;  %v2589_v34 = vld [vmem:[%s3070_s13 + $0x16c] sm:$0xf]  ;;  %v2438_v36 = vld [vmem:[%s3070_s13 + $0x2f4] sm:$0xf0] }
  0xfd   : > { %1343 = vmatmul.bf16.gmra.mxu1 %v2225_v38  ;;  %v2637_v35 = vld [vmem:[%s3070_s13 + $0x2ec] sm:$0xf]  ;;  %v2252_v38 = vld [vmem:[%s3070_s13 + $0x170] sm:$0xf] }
  0xfe   : > { %v1689_v45 = vadd.f32 %v3197_v22, %v1621_v44  ;;  %1512 = vmatmul.bf16.gmra.mxu2 %v2229_v40  ;;  %v2591_v40 = vld [vmem:[%s3070_s13 + $0x178] sm:$0xf0] }
  0xff   : > { %v3278_v49 = vpop.f32.mrf.mxu3 }
 0x100   : > { %v1753_v47 = vmax.f32 %v1689_v45, 0.0 }
 0x101   : > { %v1473_v50 = vpop.f32.mrf.mxu2  ;;  %v1137_v52 = vpop.f32.mrf.mxu0 }
 0x102   : > { %v2687_v51 = vpack.c.bf16 %v1753_v47, %v1752_v46  ;;  %v1306_v53 = vpop.f32.mrf.mxu1  ;;  %v1474_v54 = vadd.f32 %v1473_v50, %v1305_v48  ;;  %v2245_v46 = vor.u32 %v2590_v33, %v2244_v31  ;;  %v2441_v47 = vor.u32 %v2637_v35, %v2438_v36 }
 0x103   : > { %v1307_v2 = vadd.f32 %v1306_v53, %v1137_v52  ;;  %v2253_v52 = vor.u32 %v2591_v40, %v2252_v38 }
 0x104   : > { %2827 = vst [vmem:[%s3210_s11 + $0x20] sm:$0xff] %v2687_v51   ;;  %v1622_v1 = vmul.f32 %v3183_v12, %v1474_v54  ;;  %v2249_v51 = vor.u32 %v2589_v34, %v2246_v37 }
 0x106   : > { %v1690_v16 = vadd.f32 %v3197_v22, %v1622_v1 }
 0x107   : > { %v3290_v3 = vpop.f32.mrf.mxu3 }
 0x108   : > { %v1754_v19 = vmax.f32 %v1690_v16, 0.0  ;;  %v2594_v16 = vld [vmem:[%s3070_s13 + $0x190] sm:$0xf0] }
 0x109   : > { %v1475_v4 = vpop.f32.mrf.mxu2  ;;  %v1140_v10 = vpop.f32.mrf.mxu0 }
 0x10a   : > { %v1476_v9 = vadd.f32 %v1475_v4, %v1307_v2  ;;  %v1309_v15 = vpop.f32.mrf.mxu1 }
 0x10b   : > { %v1310_v21 = vadd.f32 %v1309_v15, %v1140_v10  ;;  %v2360_v10 = vld [vmem:[%s3070_s13 + $0x248] sm:$0xf] }
 0x10c   : > { %v1623_v17 = vmul.f32 %v3183_v12, %v1476_v9  ;;  %1179 = vmatmul.bf16.gmra.mxu0 %v2233_v5  ;;  %1428 = vmatmul.bf16.gmra.mxu3 %v2429_v8  ;;  %v2256_v5 = vld [vmem:[%s3070_s13 + $0x180] sm:$0xf]  ;;  %v2593_v8 = vld [vmem:[%s3070_s13 + $0x188] sm:$0xf0]  ;;  %v2592_v9 = vld [vmem:[%s3070_s13 + $0x184] sm:$0xf] }
 0x10d   : > { %1348 = vmatmul.bf16.gmra.mxu1 %v2237_v11  ;;  %v2618_v11 = vld [vmem:[%s3070_s13 + $0x250] sm:$0xf0]  ;;  %v2264_v15 = vld [vmem:[%s3070_s13 + $0x188] sm:$0xf] }
 0x10e   : > { %v1691_v18 = vadd.f32 %v3197_v22, %v1623_v17  ;;  %1517 = vmatmul.bf16.gmra.mxu2 %v2241_v14  ;;  %v2258_v14 = vld [vmem:[%s3070_s13 + $0x18c] sm:$0xf0] }
 0x10f   : > { %v3295_v24 = vpop.f32.mrf.mxu3 }
 0x110   : > { %v1755_v20 = vmax.f32 %v1691_v18, 0.0 }
 0x111   : > { %v1478_v23 = vpop.f32.mrf.mxu2  ;;  %v1142_v28 = vpop.f32.mrf.mxu0 }
 0x112   : > { %v2692_v27 = vpack.c.bf16 %v1755_v20, %v1754_v19  ;;  %v1311_v29 = vpop.f32.mrf.mxu1  ;;  %v1479_v30 = vadd.f32 %v1478_v23, %v1310_v21  ;;  %v2257_v21 = vor.u32 %v2593_v8, %v2256_v5  ;;  %v2361_v23 = vor.u32 %v2618_v11, %v2360_v10 }
 0x113   : > { %v1312_v43 = vadd.f32 %v1311_v29, %v1142_v28  ;;  %v2261_v29 = vor.u32 %v2592_v9, %v2258_v14 }
 0x114   : > { %2828 = vst [vmem:[%s3210_s11 + $0x28] sm:$0xff] %v2692_v27   ;;  %v1624_v41 = vmul.f32 %v3183_v12, %v1479_v30  ;;  %v2265_v30 = vor.u32 %v2594_v16, %v2264_v15 }
 0x116   : > { %v1692_v54 = vadd.f32 %v3197_v22, %v1624_v41 }
 0x117   : > { %v3307_v44 = vpop.f32.mrf.mxu3 }
 0x118   : > { %v1756_v58 = vmax.f32 %v1692_v54, 0.0  ;;  %v2270_v54 = vld [vmem:[%s3070_s13 + $0x1a4] sm:$0xf0] }
 0x119   : > { %v1480_v45 = vpop.f32.mrf.mxu2  ;;  %v1145_v50 = vpop.f32.mrf.mxu0 }
 0x11a   : > { %v1481_v48 = vadd.f32 %v1480_v45, %v1312_v43  ;;  %v1314_v53 = vpop.f32.mrf.mxu1 }
 0x11b   : > { %v1315_v61 = vadd.f32 %v1314_v53, %v1145_v50  ;;  %v2596_v50 = vld [vmem:[%s3070_s13 + $0x1a0] sm:$0xf0]  ;;  %v2621_v53 = vld [vmem:[%s3070_s13 + $0x268] sm:$0xf0] }
 0x11c   : > { %v1625_v56 = vmul.f32 %v3183_v12, %v1481_v48  ;;  %1184 = vmatmul.bf16.gmra.mxu0 %v2245_v46  ;;  %1433 = vmatmul.bf16.gmra.mxu3 %v2441_v47  ;;  %v2268_v48 = vld [vmem:[%s3070_s13 + $0x198] sm:$0xf] }
 0x11d   : > { %1353 = vmatmul.bf16.gmra.mxu1 %v2249_v51  ;;  %v2595_v51 = vld [vmem:[%s3070_s13 + $0x19c] sm:$0xf] }
 0x11e   : > { %v1693_v57 = vadd.f32 %v3197_v22, %v1625_v56  ;;  %1522 = vmatmul.bf16.gmra.mxu2 %v2253_v52  ;;  %v2372_v52 = vld [vmem:[%s3070_s13 + $0x260] sm:$0xf]  ;;  %v2273_v5 = vor.u32 %v2595_v51, %v2270_v54 }
 0x11f   : > { %v3312_v62 = vpop.f32.mrf.mxu3  ;;  %v2276_v56 = vld [vmem:[%s3070_s13 + $0x1a0] sm:$0xf] }
 0x120   : > { %v1757_v60 = vmax.f32 %v1693_v57, 0.0  ;;  %v2597_v57 = vld [vmem:[%s3070_s13 + $0x1a8] sm:$0xf0] }
 0x121   : > { %v1483_v63 = vpop.f32.mrf.mxu2  ;;  %v1147_v1 = vpop.f32.mrf.mxu0  ;;  %v2277_v8 = vor.u32 %v2597_v57, %v2276_v56 }
 0x122   : > { %v2697_v0 = vpack.c.bf16 %v1757_v60, %v1756_v58  ;;  %v1316_v2 = vpop.f32.mrf.mxu1  ;;  %v1484_v4 = vadd.f32 %v1483_v63, %v1315_v61 }
 0x123   : > { %v1317_v18 = vadd.f32 %v1316_v2, %v1147_v1  ;;  %v2373_v1 = vor.u32 %v2621_v53, %v2372_v52 }
 0x124   : > { %2829 = vst [vmem:[%s3210_s11 + $0x30] sm:$0xff] %v2697_v0   ;;  %v1626_v17 = vmul.f32 %v3183_v12, %v1484_v4  ;;  %v2269_v0 = vor.u32 %v2596_v50, %v2268_v48 }
 0x126   : > { %v1694_v33 = vadd.f32 %v3197_v22, %v1626_v17 }
 0x127   : > { %v3324_v19 = vpop.f32.mrf.mxu3 }
 0x128   : > { %v1758_v36 = vmax.f32 %v1694_v33, 0.0  ;;  %v2384_v33 = vld [vmem:[%s3070_s13 + $0x278] sm:$0xf] }
 0x129   : > { %v1485_v20 = vpop.f32.mrf.mxu2  ;;  %v1150_v28 = vpop.f32.mrf.mxu0 }
 0x12a   : > { %v1486_v27 = vadd.f32 %v1485_v20, %v1317_v18  ;;  %v1319_v31 = vpop.f32.mrf.mxu1 }
 0x12b   : > { %v1320_v38 = vadd.f32 %v1319_v31, %v1150_v28  ;;  %v2598_v31 = vld [vmem:[%s3070_s13 + $0x1b4] sm:$0xf] }
 0x12c   : > { %v1627_v34 = vmul.f32 %v3183_v12, %v1486_v27  ;;  %1189 = vmatmul.bf16.gmra.mxu0 %v2257_v21  ;;  %1567 = vmatmul.bf16.vlgmr.msra.gmra.mxu3 %v2361_v23 }
 0x12d   : > { %1358 = vmatmul.bf16.gmra.mxu1 %v2261_v29  ;;  %v2280_v29 = vld [vmem:[%s3070_s13 + $0x1b0] sm:$0xf] }
 0x12e   : > { %v1695_v35 = vadd.f32 %v3197_v22, %v1627_v34  ;;  %1527 = vmatmul.bf16.gmra.mxu2 %v2265_v30  ;;  %v2599_v30 = vld [vmem:[%s3070_s13 + $0x1b8] sm:$0xf0]  ;;  %v2624_v34 = vld [vmem:[%s3070_s13 + $0x280] sm:$0xf0] }
 0x12f   : > { %v3329_v40 = vpop.f32.mrf.mxu3 }
 0x130   : > { %v1759_v37 = vmax.f32 %v1695_v35, 0.0  ;;  %v2282_v35 = vld [vmem:[%s3070_s13 + $0x1bc] sm:$0xf0] }
 0x131   : > { %v1488_v41 = vpop.f32.mrf.mxu2  ;;  %v1152_v45 = vpop.f32.mrf.mxu0  ;;  %v2285_v51 = vor.u32 %v2598_v31, %v2282_v35 }
 0x132   : > { %v2702_v43 = vpack.c.bf16 %v1759_v37, %v1758_v36  ;;  %v1321_v46 = vpop.f32.mrf.mxu1  ;;  %v1489_v47 = vadd.f32 %v1488_v41, %v1320_v38  ;;  %v2288_v36 = vld [vmem:[%s3070_s13 + $0x1b8] sm:$0xf]  ;;  %v2600_v37 = vld [vmem:[%s3070_s13 + $0x1c0] sm:$0xf0] }
 0x133   : > { %v1322_v60 = vadd.f32 %v1321_v46, %v1152_v45  ;;  %v2281_v46 = vor.u32 %v2599_v30, %v2280_v29  ;;  %v2289_v52 = vor.u32 %v2600_v37, %v2288_v36 }
 0x134   : > { %2830 = vst [vmem:[%s3210_s11 + $0x38] sm:$0xff] %v2702_v43   ;;  %v1628_v58 = vmul.f32 %v3183_v12, %v1489_v47  ;;  %v2385_v47 = vor.u32 %v2624_v34, %v2384_v33 }
 0x136   : > { %v1696_v10 = vadd.f32 %v3197_v22, %v1628_v58 }
 0x137   : > { %v3341_v61 = vpop.f32.mrf.mxu3 }
 0x138   : > { %v1760_v15 = vmax.f32 %v1696_v10, 0.0  ;;  %v2602_v10 = vld [vmem:[%s3070_s13 + $0x1d0] sm:$0xf0] }
 0x139   : > { %v1490_v63 = vpop.f32.mrf.mxu2  ;;  %v1155_v4 = vpop.f32.mrf.mxu0 }
 0x13a   : > { %v1491_v2 = vadd.f32 %v1490_v63, %v1322_v60  ;;  %v1324_v9 = vpop.f32.mrf.mxu1 }
 0x13b   : > { %v1325_v17 = vadd.f32 %v1324_v9, %v1155_v4  ;;  %v2292_v9 = vld [vmem:[%s3070_s13 + $0x1c8] sm:$0xf] }
 0x13c   : > { %v1629_v11 = vmul.f32 %v3183_v12, %v1491_v2  ;;  %1194 = vmatmul.bf16.gmra.mxu0 %v2269_v0  ;;  %1572 = vmatmul.bf16.gmra.mxu3 %v2373_v1  ;;  %v2293_v29 = vor.u32 %v2602_v10, %v2292_v9 }
 0x13d   : > { %1363 = vmatmul.bf16.gmra.mxu1 %v2273_v5 }
 0x13e   : > { %v1697_v14 = vadd.f32 %v3197_v22, %v1629_v11  ;;  %1532 = vmatmul.bf16.gmra.mxu2 %v2277_v8  ;;  %v2601_v11 = vld [vmem:[%s3070_s13 + $0x1cc] sm:$0xf] }
 0x13f   : > { %v3346_v18 = vpop.f32.mrf.mxu3 }
 0x140   : > { %v1761_v16 = vmax.f32 %v1697_v14, 0.0  ;;  %v2396_v14 = vld [vmem:[%s3070_s13 + $0x290] sm:$0xf] }
 0x141   : > { %v1493_v20 = vpop.f32.mrf.mxu2  ;;  %v1157_v23 = vpop.f32.mrf.mxu0 }
 0x142   : > { %v2707_v21 = vpack.c.bf16 %v1761_v16, %v1760_v15  ;;  %v1326_v27 = vpop.f32.mrf.mxu1  ;;  %v1494_v28 = vadd.f32 %v1493_v20, %v1325_v17  ;;  %v2627_v15 = vld [vmem:[%s3070_s13 + $0x298] sm:$0xf0]  ;;  %v2294_v16 = vld [vmem:[%s3070_s13 + $0x1d4] sm:$0xf0]  ;;  %v2300_v17 = vld [vmem:[%s3070_s13 + $0x1d0] sm:$0xf] }
 0x143   : > { %v1327_v41 = vadd.f32 %v1326_v27, %v1157_v23  ;;  %v2603_v20 = vld [vmem:[%s3070_s13 + $0x1d8] sm:$0xf0]  ;;  %v2397_v30 = vor.u32 %v2627_v15, %v2396_v14  ;;  %v2297_v34 = vor.u32 %v2601_v11, %v2294_v16 }
 0x144   : > { %2831 = vst [vmem:[%s3210_s11 + $0x40] sm:$0xff] %v2707_v21   ;;  %v1630_v38 = vmul.f32 %v3183_v12, %v1494_v28  ;;  %v2301_v35 = vor.u32 %v2603_v20, %v2300_v17 }
 0x146   : > { %v1698_v54 = vadd.f32 %v3197_v22, %v1630_v38 }
 0x147   : > { %v3358_v43 = vpop.f32.mrf.mxu3 }
 0x148   : > { %v1762_v58 = vmax.f32 %v1698_v54, 0.0 }
 0x149   : > { %v1495_v45 = vpop.f32.mrf.mxu2  ;;  %v1160_v50 = vpop.f32.mrf.mxu0 }
 0x14a   : > { %v1496_v48 = vadd.f32 %v1495_v45, %v1327_v41  ;;  %v1329_v53 = vpop.f32.mrf.mxu1 }
 0x14b   : > { %v1330_v63 = vadd.f32 %v1329_v53, %v1160_v50 }
 0x14c   : > { %v1631_v56 = vmul.f32 %v3183_v12, %v1496_v48  ;;  %1199 = vmatmul.bf16.gmra.mxu0 %v2281_v46  ;;  %1577 = vmatmul.bf16.gmra.mxu3 %v2385_v47 }
 0x14d   : > { %1368 = vmatmul.bf16.gmra.mxu1 %v2285_v51 }
 0x14e   : > { %v1699_v57 = vadd.f32 %v3197_v22, %v1631_v56  ;;  %1537 = vmatmul.bf16.gmra.mxu2 %v2289_v52  ;;  %v2304_v56 = vld [vmem:[%s3070_s13 + $0x1e0] sm:$0xf] }
 0x14f   : > { %v3363_v0 = vpop.f32.mrf.mxu3 }
 0x150   : > { %v1763_v60 = vmax.f32 %v1699_v57, 0.0  ;;  %v2605_v57 = vld [vmem:[%s3070_s13 + $0x1e8] sm:$0xf0] }
 0x151   : > { %v1498_v1 = vpop.f32.mrf.mxu2  ;;  %v1162_v4 = vpop.f32.mrf.mxu0  ;;  %v2305_v11 = vor.u32 %v2605_v57, %v2304_v56 }
 0x152   : > { %v2712_v2 = vpack.c.bf16 %v1763_v60, %v1762_v58  ;;  %v1331_v5 = vpop.f32.mrf.mxu1  ;;  %v1499_v8 = vadd.f32 %v1498_v1, %v1330_v63  ;;  %v2604_v58 = vld [vmem:[%s3070_s13 + $0x1e4] sm:$0xf]  ;;  %v2408_v60 = vld [vmem:[%s3070_s13 + $0x2a8] sm:$0xf]  ;;  %v2630_v63 = vld [vmem:[%s3070_s13 + $0x2b0] sm:$0xf0] }
 0x153   : > { %v1332_v23 = vadd.f32 %v1331_v5, %v1162_v4  ;;  %v2306_v1 = vld [vmem:[%s3070_s13 + $0x1ec] sm:$0xf0]  ;;  %v2606_v4 = vld [vmem:[%s3070_s13 + $0x1f0] sm:$0xf0]  ;;  %v2409_v14 = vor.u32 %v2630_v63, %v2408_v60 }
 0x154   : > { %2832 = vst [vmem:[%s3210_s11 + $0x48] sm:$0xff] %v2712_v2   ;;  %v1632_v21 = vmul.f32 %v3183_v12, %v1499_v8  ;;  %v2312_v2 = vld [vmem:[%s3070_s13 + $0x1e8] sm:$0xf]  ;;  %v2309_v17 = vor.u32 %v2604_v58, %v2306_v1 }
 0x155   : > { %v2313_v20 = vor.u32 %v2606_v4, %v2312_v2 }
 0x156   : > { %v1700_v37 = vadd.f32 %v3197_v22, %v1632_v21 }
 0x157   : > { %v3375_v27 = vpop.f32.mrf.mxu3 }
 0x158   : > { %v1764_v45 = vmax.f32 %v1700_v37, 0.0 }
 0x159   : > { %v1500_v28 = vpop.f32.mrf.mxu2  ;;  %v1165_v33 = vpop.f32.mrf.mxu0 }
 0x15a   : > { %v1501_v31 = vadd.f32 %v1500_v28, %v1332_v23  ;;  %v1334_v36 = vpop.f32.mrf.mxu1 }
 0x15b   : > { %v1335_v47 = vadd.f32 %v1334_v36, %v1165_v33 }
 0x15c   : > { %v1633_v38 = vmul.f32 %v3183_v12, %v1501_v31  ;;  %1204 = vmatmul.bf16.gmra.mxu0 %v2293_v29  ;;  %1582 = vmatmul.bf16.gmra.mxu3 %v2397_v30 }
 0x15d   : > { %1373 = vmatmul.bf16.gmra.mxu1 %v2297_v34 }
 0x15e   : > { %v1701_v41 = vadd.f32 %v3197_v22, %v1633_v38  ;;  %1542 = vmatmul.bf16.gmra.mxu2 %v2301_v35 }
 0x15f   : > { %v3380_v48 = vpop.f32.mrf.mxu3 }
 0x160   : > { %v1765_v46 = vmax.f32 %v1701_v41, 0.0 }
 0x161   : > { %v1503_v50 = vpop.f32.mrf.mxu2  ;;  %v1167_v52 = vpop.f32.mrf.mxu0 }
 0x162   : > { %v2717_v51 = vpack.c.bf16 %v1765_v46, %v1764_v45  ;;  %v1336_v53 = vpop.f32.mrf.mxu1  ;;  %v1504_v54 = vadd.f32 %v1503_v50, %v1335_v47  ;;  %v2316_v45 = vld [vmem:[%s3070_s13 + $0x1f8] sm:$0xf]  ;;  %v2608_v46 = vld [vmem:[%s3070_s13 + $0x200] sm:$0xf0]  ;;  %v2607_v47 = vld [vmem:[%s3070_s13 + $0x1fc] sm:$0xf] }
 0x163   : > { %v1337_v8 = vadd.f32 %v1336_v53, %v1167_v52  ;;  %v2420_v50 = vld [vmem:[%s3070_s13 + $0x2c0] sm:$0xf]  ;;  %v2318_v52 = vld [vmem:[%s3070_s13 + $0x204] sm:$0xf0]  ;;  %v2317_v63 = vor.u32 %v2608_v46, %v2316_v45  ;;  %v2336_v45 = vld [vmem:[%s3070_s13 + $0x218] sm:$0xf] }
 0x164   : > { %2833 = vst [vmem:[%s3210_s11 + $0x50] sm:$0xff] %v2717_v51   ;;  %v1634_v5 = vmul.f32 %v3183_v12, %v1504_v54  ;;  %v2633_v51 = vld [vmem:[%s3070_s13 + $0x2c8] sm:$0xf0]  ;;  %v2324_v53 = vld [vmem:[%s3070_s13 + $0x200] sm:$0xf] }
 0x165   : > { %v2609_v54 = vld [vmem:[%s3070_s13 + $0x208] sm:$0xf0]  ;;  %v2421_v1 = vor.u32 %v2633_v51, %v2420_v50  ;;  %v2612_v46 = vld [vmem:[%s3070_s13 + $0x220] sm:$0xf0] }
 0x166   : > { %v1702_v23 = vadd.f32 %v3197_v22, %v1634_v5  ;;  %v2321_v5 = vor.u32 %v2607_v47, %v2318_v52 }
 0x167   : > { %v3392_v9 = vpop.f32.mrf.mxu3 }
 0x168   : > { %v1766_v30 = vmax.f32 %v1702_v23, 0.0 }
 0x169   : > { %v1505_v10 = vpop.f32.mrf.mxu2  ;;  %v1170_v16 = vpop.f32.mrf.mxu0 }
 0x16a   : > { %v1506_v15 = vadd.f32 %v1505_v10, %v1337_v8  ;;  %v1339_v21 = vpop.f32.mrf.mxu1  ;;  %v2325_v8 = vor.u32 %v2609_v54, %v2324_v53 }
 0x16b   : > { %v1340_v33 = vadd.f32 %v1339_v21, %v1170_v16 }
 0x16c   : > { %v1635_v28 = vmul.f32 %v3183_v12, %v1506_v15  ;;  %1209 = vmatmul.bf16.gmra.mxu0 %v2305_v11  ;;  %1587 = vmatmul.bf16.gmra.mxu3 %v2409_v14 }
 0x16d   : > { %1378 = vmatmul.bf16.gmra.mxu1 %v2309_v17 }
 0x16e   : > { %v1703_v29 = vadd.f32 %v3197_v22, %v1635_v28  ;;  %1547 = vmatmul.bf16.gmra.mxu2 %v2313_v20 }
 0x16f   : > { %v3397_v34 = vpop.f32.mrf.mxu3 }
 0x170   : > { %v1767_v31 = vmax.f32 %v1703_v29, 0.0 }
 0x171   : > { %v1508_v35 = vpop.f32.mrf.mxu2  ;;  %v1172_v37 = vpop.f32.mrf.mxu0 }
 0x172   : > { %v2722_v36 = vpack.c.bf16 %v1767_v31, %v1766_v30  ;;  %v1341_v38 = vpop.f32.mrf.mxu1  ;;  %v1509_v41 = vadd.f32 %v1508_v35, %v1340_v33  ;;  %v2328_v33 = vld [vmem:[%s3070_s13 + $0x210] sm:$0xf]  ;;  %v2611_v35 = vld [vmem:[%s3070_s13 + $0x218] sm:$0xf0] }
 0x173   : > { %v1342_v57 = vadd.f32 %v1341_v38, %v1172_v37  ;;  %v2432_v37 = vld [vmem:[%s3070_s13 + $0x2d8] sm:$0xf]  ;;  %v2636_v38 = vld [vmem:[%s3070_s13 + $0x2e0] sm:$0xf0]  ;;  %v2329_v53 = vor.u32 %v2611_v35, %v2328_v33  ;;  %v2348_v33 = vld [vmem:[%s3070_s13 + $0x230] sm:$0xf] }
 0x174   : > { %2834 = vst [vmem:[%s3210_s11 + $0x58] sm:$0xff] %v2722_v36   ;;  %v1636_v56 = vmul.f32 %v3183_v12, %v1509_v41  ;;  %v2610_v36 = vld [vmem:[%s3070_s13 + $0x214] sm:$0xf]  ;;  %v2330_v41 = vld [vmem:[%s3070_s13 + $0x21c] sm:$0xf0]  ;;  %v2433_v54 = vor.u32 %v2636_v38, %v2432_v37 }
 0x175   : > { %v2615_v35 = vld [vmem:[%s3070_s13 + $0x238] sm:$0xf0] }
 0x176   : > { %v1704_v11 = vadd.f32 %v3197_v22, %v1636_v56 }
 0x177   : > { %v3409_v58 = vpop.f32.mrf.mxu3 }
 0x178   : > { %v1768_v16 = vmax.f32 %v1704_v11, 0.0 }
 0x179   : > { %v1510_v60 = vpop.f32.mrf.mxu2  ;;  %v1175_v4 = vpop.f32.mrf.mxu0 }
 0x17a   : > { %v1511_v2 = vadd.f32 %v1510_v60, %v1342_v57  ;;  %v1344_v10 = vpop.f32.mrf.mxu1  ;;  %v2333_v60 = vor.u32 %v2610_v36, %v2330_v41  ;;  %v3445_v36 = vld [vmem:[%s3591_s2] ss:$0 sm:$0xff] }
 0x17b   : > { %v1345_v20 = vadd.f32 %v1344_v10, %v1175_v4 }
 0x17c   : > { %v1637_v14 = vmul.f32 %v3183_v12, %v1511_v2  ;;  %1214 = vmatmul.bf16.gmra.mxu0 %v2317_v63  ;;  %1592 = vmatmul.bf16.gmra.mxu3 %v2421_v1  ;;  %v2337_v63 = vor.u32 %v2612_v46, %v2336_v45 }
 0x17d   : > { %1383 = vmatmul.bf16.gmra.mxu1 %v2321_v5 }
 0x17e   : > { %v1705_v15 = vadd.f32 %v3197_v22, %v1637_v14  ;;  %1552 = vmatmul.bf16.gmra.mxu2 %v2325_v8 }
 0x17f   : > { %v3414_v21 = vpop.f32.mrf.mxu3 }
 0x180   : > { %v1769_v17 = vmax.f32 %v1705_v15, 0.0 }
 0x181   : > { %v1513_v23 = vpop.f32.mrf.mxu2  ;;  %v1177_v29 = vpop.f32.mrf.mxu0 }
 0x182   : > { %v2727_v28 = vpack.c.bf16 %v1769_v17, %v1768_v16  ;;  %v1346_v30 = vpop.f32.mrf.mxu1  ;;  %v1514_v31 = vadd.f32 %v1513_v23, %v1345_v20  ;;  %v2340_v23 = vld [vmem:[%s3070_s13 + $0x228] sm:$0xf] }
 0x183   : > { %v1347_v50 = vadd.f32 %v1346_v30, %v1177_v29  ;;  %v2444_v29 = vld [vmem:[%s3070_s13 + $0x2f0] sm:$0xf]  ;;  %v2639_v30 = vld [vmem:[%s3070_s13 + $0x2f8] sm:$0xf0] }
 0x184   : > { %2835 = vst [vmem:[%s3210_s11 + $0x60] sm:$0xff] %v2727_v28   ;;  %v1638_v47 = vmul.f32 %v3183_v12, %v1514_v31  ;;  %v2613_v28 = vld [vmem:[%s3070_s13 + $0x22c] sm:$0xf]  ;;  %v2342_v31 = vld [vmem:[%s3070_s13 + $0x234] sm:$0xf0] }
 0x186   : > { %v1706_v2 = vadd.f32 %v3197_v22, %v1638_v47  ;;  %v2445_v47 = vor.u32 %v2639_v30, %v2444_v29 }
 0x187   : > { %v3426_v51 = vpop.f32.mrf.mxu3 }
 0x188   : > { %v1770_v8 = vmax.f32 %v1706_v2, 0.0 }
 0x189   : > { %v1515_v52 = vpop.f32.mrf.mxu2  ;;  %v1180_v57 = vpop.f32.mrf.mxu0 }
 0x18a   : > { %v1516_v56 = vadd.f32 %v1515_v52, %v1347_v50  ;;  %v1349_v1 = vpop.f32.mrf.mxu1 }
 0x18b   : > { %v1350_v11 = vadd.f32 %v1349_v1, %v1180_v57  ;;  %v3453_v57 = vld [vmem:[%s3592_s3] ss:$0 sm:$0xff] }
 0x18c   : > { %v1639_v4 = vmul.f32 %v3183_v12, %v1516_v56  ;;  %1219 = vmatmul.bf16.gmra.mxu0 %v2329_v53  ;;  %1597 = vmatmul.bf16.gmra.mxu3 %v2433_v54  ;;  %v2345_v53 = vor.u32 %v2613_v28, %v2342_v31  ;;  %v2349_v54 = vor.u32 %v2615_v35, %v2348_v33 }
 0x18d   : > { %1388 = vmatmul.bf16.gmra.mxu1 %v2333_v60 }
 0x18e   : > { %v1707_v5 = vadd.f32 %v3197_v22, %v1639_v4  ;;  %1557 = vmatmul.bf16.gmra.mxu2 %v2337_v63  ;;  %v2614_v22 = vld [vmem:[%s3070_s13 + $0x230] sm:$0xf0] }
 0x18f   : > { %v3431_v14 = vpop.f32.mrf.mxu3  ;;  %v2341_v46 = vor.u32 %v2614_v22, %v2340_v23 }
 0x190   : > { %v1771_v10 = vmax.f32 %v1707_v5, 0.0 }
 0x191   : > { %v1518_v12 = vpop.f32.mrf.mxu2  ;;  %v1182_v16 = vpop.f32.mrf.mxu0 }
 0x192   : > { %v2732_v15 = vpack.c.bf16 %v1771_v10, %v1770_v8  ;;  %v1351_v17 = vpop.f32.mrf.mxu1  ;;  %v1519_v20 = vadd.f32 %v1518_v12, %v1350_v11 }
 0x193   : > { %v1352_v38 = vadd.f32 %v1351_v17, %v1182_v16 }
 0x194   : > { %2836 = vst [vmem:[%s3210_s11 + $0x68] sm:$0xff] %v2732_v15   ;;  %v1640_v37 = vmul.f32 %v3445_v36, %v1519_v20 }
 0x196   : > { %v1708_v60 = vadd.f32 %v3453_v57, %v1640_v37 }
 0x197   : > { %v3448_v41 = vpop.f32.mrf.mxu3 }
 0x198   : > { %v1772_v2 = vmax.f32 %v1708_v60, 0.0 }
 0x199   : > { %v1520_v45 = vpop.f32.mrf.mxu2  ;;  %v1185_v52 = vpop.f32.mrf.mxu0 }
 0x19a   : > { %v1521_v50 = vadd.f32 %v1520_v45, %v1352_v38  ;;  %v1354_v56 = vpop.f32.mrf.mxu1 }
 0x19b   : > { %v1355_v5 = vadd.f32 %v1354_v56, %v1185_v52 }
 0x19c   : > { %v1641_v63 = vmul.f32 %v3445_v36, %v1521_v50  ;;  %1224 = vmatmul.bf16.gmra.mxu0 %v2341_v46  ;;  %1602 = vmatmul.bf16.gmra.mxu3 %v2445_v47  ;;  %v1400_v47 = vadd.f32 %v3329_v40, %v3178_v7 }
 0x19d   : > { %1393 = vmatmul.bf16.gmra.mxu1 %v2345_v53 }
 0x19e   : > { %v1709_v1 = vadd.f32 %v3453_v57, %v1641_v63  ;;  %1562 = vmatmul.bf16.gmra.mxu2 %v2349_v54  ;;  %v1402_v63 = vadd.f32 %v3341_v61, %v3199_v25 }
 0x19f   : > { %v3458_v8 = vpop.f32.mrf.mxu3 }
 0x1a0   : > { %v1773_v4 = vmax.f32 %v1709_v1, 0.0 }
 0x1a1   : > { %v1523_v10 = vpop.f32.mrf.mxu2  ;;  %v1187_v12 = vpop.f32.mrf.mxu0 }
 0x1a2   : > { %v2737_v11 = vpack.c.bf16 %v1773_v4, %v1772_v2  ;;  %v1356_v15 = vpop.f32.mrf.mxu1  ;;  %v1524_v16 = vadd.f32 %v1523_v10, %v1355_v5 }
 0x1a3   : > { %v1357_v20 = vadd.f32 %v1356_v15, %v1187_v12 }
 0x1a4   : > { %2837 = vst [vmem:[%s3210_s11 + $0x70] sm:$0xff] %v2737_v11   ;;  %v1642_v17 = vmul.f32 %v3445_v36, %v1524_v16 }
 0x1a6   : > { %v1710_v31 = vadd.f32 %v3453_v57, %v1642_v17 }
 0x1a7   : > { %v3462_v23 = vpop.f32.mrf.mxu3 }
 0x1a8   : > { %v1774_v37 = vmax.f32 %v1710_v31, 0.0 }
 0x1a9   : > { %v1525_v22 = vpop.f32.mrf.mxu2  ;;  %v1190_v29 = vpop.f32.mrf.mxu0 }
 0x1aa   : > { %v1526_v28 = vadd.f32 %v1525_v22, %v1357_v20  ;;  %v1359_v30 = vpop.f32.mrf.mxu1 }
 0x1ab   : > { %v1360_v45 = vadd.f32 %v1359_v30, %v1190_v29 }
 0x1ac   : > { %v1643_v33 = vmul.f32 %v3445_v36, %v1526_v28 }
 0x1ae   : > { %v1711_v35 = vadd.f32 %v3453_v57, %v1643_v33 }
 0x1af   : > { %v1568_v46 = vpop.f32.mrf.mxu3 }
 0x1b0   : > { %v1775_v38 = vmax.f32 %v1711_v35, 0.0  ;;  %v1569_v54 = vadd.f32 %v1568_v46, %v1400_v47  ;;  %v1405_v35 = vadd.f32 %v3346_v18, %v3205_v39 }
 0x1b1   : > { %v1528_v50 = vpop.f32.mrf.mxu2  ;;  %v1192_v53 = vpop.f32.mrf.mxu0 }
 0x1b2   : > { %v2742_v52 = vpack.c.bf16 %v1775_v38, %v1774_v37  ;;  %v1361_v56 = vpop.f32.mrf.mxu1  ;;  %v1529_v60 = vadd.f32 %v1528_v50, %v1360_v45  ;;  %v1660_v1 = vmul.f32 %v3445_v36, %v1569_v54 }
 0x1b3   : > { %v1362_v4 = vadd.f32 %v1361_v56, %v1192_v53  ;;  %v1407_v53 = vadd.f32 %v3358_v43, %v3222_v55 }
 0x1b4   : > { %2838 = vst [vmem:[%s3210_s11 + $0x78] sm:$0xff] %v2742_v52   ;;  %v1644_v2 = vmul.f32 %v3445_v36, %v1529_v60  ;;  %v1728_v40 = vadd.f32 %v3453_v57, %v1660_v1 }
 0x1b6   : > { %v1712_v17 = vadd.f32 %v3453_v57, %v1644_v2  ;;  %v1792_v22 = vmax.f32 %v1728_v40, 0.0 }
 0x1b7   : > { %v1570_v5 = vpop.f32.mrf.mxu3 }
 0x1b8   : > { %v1571_v11 = vadd.f32 %v1570_v5, %v1402_v63  ;;  %v1776_v29 = vmax.f32 %v1712_v17, 0.0 }
 0x1b9   : > { %v1530_v10 = vpop.f32.mrf.mxu2  ;;  %v1195_v7 = vpop.f32.mrf.mxu0 }
 0x1ba   : > { %v1531_v12 = vadd.f32 %v1530_v10, %v1362_v4  ;;  %v1661_v15 = vmul.f32 %v3445_v36, %v1571_v11  ;;  %v1364_v16 = vpop.f32.mrf.mxu1 }
 0x1bb   : > { %v1365_v31 = vadd.f32 %v1364_v16, %v1195_v7 }
 0x1bc   : > { %v1645_v25 = vmul.f32 %v3445_v36, %v1531_v12  ;;  %v1729_v61 = vadd.f32 %v3453_v57, %v1661_v15 }
 0x1be   : > { %v1713_v20 = vadd.f32 %v3453_v57, %v1645_v25  ;;  %v1793_v28 = vmax.f32 %v1729_v61, 0.0  ;;  %v1410_v61 = vadd.f32 %v3363_v0, %v3227_v6 }
 0x1bf   : > { %v1573_v33 = vpop.f32.mrf.mxu3 }
 0x1c0   : > { %v1777_v30 = vmax.f32 %v1713_v20, 0.0  ;;  %v2787_v37 = vpack.c.bf16 %v1793_v28, %v1792_v22  ;;  %v1574_v47 = vadd.f32 %v1573_v33, %v1405_v35  ;;  %v1412_v35 = vadd.f32 %v3375_v27, %v3239_v26 }
 0x1c1   : > { %v1533_v38 = vpop.f32.mrf.mxu2  ;;  %v1197_v46 = vpop.f32.mrf.mxu0 }
 0x1c2   : > { %v2747_v45 = vpack.c.bf16 %v1777_v30, %v1776_v29  ;;  %2847 = vst [vmem:[%s3210_s11 + $0xc0] sm:$0xff] %v2787_v37   ;;  %v1366_v50 = vpop.f32.mrf.mxu1  ;;  %v1534_v52 = vadd.f32 %v1533_v38, %v1365_v31  ;;  %v1662_v54 = vmul.f32 %v3445_v36, %v1574_v47 }
 0x1c3   : > { %v1367_v60 = vadd.f32 %v1366_v50, %v1197_v46 }
 0x1c4   : > { %2839 = vst [vmem:[%s3210_s11 + $0x80] sm:$0xff] %v2747_v45   ;;  %v1646_v56 = vmul.f32 %v3445_v36, %v1534_v52  ;;  %v1730_v4 = vadd.f32 %v3453_v57, %v1662_v54 }
 0x1c6   : > { %v1714_v11 = vadd.f32 %v3453_v57, %v1646_v56  ;;  %v1794_v7 = vmax.f32 %v1730_v4, 0.0 }
 0x1c7   : > { %v1575_v63 = vpop.f32.mrf.mxu3 }
 0x1c8   : > { %v1576_v39 = vadd.f32 %v1575_v63, %v1407_v53  ;;  %v1778_v15 = vmax.f32 %v1714_v11, 0.0 }
 0x1c9   : > { %v1535_v1 = vpop.f32.mrf.mxu2  ;;  %v1200_v2 = vpop.f32.mrf.mxu0 }
 0x1ca   : > { %v1536_v18 = vadd.f32 %v1535_v1, %v1367_v60  ;;  %v1663_v5 = vmul.f32 %v3445_v36, %v1576_v39  ;;  %v1369_v10 = vpop.f32.mrf.mxu1 }
 0x1cb   : > { %v1370_v17 = vadd.f32 %v1369_v10, %v1200_v2 }
 0x1cc   : > { %v1647_v55 = vmul.f32 %v3445_v36, %v1536_v18  ;;  %v1731_v43 = vadd.f32 %v3453_v57, %v1663_v5  ;;  %v1415_v5 = vadd.f32 %v3380_v48, %v3244_v42 }
 0x1ce   : > { %v1715_v12 = vadd.f32 %v3453_v57, %v1647_v55  ;;  %v1795_v40 = vmax.f32 %v1731_v43, 0.0 }
 0x1cf   : > { %v1578_v25 = vpop.f32.mrf.mxu3 }
 0x1d0   : > { %v1779_v16 = vmax.f32 %v1715_v12, 0.0  ;;  %v2792_v20 = vpack.c.bf16 %v1795_v40, %v1794_v7  ;;  %v1579_v30 = vadd.f32 %v1578_v25, %v1410_v61 }
 0x1d1   : > { %v1538_v22 = vpop.f32.mrf.mxu2  ;;  %v1202_v29 = vpop.f32.mrf.mxu0 }
 0x1d2   : > { %v2752_v28 = vpack.c.bf16 %v1779_v16, %v1778_v15  ;;  %2848 = vst [vmem:[%s3210_s11 + $0xc8] sm:$0xff] %v2792_v20   ;;  %v1371_v31 = vpop.f32.mrf.mxu1  ;;  %v1539_v33 = vadd.f32 %v1538_v22, %v1370_v17  ;;  %v1664_v37 = vmul.f32 %v3445_v36, %v1579_v30  ;;  %v1417_v15 = vadd.f32 %v3392_v9, %v3256_v59 }
 0x1d3   : > { %v1372_v45 = vadd.f32 %v1371_v31, %v1202_v29 }
 0x1d4   : > { %2840 = vst [vmem:[%s3210_s11 + $0x88] sm:$0xff] %v2752_v28   ;;  %v1648_v38 = vmul.f32 %v3445_v36, %v1539_v33  ;;  %v1732_v52 = vadd.f32 %v3453_v57, %v1664_v37 }
 0x1d6   : > { %v1716_v56 = vadd.f32 %v3453_v57, %v1648_v38  ;;  %v1796_v63 = vmax.f32 %v1732_v52, 0.0 }
 0x1d7   : > { %v1580_v46 = vpop.f32.mrf.mxu3 }
 0x1d8   : > { %v1581_v6 = vadd.f32 %v1580_v46, %v1412_v35  ;;  %v1780_v39 = vmax.f32 %v1716_v56, 0.0 }
 0x1d9   : > { %v1540_v47 = vpop.f32.mrf.mxu2  ;;  %v1205_v50 = vpop.f32.mrf.mxu0 }
 0x1da   : > { %v1541_v0 = vadd.f32 %v1540_v47, %v1372_v45  ;;  %v1665_v53 = vmul.f32 %v3445_v36, %v1581_v6  ;;  %v1374_v54 = vpop.f32.mrf.mxu1  ;;  %v1420_v6 = vadd.f32 %v3397_v34, %v3261_v13 }
 0x1db   : > { %v1375_v2 = vadd.f32 %v1374_v54, %v1205_v50 }
 0x1dc   : > { %v1649_v26 = vmul.f32 %v3445_v36, %v1541_v0  ;;  %v1733_v27 = vadd.f32 %v3453_v57, %v1665_v53 }
 0x1de   : > { %v1717_v60 = vadd.f32 %v3453_v57, %v1649_v26  ;;  %v1797_v1 = vmax.f32 %v1733_v27, 0.0  ;;  %v1422_v27 = vadd.f32 %v3409_v58, %v3273_v32 }
 0x1df   : > { %v1583_v4 = vpop.f32.mrf.mxu3 }
 0x1e0   : > { %v1781_v18 = vmax.f32 %v1717_v60, 0.0  ;;  %v2797_v10 = vpack.c.bf16 %v1797_v1, %v1796_v63  ;;  %v1584_v12 = vadd.f32 %v1583_v4, %v1415_v5 }
 0x1e1   : > { %v1543_v11 = vpop.f32.mrf.mxu2  ;;  %v1207_v43 = vpop.f32.mrf.mxu0 }
 0x1e2   : > { %v2757_v55 = vpack.c.bf16 %v1781_v18, %v1780_v39  ;;  %2849 = vst [vmem:[%s3210_s11 + $0xd0] sm:$0xff] %v2797_v10   ;;  %v1376_v7 = vpop.f32.mrf.mxu1  ;;  %v1544_v40 = vadd.f32 %v1543_v11, %v1375_v2  ;;  %v1666_v16 = vmul.f32 %v3445_v36, %v1584_v12 }
 0x1e3   : > { %v1377_v25 = vadd.f32 %v1376_v7, %v1207_v43 }
 0x1e4   : > { %2841 = vst [vmem:[%s3210_s11 + $0x90] sm:$0xff] %v2757_v55   ;;  %v1650_v17 = vmul.f32 %v3445_v36, %v1544_v40  ;;  %v1734_v28 = vadd.f32 %v3453_v57, %v1666_v16 }
 0x1e6   : > { %v1718_v31 = vadd.f32 %v3453_v57, %v1650_v17  ;;  %v1798_v35 = vmax.f32 %v1734_v28, 0.0  ;;  %v1425_v17 = vadd.f32 %v3414_v21, %v3278_v49 }
 0x1e7   : > { %v1585_v61 = vpop.f32.mrf.mxu3 }
 0x1e8   : > { %v1586_v42 = vadd.f32 %v1585_v61, %v1417_v15  ;;  %v1782_v38 = vmax.f32 %v1718_v31, 0.0 }
 0x1e9   : > { %v1545_v20 = vpop.f32.mrf.mxu2  ;;  %v1210_v22 = vpop.f32.mrf.mxu0 }
 0x1ea   : > { %v1546_v48 = vadd.f32 %v1545_v20, %v1377_v25  ;;  %v1667_v29 = vmul.f32 %v3445_v36, %v1586_v42  ;;  %v1379_v30 = vpop.f32.mrf.mxu1 }
 0x1eb   : > { %v1380_v46 = vadd.f32 %v1379_v30, %v1210_v22 }
 0x1ec   : > { %v1651_v59 = vmul.f32 %v3445_v36, %v1546_v48  ;;  %v1735_v9 = vadd.f32 %v3453_v57, %v1667_v29  ;;  %v1427_v29 = vadd.f32 %v3426_v51, %v3290_v3 }
 0x1ee   : > { %v1719_v33 = vadd.f32 %v3453_v57, %v1651_v59  ;;  %v1799_v37 = vmax.f32 %v1735_v9, 0.0 }
 0x1ef   : > { %v1588_v47 = vpop.f32.mrf.mxu3 }
 0x1f0   : > { %v1783_v45 = vmax.f32 %v1719_v33, 0.0  ;;  %v2802_v0 = vpack.c.bf16 %v1799_v37, %v1798_v35  ;;  %v1589_v54 = vadd.f32 %v1588_v47, %v1420_v6 }
 0x1f1   : > { %v1548_v50 = vpop.f32.mrf.mxu2  ;;  %v1212_v53 = vpop.f32.mrf.mxu0 }
 0x1f2   : > { %v2762_v52 = vpack.c.bf16 %v1783_v45, %v1782_v38  ;;  %2850 = vst [vmem:[%s3210_s11 + $0xd8] sm:$0xff] %v2802_v0   ;;  %v1381_v56 = vpop.f32.mrf.mxu1  ;;  %v1549_v26 = vadd.f32 %v1548_v50, %v1380_v46  ;;  %v1668_v60 = vmul.f32 %v3445_v36, %v1589_v54 }
 0x1f3   : > { %v1382_v1 = vadd.f32 %v1381_v56, %v1212_v53  ;;  %v1430_v56 = vadd.f32 %v3431_v14, %v3295_v24 }
 0x1f4   : > { %2842 = vst [vmem:[%s3210_s11 + $0x98] sm:$0xff] %v2762_v52   ;;  %v1652_v63 = vmul.f32 %v3445_v36, %v1549_v26  ;;  %v1736_v4 = vadd.f32 %v3453_v57, %v1668_v60 }
 0x1f6   : > { %v1720_v11 = vadd.f32 %v3453_v57, %v1652_v63  ;;  %v1800_v43 = vmax.f32 %v1736_v4, 0.0 }
 0x1f7   : > { %v1590_v39 = vpop.f32.mrf.mxu3 }
 0x1f8   : > { %v1591_v13 = vadd.f32 %v1590_v39, %v1422_v27  ;;  %v1784_v7 = vmax.f32 %v1720_v11, 0.0 }
 0x1f9   : > { %v1550_v18 = vpop.f32.mrf.mxu2  ;;  %v1215_v2 = vpop.f32.mrf.mxu0 }
 0x1fa   : > { %v1551_v34 = vadd.f32 %v1550_v18, %v1382_v1  ;;  %v1669_v5 = vmul.f32 %v3445_v36, %v1591_v13  ;;  %v1384_v10 = vpop.f32.mrf.mxu1  ;;  %v1432_v13 = vadd.f32 %v3448_v41, %v3307_v44 }
 0x1fb   : > { %v1385_v15 = vadd.f32 %v1384_v10, %v1215_v2 }
 0x1fc   : > { %v1653_v32 = vmul.f32 %v3445_v36, %v1551_v34  ;;  %v1737_v58 = vadd.f32 %v3453_v57, %v1669_v5 }
 0x1fe   : > { %v1721_v55 = vadd.f32 %v3453_v57, %v1653_v32  ;;  %v1801_v12 = vmax.f32 %v1737_v58, 0.0 }
 0x1ff   : > { %v1593_v16 = vpop.f32.mrf.mxu3 }
 0x200   : > { %v1785_v40 = vmax.f32 %v1721_v55, 0.0  ;;  %v2807_v25 = vpack.c.bf16 %v1801_v12, %v1800_v43  ;;  %v1594_v48 = vadd.f32 %v1593_v16, %v1425_v17 }
 0x201   : > { %v1553_v61 = vpop.f32.mrf.mxu2  ;;  %v1217_v42 = vpop.f32.mrf.mxu0 }
 0x202   : > { %v2767_v20 = vpack.c.bf16 %v1785_v40, %v1784_v7  ;;  %2851 = vst [vmem:[%s3210_s11 + $0xe0] sm:$0xff] %v2807_v25   ;;  %v1386_v22 = vpop.f32.mrf.mxu1  ;;  %v1554_v28 = vadd.f32 %v1553_v61, %v1385_v15  ;;  %v1670_v30 = vmul.f32 %v3445_v36, %v1594_v48  ;;  %v1435_v61 = vadd.f32 %v3458_v8, %v3312_v62 }
 0x203   : > { %v1387_v59 = vadd.f32 %v1386_v22, %v1217_v42 }
 0x204   : > { %2843 = vst [vmem:[%s3210_s11 + $0xa0] sm:$0xff] %v2767_v20   ;;  %v1654_v31 = vmul.f32 %v3445_v36, %v1554_v28  ;;  %v1738_v37 = vadd.f32 %v3453_v57, %v1670_v30 }
 0x206   : > { %v1722_v46 = vadd.f32 %v3453_v57, %v1654_v31  ;;  %v1802_v6 = vmax.f32 %v1738_v37, 0.0  ;;  %v1437_v31 = vadd.f32 %v3462_v23, %v3324_v19 }
 0x207   : > { %v1595_v9 = vpop.f32.mrf.mxu3 }
 0x208   : > { %v1596_v49 = vadd.f32 %v1595_v9, %v1427_v29  ;;  %v1786_v50 = vmax.f32 %v1722_v46, 0.0 }
 0x209   : > { %v1555_v33 = vpop.f32.mrf.mxu2  ;;  %v1220_v35 = vpop.f32.mrf.mxu0 }
 0x20a   : > { %v1556_v21 = vadd.f32 %v1555_v33, %v1387_v59  ;;  %v1671_v38 = vmul.f32 %v3445_v36, %v1596_v49  ;;  %v1389_v45 = vpop.f32.mrf.mxu1 }
 0x20b   : > { %v1390_v53 = vadd.f32 %v1389_v45, %v1220_v35 }
 0x20c   : > { %v1655_v3 = vmul.f32 %v3445_v36, %v1556_v21  ;;  %v1739_v51 = vadd.f32 %v3453_v57, %v1671_v38 }
 0x20e   : > { %v1723_v47 = vadd.f32 %v3453_v57, %v1655_v3  ;;  %v1803_v0 = vmax.f32 %v1739_v51, 0.0 }
 0x20f   : > { %v1598_v54 = vpop.f32.mrf.mxu3 }
 0x210   : > { %v1787_v52 = vmax.f32 %v1723_v47, 0.0  ;;  %v2812_v26 = vpack.c.bf16 %v1803_v0, %v1802_v6  ;;  %v1599_v1 = vadd.f32 %v1598_v54, %v1430_v56 }
 0x211   : > { %v1558_v27 = vpop.f32.mrf.mxu2  ;;  %v1222_v63 = vpop.f32.mrf.mxu0 }
 0x212   : > { %v2772_v60 = vpack.c.bf16 %v1787_v52, %v1786_v50  ;;  %2852 = vst [vmem:[%s3210_s11 + $0xe8] sm:$0xff] %v2812_v26   ;;  %v1391_v39 = vpop.f32.mrf.mxu1  ;;  %v1559_v18 = vadd.f32 %v1558_v27, %v1390_v53  ;;  %v1672_v34 = vmul.f32 %v3445_v36, %v1599_v1 }
 0x213   : > { %v1392_v4 = vadd.f32 %v1391_v39, %v1222_v63 }
 0x214   : > { %2844 = vst [vmem:[%s3210_s11 + $0xa8] sm:$0xff] %v2772_v60   ;;  %v1656_v2 = vmul.f32 %v3445_v36, %v1559_v18  ;;  %v1740_v11 = vadd.f32 %v3453_v57, %v1672_v34 }
 0x216   : > { %v1724_v43 = vadd.f32 %v3453_v57, %v1656_v2  ;;  %v1804_v7 = vmax.f32 %v1740_v11, 0.0 }
 0x217   : > { %v1600_v5 = vpop.f32.mrf.mxu3 }
 0x218   : > { %v1601_v24 = vadd.f32 %v1600_v5, %v1432_v13  ;;  %v1788_v15 = vmax.f32 %v1724_v43, 0.0 }
 0x219   : > { %v1560_v10 = vpop.f32.mrf.mxu2  ;;  %v1225_v58 = vpop.f32.mrf.mxu0 }
 0x21a   : > { %v1561_v14 = vadd.f32 %v1560_v10, %v1392_v4  ;;  %v1673_v32 = vmul.f32 %v3445_v36, %v1601_v24  ;;  %v1394_v55 = vpop.f32.mrf.mxu1 }
 0x21b   : > { %v1395_v17 = vadd.f32 %v1394_v55, %v1225_v58 }
 0x21c   : > { %v1657_v44 = vmul.f32 %v3445_v36, %v1561_v14  ;;  %v1741_v41 = vadd.f32 %v3453_v57, %v1673_v32 }
 0x21e   : > { %v1725_v12 = vadd.f32 %v3453_v57, %v1657_v44  ;;  %v1805_v40 = vmax.f32 %v1741_v41, 0.0 }
 0x21f   : > { %v1603_v25 = vpop.f32.mrf.mxu3 }
 0x220   : > { %v1789_v16 = vmax.f32 %v1725_v12, 0.0  ;;  %v2817_v20 = vpack.c.bf16 %v1805_v40, %v1804_v7  ;;  %v1604_v22 = vadd.f32 %v1603_v25, %v1435_v61 }
 0x221   : > { %v1563_v42 = vpop.f32.mrf.mxu2  ;;  %v1227_v29 = vpop.f32.mrf.mxu0 }
 0x222   : > { %v2777_v48 = vpack.c.bf16 %v1789_v16, %v1788_v15  ;;  %2853 = vst [vmem:[%s3210_s11 + $0xf0] sm:$0xff] %v2817_v20   ;;  %v1564_v28 = vadd.f32 %v1563_v42, %v1395_v17  ;;  %v1396_v30 = vpop.f32.mrf.mxu1  ;;  %v1674_v59 = vmul.f32 %v3445_v36, %v1604_v22 }
 0x223   : > { %v1397_v33 = vadd.f32 %v1396_v30, %v1227_v29 }
 0x224   : > { %2845 = vst [vmem:[%s3210_s11 + $0xb0] sm:$0xff] %v2777_v48   ;;  %v1658_v9 = vmul.f32 %v3445_v36, %v1564_v28  ;;  %v1742_v35 = vadd.f32 %v3453_v57, %v1674_v59 }
 0x226   : > { %v1726_v38 = vadd.f32 %v3453_v57, %v1658_v9  ;;  %v1806_v46 = vmax.f32 %v1742_v35, 0.0 }
 0x227   : > { %v1605_v49 = vpop.f32.mrf.mxu3 }
 0x228   : > { %v1606_v8 = vadd.f32 %v1605_v49, %v1437_v31  ;;  %v1790_v51 = vmax.f32 %v1726_v38, 0.0 }
 0x229   : > { %v1565_v62 = vpop.f32.mrf.mxu2 }
 0x22a   : > { %v1566_v21 = vadd.f32 %v1565_v62, %v1397_v33  ;;  %v1675_v37 = vmul.f32 %v3445_v36, %v1606_v8 }
 0x22c   : > { %v1659_v45 = vmul.f32 %v3445_v36, %v1566_v21  ;;  %v1743_v19 = vadd.f32 %v3453_v57, %v1675_v37 }
 0x22e   : > { %v1727_v23 = vadd.f32 %v3453_v57, %v1659_v45  ;;  %v1807_v3 = vmax.f32 %v1743_v19, 0.0 }
 0x230   : > { %v1791_v47 = vmax.f32 %v1727_v23, 0.0  ;;  %v2822_v6 = vpack.c.bf16 %v1807_v3, %v1806_v46 }
 0x232   : > { %v2782_v0 = vpack.c.bf16 %v1791_v47, %v1790_v51  ;;  %2854 = vst [vmem:[%s3210_s11 + $0xf8] sm:$0xff] %v2822_v6  }
 0x234   : > { %2846 = vst [vmem:[%s3210_s11 + $0xb8] sm:$0xff] %v2782_v0  }
 0x235 PF: > { %s14_s17 = sadd.s32 1, %s2930_s17   ;;  %s3594_s15 = smov %s2926_s16 }
 0x236   : > { %p11_p5 = scmp.ge.s32.totalorder %s14_s17, 4   ;;  %s3595_s16 = smov %s3597_s18 }
 0x238   :  { %13 = sbr.rel (!%p11_p5) target bundleno = 2 (0x2), region = 75 }

// kernel: _lambda_.24
= control target key start
LH: loop header
LB: loop body
LE: loop exit
PB: predicated region body
PF: predicated region fallthrough
CT: control target
= control target key end

     0   :  { %s749_s15 = smov 0   ;;  %s751_s16 = smov 0   ;;  %s822_s0 = inlined_call_operand.vmem [shape: bf16[128,128], index: 0, kind: input, shape index: {}]   ;;  %s823_s1 = inlined_call_operand.vmem [shape: bf16[128,128], index: 1, kind: input, shape index: {}]   ;;  %s824_s2 = inlined_call_operand.vmem [shape: f32[1,128], index: 2, kind: input, shape index: {}]   ;;  %s825_s3 = inlined_call_operand.vmem [shape: f32[1,128], index: 3, kind: input, shape index: {}]   ;;  %s826_s4 = inlined_call_operand.vmem [shape: bf16[128,128], index: 4, kind: output, shape index: {}]  }
   0x1   :  { %s753_s17 = smov 0  }
   0x2 LB: > { %s26_s18 = sadd.s32 1, %s718_s16  ;;  %p560_p0 = scmp.ge.s32.totalorder %s722_s17, 1  ;;  %s722_s17 = sphi %s753_s17, %s14_s17   ;;  %s718_s16 = sphi %s751_s16, %s828_s16   ;;  %s714_s15 = sphi %s749_s15, %s827_s15  }
   0x3   : > { %p28_p1 = scmp.ge.s32.totalorder %s26_s18, 2  ;;  %p202_p2 = scmp.lt.s32.totalorder %s722_s17, 3 }
   0x5   : > { %s830_s18 = smov (%p28_p1, %s26_s18), 0  ;;  %p203_p3 = pnand %p560_p0, %p202_p2 }
   0x6   : > { %s561_s27 = sshll.u32 (!%p203_p3), %s714_s15, 3 }
   0x7   : > { %206 = sbr.rel (%p203_p3) target bundleno = 195 (0xc3), region = 36  ;;  %p242_p4 = scmp.lt.s32.totalorder (!%p203_p3), %s561_s27, 15 }
   0xc   : > { %v626_v0 = vld [vmem:[%s823_s1 + $0x38] sm:$0xff]  ;;  %v625_v1 = vld [vmem:[%s823_s1 + $0x30] sm:$0xff]  ;;  %v624_v2 = vld [vmem:[%s823_s1 + $0x28] sm:$0xff]  ;;  %s832_s27 = smov (!%p242_p4, %s561_s27), 15 }
   0xd   : > { %362 = vmatpush.bf16.msra.mxu0 %v626_v0  ;;  %650 = vmatpush.bf16.msra.mxu1 %v626_v0  ;;  %v623_v3 = vld [vmem:[%s823_s1 + $0x20] sm:$0xff]  ;;  %v622_v4 = vld [vmem:[%s823_s1 + $0x18] sm:$0xff]  ;;  %v621_v5 = vld [vmem:[%s823_s1 + $0x10] sm:$0xff]  ;;  %s562_s8 = sshll.u32 %s832_s27, 2 }
   0xe   : > { %651 = vmatpush.bf16.msra.mxu2 %v626_v0  ;;  %652 = vmatpush.bf16.msra.mxu3 %v626_v0  ;;  %v620_v6 = vld [vmem:[%s823_s1 + $0x8] sm:$0xff]  ;;  %v619_v7 = vld [vmem:[%s823_s1] sm:$0xff]  ;;  %s245_s13 = scalar_lea.vmem %s822_s0, %s562_s8  ;;  %s264_s23 = scalar_lea.vmem %s826_s4, %s562_s8 }
   0xf   : > { %v615_v8 = vld [vmem:[%s245_s13] sm:$0xff]  ;;  %v616_v9 = vld [vmem:[%s245_s13 + $0x8] sm:$0xff]  ;;  %v617_v10 = vld [vmem:[%s245_s13 + $0x10] sm:$0xff] }
  0x10   : > { %v618_v11 = vld [vmem:[%s245_s13 + $0x18] sm:$0xff]  ;;  %v698_v14 = vld [vmem:[%s824_s2] ss:$0 sm:$0xff] }
  0x11   : > { %363 = vmatpush.bf16.msra.mxu0 %v625_v1  ;;  %653 = vmatpush.bf16.msra.mxu1 %v625_v1  ;;  %v699_v16 = vld [vmem:[%s825_s3] ss:$0 sm:$0xff] }
  0x12   : > { %654 = vmatpush.bf16.msra.mxu2 %v625_v1  ;;  %655 = vmatpush.bf16.msra.mxu3 %v625_v1 }
  0x15   : > { %364 = vmatpush.bf16.msra.mxu0 %v624_v2  ;;  %656 = vmatpush.bf16.msra.mxu1 %v624_v2 }
  0x16   : > { %657 = vmatpush.bf16.msra.mxu2 %v624_v2  ;;  %658 = vmatpush.bf16.msra.mxu3 %v624_v2 }
  0x19   : > { %365 = vmatpush.bf16.msra.mxu0 %v623_v3  ;;  %659 = vmatpush.bf16.msra.mxu1 %v623_v3 }
  0x1a   : > { %660 = vmatpush.bf16.msra.mxu2 %v623_v3  ;;  %661 = vmatpush.bf16.msra.mxu3 %v623_v3 }
  0x1d   : > { %366 = vmatpush.bf16.msra.mxu0 %v622_v4  ;;  %662 = vmatpush.bf16.msra.mxu1 %v622_v4 }
  0x1e   : > { %663 = vmatpush.bf16.msra.mxu2 %v622_v4  ;;  %664 = vmatpush.bf16.msra.mxu3 %v622_v4 }
  0x21   : > { %367 = vmatpush.bf16.msra.mxu0 %v621_v5  ;;  %665 = vmatpush.bf16.msra.mxu1 %v621_v5 }
  0x22   : > { %666 = vmatpush.bf16.msra.mxu2 %v621_v5  ;;  %667 = vmatpush.bf16.msra.mxu3 %v621_v5 }
  0x25   : > { %368 = vmatpush.bf16.msra.mxu0 %v620_v6  ;;  %668 = vmatpush.bf16.msra.mxu1 %v620_v6 }
  0x26   : > { %669 = vmatpush.bf16.msra.mxu2 %v620_v6  ;;  %670 = vmatpush.bf16.msra.mxu3 %v620_v6 }
  0x29   : > { %369 = vmatpush.bf16.msra.mxu0 %v619_v7  ;;  %671 = vmatpush.bf16.msra.mxu1 %v619_v7 }
  0x2a   : > { %672 = vmatpush.bf16.msra.mxu2 %v619_v7  ;;  %673 = vmatpush.bf16.msra.mxu3 %v619_v7 }
  0x2c   : > { %370 = vmatmul.bf16.vlgmr.msra.gmra.mxu0 %v615_v8  ;;  %375 = vmatmul.bf16.vlgmr.msra.gmra.mxu1 %v616_v9 }
  0x2d   : > { %380 = vmatmul.bf16.vlgmr.msra.gmra.mxu2 %v617_v10  ;;  %385 = vmatmul.bf16.vlgmr.msra.gmra.mxu3 %v618_v11 }
  0xa9   : > { %v371_v12 = vpop.f32.mrf.mxu0  ;;  %v376_v13 = vpop.f32.mrf.mxu1 }
  0xaa   : > { %v395_v15 = vmul.f32 %v698_v14, %v371_v12  ;;  %v397_v17 = vmul.f32 %v698_v14, %v376_v13 }
  0xac   : > { %v407_v22 = vadd.f32 %v699_v16, %v395_v15  ;;  %v409_v23 = vadd.f32 %v699_v16, %v397_v17 }
  0xae   : > { %v415_v30 = vmax.f32 %v407_v22, 0.0  ;;  %v417_v31 = vmax.f32 %v409_v23, 0.0 }
  0xb0   : > { %v381_v18 = vpop.f32.mrf.mxu2  ;;  %v386_v19 = vpop.f32.mrf.mxu3 }
  0xb1   : > { %v373_v20 = vpop.f32.mrf.mxu0  ;;  %v378_v21 = vpop.f32.mrf.mxu1  ;;  %v399_v28 = vmul.f32 %v698_v14, %v381_v18  ;;  %v401_v29 = vmul.f32 %v698_v14, %v386_v19 }
  0xb2   : > { %v396_v24 = vmul.f32 %v698_v14, %v373_v20  ;;  %v398_v25 = vmul.f32 %v698_v14, %v378_v21 }
  0xb3   : > { %v411_v38 = vadd.f32 %v699_v16, %v399_v28  ;;  %v413_v39 = vadd.f32 %v699_v16, %v401_v29 }
  0xb4   : > { %v408_v26 = vadd.f32 %v699_v16, %v396_v24  ;;  %v410_v27 = vadd.f32 %v699_v16, %v398_v25 }
  0xb5   : > { %v419_v44 = vmax.f32 %v411_v38, 0.0  ;;  %v421_v45 = vmax.f32 %v413_v39, 0.0 }
  0xb6   : > { %v416_v32 = vmax.f32 %v408_v26, 0.0  ;;  %v418_v33 = vmax.f32 %v410_v27, 0.0 }
  0xb8   : > { %v630_v34 = vpack.c.bf16 %v416_v32, %v415_v30  ;;  %v635_v35 = vpack.c.bf16 %v418_v33, %v417_v31  ;;  %v383_v36 = vpop.f32.mrf.mxu2  ;;  %v388_v37 = vpop.f32.mrf.mxu3 }
  0xb9   : > { %v400_v40 = vmul.f32 %v698_v14, %v383_v36  ;;  %v402_v41 = vmul.f32 %v698_v14, %v388_v37 }
  0xba   : > { %631 = vst [vmem:[%s264_s23] sm:$0xff] %v630_v34  }
  0xbb   : > { %647 = vst [vmem:[%s264_s23 + $0x8] sm:$0xff] %v635_v35   ;;  %v412_v42 = vadd.f32 %v699_v16, %v400_v40  ;;  %v414_v43 = vadd.f32 %v699_v16, %v402_v41 }
  0xbd   : > { %v420_v46 = vmax.f32 %v412_v42, 0.0  ;;  %v422_v47 = vmax.f32 %v414_v43, 0.0 }
  0xbf   : > { %v640_v48 = vpack.c.bf16 %v420_v46, %v419_v44  ;;  %v645_v49 = vpack.c.bf16 %v422_v47, %v421_v45 }
  0xc1   : > { %648 = vst [vmem:[%s264_s23 + $0x10] sm:$0xff] %v640_v48  }
  0xc2   : > { %649 = vst [vmem:[%s264_s23 + $0x18] sm:$0xff] %v645_v49  }
  0xc3 PF: > { %s14_s17 = sadd.s32 1, %s722_s17   ;;  %s827_s15 = smov %s718_s16 }
  0xc4   : > { %p11_p5 = scmp.ge.s32.totalorder %s14_s17, 4   ;;  %s828_s16 = smov %s830_s18 }
  0xc6   :  { %13 = sbr.rel (!%p11_p5) target bundleno = 2 (0x2), region = 75 }

// kernel: _lambda_.27
= control target key start
LH: loop header
LB: loop body
LE: loop exit
PB: predicated region body
PF: predicated region fallthrough
CT: control target
= control target key end

     0   :  { %s874_s18 = smov 0   ;;  %s876_s19 = smov 0   ;;  %s948_s0 = inlined_call_operand.vmem [shape: bf16[128,128], index: 0, kind: input, shape index: {}]   ;;  %s949_s1 = inlined_call_operand.vmem [shape: bf16[128,128], index: 1, kind: input, shape index: {}]   ;;  %s950_s2 = inlined_call_operand.vmem [shape: f32[1,128], index: 2, kind: input, shape index: {}]   ;;  %s951_s3 = inlined_call_operand.vmem [shape: f32[1,128], index: 3, kind: input, shape index: {}]   ;;  %s952_s4 = inlined_call_operand.vmem [shape: bf16[128,128], index: 4, kind: input, shape index: {}]   ;;  %s953_s5 = inlined_call_operand.vmem [shape: bf16[128,128], index: 5, kind: output, shape index: {}]  }
   0x1   :  { %s878_s20 = smov 0  }
   0x2 LB: > { %s27_s21 = sadd.s32 1, %s838_s19  ;;  %p659_p0 = scmp.ge.s32.totalorder %s842_s20, 1  ;;  %s842_s20 = sphi %s878_s20, %s15_s20   ;;  %s838_s19 = sphi %s876_s19, %s955_s19   ;;  %s834_s18 = sphi %s874_s18, %s954_s18  }
   0x3   : > { %p29_p1 = scmp.ge.s32.totalorder %s27_s21, 2  ;;  %p243_p2 = scmp.lt.s32.totalorder %s842_s20, 3 }
   0x5   : > { %s957_s21 = smov (%p29_p1, %s27_s21), 0  ;;  %p244_p3 = pnand %p659_p0, %p243_p2 }
   0x6   : > { %s660_s30 = sshll.u32 (!%p244_p3), %s834_s18, 3 }
   0x7   : > { %247 = sbr.rel (%p244_p3) target bundleno = 197 (0xc5), region = 40  ;;  %p293_p4 = scmp.lt.s32.totalorder (!%p244_p3), %s660_s30, 15 }
   0xc   : > { %v727_v0 = vld [vmem:[%s949_s1 + $0x38] sm:$0xff]  ;;  %v726_v1 = vld [vmem:[%s949_s1 + $0x30] sm:$0xff]  ;;  %v725_v2 = vld [vmem:[%s949_s1 + $0x28] sm:$0xff]  ;;  %s959_s30 = smov (!%p293_p4, %s660_s30), 15 }
   0xd   : > { %422 = vmatpush.bf16.msra.mxu0 %v727_v0  ;;  %770 = vmatpush.bf16.msra.mxu1 %v727_v0  ;;  %v724_v3 = vld [vmem:[%s949_s1 + $0x20] sm:$0xff]  ;;  %v723_v4 = vld [vmem:[%s949_s1 + $0x18] sm:$0xff]  ;;  %v722_v5 = vld [vmem:[%s949_s1 + $0x10] sm:$0xff]  ;;  %s916_s12 = sshll.u32 %s959_s30, 2 }
   0xe   : > { %771 = vmatpush.bf16.msra.mxu2 %v727_v0  ;;  %772 = vmatpush.bf16.msra.mxu3 %v727_v0  ;;  %v721_v6 = vld [vmem:[%s949_s1 + $0x8] sm:$0xff]  ;;  %v720_v7 = vld [vmem:[%s949_s1] sm:$0xff]  ;;  %s296_s17 = scalar_lea.vmem %s948_s0, %s916_s12  ;;  %s315_s25 = scalar_lea.vmem %s952_s4, %s916_s12 }
   0xf   : > { %v716_v8 = vld [vmem:[%s296_s17] sm:$0xff]  ;;  %v717_v9 = vld [vmem:[%s296_s17 + $0x8] sm:$0xff]  ;;  %v718_v10 = vld [vmem:[%s296_s17 + $0x10] sm:$0xff]  ;;  %s324_s30 = scalar_lea.vmem %s953_s5, %s916_s12 }
  0x10   : > { %v719_v11 = vld [vmem:[%s296_s17 + $0x18] sm:$0xff]  ;;  %v818_v12 = vld [vmem:[%s950_s2] ss:$0 sm:$0xff]  ;;  %v764_v19 = vld [vmem:[%s315_s25 + $0x8] sm:$0xff]  }
  0x11   : > { %423 = vmatpush.bf16.msra.mxu0 %v726_v1  ;;  %773 = vmatpush.bf16.msra.mxu1 %v726_v1  ;;  %v819_v16 = vld [vmem:[%s951_s3] ss:$0 sm:$0xff]  ;;  %v734_v23 = vunpack.c.l.bf16 %v764_v19  ;;  %v735_v31 = vunpack.c.h.bf16 %v764_v19  ;;  %v765_v36 = vld [vmem:[%s315_s25 + $0x10] sm:$0xff]   ;;  %v766_v37 = vld [vmem:[%s315_s25 + $0x18] sm:$0xff]  }
  0x12   : > { %774 = vmatpush.bf16.msra.mxu2 %v726_v1  ;;  %775 = vmatpush.bf16.msra.mxu3 %v726_v1  ;;  %v729_v18 = vld [vmem:[%s315_s25] sm:$0xff]   ;;  %v738_v43 = vunpack.c.l.bf16 %v765_v36  ;;  %v742_v45 = vunpack.c.l.bf16 %v766_v37  ;;  %v739_v53 = vunpack.c.h.bf16 %v765_v36  ;;  %v743_v55 = vunpack.c.h.bf16 %v766_v37 }
  0x13   : > { %v730_v21 = vunpack.c.l.bf16 %v729_v18  ;;  %v731_v29 = vunpack.c.h.bf16 %v729_v18 }
  0x15   : > { %424 = vmatpush.bf16.msra.mxu0 %v725_v2  ;;  %776 = vmatpush.bf16.msra.mxu1 %v725_v2 }
  0x16   : > { %777 = vmatpush.bf16.msra.mxu2 %v725_v2  ;;  %778 = vmatpush.bf16.msra.mxu3 %v725_v2 }
  0x19   : > { %425 = vmatpush.bf16.msra.mxu0 %v724_v3  ;;  %779 = vmatpush.bf16.msra.mxu1 %v724_v3 }
  0x1a   : > { %780 = vmatpush.bf16.msra.mxu2 %v724_v3  ;;  %781 = vmatpush.bf16.msra.mxu3 %v724_v3 }
  0x1d   : > { %426 = vmatpush.bf16.msra.mxu0 %v723_v4  ;;  %782 = vmatpush.bf16.msra.mxu1 %v723_v4 }
  0x1e   : > { %783 = vmatpush.bf16.msra.mxu2 %v723_v4  ;;  %784 = vmatpush.bf16.msra.mxu3 %v723_v4 }
  0x21   : > { %427 = vmatpush.bf16.msra.mxu0 %v722_v5  ;;  %785 = vmatpush.bf16.msra.mxu1 %v722_v5 }
  0x22   : > { %786 = vmatpush.bf16.msra.mxu2 %v722_v5  ;;  %787 = vmatpush.bf16.msra.mxu3 %v722_v5 }
  0x25   : > { %428 = vmatpush.bf16.msra.mxu0 %v721_v6  ;;  %788 = vmatpush.bf16.msra.mxu1 %v721_v6 }
  0x26   : > { %789 = vmatpush.bf16.msra.mxu2 %v721_v6  ;;  %790 = vmatpush.bf16.msra.mxu3 %v721_v6 }
  0x29   : > { %429 = vmatpush.bf16.msra.mxu0 %v720_v7  ;;  %791 = vmatpush.bf16.msra.mxu1 %v720_v7 }
  0x2a   : > { %792 = vmatpush.bf16.msra.mxu2 %v720_v7  ;;  %793 = vmatpush.bf16.msra.mxu3 %v720_v7 }
  0x2c   : > { %430 = vmatmul.bf16.vlgmr.msra.gmra.mxu0 %v716_v8  ;;  %435 = vmatmul.bf16.vlgmr.msra.gmra.mxu1 %v717_v9 }
  0x2d   : > { %440 = vmatmul.bf16.vlgmr.msra.gmra.mxu2 %v718_v10  ;;  %445 = vmatmul.bf16.vlgmr.msra.gmra.mxu3 %v719_v11 }
  0xa9   : > { %v431_v13 = vpop.f32.mrf.mxu0  ;;  %v436_v14 = vpop.f32.mrf.mxu1 }
  0xaa   : > { %v455_v15 = vmul.f32 %v818_v12, %v431_v13  ;;  %v457_v17 = vmul.f32 %v818_v12, %v436_v14 }
  0xac   : > { %v467_v20 = vadd.f32 %v819_v16, %v455_v15  ;;  %v469_v22 = vadd.f32 %v819_v16, %v457_v17 }
  0xae   : > { %v491_v34 = vadd.f32 %v730_v21, %v467_v20  ;;  %v493_v35 = vadd.f32 %v734_v23, %v469_v22 }
  0xb0   : > { %v441_v24 = vpop.f32.mrf.mxu2  ;;  %v446_v25 = vpop.f32.mrf.mxu3  ;;  %v499_v46 = vmax.f32 %v491_v34, 0.0  ;;  %v501_v47 = vmax.f32 %v493_v35, 0.0 }
  0xb1   : > { %v433_v26 = vpop.f32.mrf.mxu0  ;;  %v438_v27 = vpop.f32.mrf.mxu1  ;;  %v459_v32 = vmul.f32 %v818_v12, %v441_v24  ;;  %v461_v33 = vmul.f32 %v818_v12, %v446_v25 }
  0xb2   : > { %v456_v28 = vmul.f32 %v818_v12, %v433_v26  ;;  %v458_v30 = vmul.f32 %v818_v12, %v438_v27 }
  0xb3   : > { %v471_v42 = vadd.f32 %v819_v16, %v459_v32  ;;  %v473_v44 = vadd.f32 %v819_v16, %v461_v33 }
  0xb4   : > { %v468_v38 = vadd.f32 %v819_v16, %v456_v28  ;;  %v470_v39 = vadd.f32 %v819_v16, %v458_v30 }
  0xb5   : > { %v495_v58 = vadd.f32 %v738_v43, %v471_v42  ;;  %v497_v59 = vadd.f32 %v742_v45, %v473_v44 }
  0xb6   : > { %v492_v40 = vadd.f32 %v731_v29, %v468_v38  ;;  %v494_v41 = vadd.f32 %v735_v31, %v470_v39 }
  0xb7   : > { %v503_v0 = vmax.f32 %v495_v58, 0.0  ;;  %v505_v1 = vmax.f32 %v497_v59, 0.0 }
  0xb8   : > { %v500_v48 = vmax.f32 %v492_v40, 0.0  ;;  %v502_v49 = vmax.f32 %v494_v41, 0.0  ;;  %v443_v50 = vpop.f32.mrf.mxu2  ;;  %v448_v51 = vpop.f32.mrf.mxu3 }
  0xb9   : > { %v460_v52 = vmul.f32 %v818_v12, %v443_v50  ;;  %v462_v54 = vmul.f32 %v818_v12, %v448_v51 }
  0xba   : > { %v747_v56 = vpack.c.bf16 %v500_v48, %v499_v46  ;;  %v752_v57 = vpack.c.bf16 %v502_v49, %v501_v47 }
  0xbb   : > { %v472_v60 = vadd.f32 %v819_v16, %v460_v52  ;;  %v474_v61 = vadd.f32 %v819_v16, %v462_v54 }
  0xbc   : > { %748 = vst [vmem:[%s324_s30] sm:$0xff] %v747_v56  }
  0xbd   : > { %767 = vst [vmem:[%s324_s30 + $0x8] sm:$0xff] %v752_v57   ;;  %v496_v62 = vadd.f32 %v739_v53, %v472_v60  ;;  %v498_v63 = vadd.f32 %v743_v55, %v474_v61 }
  0xbf   : > { %v504_v2 = vmax.f32 %v496_v62, 0.0  ;;  %v506_v3 = vmax.f32 %v498_v63, 0.0 }
  0xc1   : > { %v757_v4 = vpack.c.bf16 %v504_v2, %v503_v0  ;;  %v762_v5 = vpack.c.bf16 %v506_v3, %v505_v1 }
  0xc3   : > { %768 = vst [vmem:[%s324_s30 + $0x10] sm:$0xff] %v757_v4  }
  0xc4   : > { %769 = vst [vmem:[%s324_s30 + $0x18] sm:$0xff] %v762_v5  }
  0xc5 PF: > { %s15_s20 = sadd.s32 1, %s842_s20   ;;  %s954_s18 = smov %s838_s19 }
  0xc6   : > { %p12_p5 = scmp.ge.s32.totalorder %s15_s20, 4   ;;  %s955_s19 = smov %s957_s21 }
  0xc8   :  { %14 = sbr.rel (!%p12_p5) target bundleno = 2 (0x2), region = 82 }

// kernel: _lambda_.28
= control target key start
LH: loop header
LB: loop body
LE: loop exit
PB: predicated region body
PF: predicated region fallthrough
CT: control target
= control target key end

     0   :  { %s286_s1 = inlined_call_operand.vmem [shape: bf16[128,128], index: 1, kind: input, shape index: {}]   ;;  %s287_s2 = inlined_call_operand.vmem [shape: f32[1,128], index: 2, kind: input, shape index: {}]   ;;  %s288_s3 = inlined_call_operand.vmem [shape: f32[1,128], index: 3, kind: input, shape index: {}]   ;;  %s289_s0 = inlined_call_operand.vmem [shape: bf16[32,128], index: 0, kind: input, shape index: {}]   ;;  %s290_s4 = inlined_call_operand.vmem [shape: bf16[32,128], index: 4, kind: output, shape index: {}]  }
   0x1   :  { %v197_v0 = vld [vmem:[%s286_s1 + $0x38] sm:$0xff]  ;;  %v196_v1 = vld [vmem:[%s286_s1 + $0x30] sm:$0xff]  ;;  %v195_v2 = vld [vmem:[%s286_s1 + $0x28] sm:$0xff] }
   0x2   :  { %97 = vmatpush.bf16.msra.mxu0 %v197_v0  ;;  %209 = vmatpush.bf16.msra.mxu1 %v197_v0  ;;  %v194_v3 = vld [vmem:[%s286_s1 + $0x20] sm:$0xff]  ;;  %v193_v4 = vld [vmem:[%s286_s1 + $0x18] sm:$0xff]  ;;  %v192_v5 = vld [vmem:[%s286_s1 + $0x10] sm:$0xff] }
   0x3   :  { %v191_v6 = vld [vmem:[%s286_s1 + $0x8] sm:$0xff]  ;;  %v190_v7 = vld [vmem:[%s286_s1] sm:$0xff] }
   0x4   :  { %v188_v8 = vld [vmem:[%s289_s0] sm:$0xff]  ;;  %v189_v9 = vld [vmem:[%s289_s0 + $0x8] sm:$0xff] }
   0x5   :  { %v217_v12 = vld [vmem:[%s287_s2] ss:$0 sm:$0xff] }
   0x6   :  { %98 = vmatpush.bf16.msra.mxu0 %v196_v1  ;;  %210 = vmatpush.bf16.msra.mxu1 %v196_v1  ;;  %v218_v14 = vld [vmem:[%s288_s3] ss:$0 sm:$0xff] }
   0xa   :  { %99 = vmatpush.bf16.msra.mxu0 %v195_v2  ;;  %211 = vmatpush.bf16.msra.mxu1 %v195_v2 }
   0xe   :  { %100 = vmatpush.bf16.msra.mxu0 %v194_v3  ;;  %212 = vmatpush.bf16.msra.mxu1 %v194_v3 }
  0x12   :  { %101 = vmatpush.bf16.msra.mxu0 %v193_v4  ;;  %213 = vmatpush.bf16.msra.mxu1 %v193_v4 }
  0x16   :  { %102 = vmatpush.bf16.msra.mxu0 %v192_v5  ;;  %214 = vmatpush.bf16.msra.mxu1 %v192_v5 }
  0x1a   :  { %103 = vmatpush.bf16.msra.mxu0 %v191_v6  ;;  %215 = vmatpush.bf16.msra.mxu1 %v191_v6 }
  0x1e   :  { %104 = vmatpush.bf16.msra.mxu0 %v190_v7  ;;  %216 = vmatpush.bf16.msra.mxu1 %v190_v7 }
  0x21   :  { %105 = vmatmul.bf16.vlgmr.msra.gmra.mxu0 %v188_v8  ;;  %110 = vmatmul.bf16.vlgmr.msra.gmra.mxu1 %v189_v9 }
  0x9e   :  { %v106_v10 = vpop.f32.mrf.mxu0  ;;  %v111_v11 = vpop.f32.mrf.mxu1 }
  0x9f   :  { %v120_v13 = vmul.f32 %v217_v12, %v106_v10  ;;  %v122_v15 = vmul.f32 %v217_v12, %v111_v11 }
  0xa1   :  { %v128_v18 = vadd.f32 %v218_v14, %v120_v13  ;;  %v130_v19 = vadd.f32 %v218_v14, %v122_v15 }
  0xa3   :  { %v132_v24 = vmax.f32 %v128_v18, 0.0  ;;  %v134_v25 = vmax.f32 %v130_v19, 0.0 }
  0xa6   :  { %v108_v16 = vpop.f32.mrf.mxu0  ;;  %v113_v17 = vpop.f32.mrf.mxu1 }
  0xa7   :  { %v121_v20 = vmul.f32 %v217_v12, %v108_v16  ;;  %v123_v21 = vmul.f32 %v217_v12, %v113_v17 }
  0xa9   :  { %v129_v22 = vadd.f32 %v218_v14, %v121_v20  ;;  %v131_v23 = vadd.f32 %v218_v14, %v123_v21 }
  0xab   :  { %v133_v26 = vmax.f32 %v129_v22, 0.0  ;;  %v135_v27 = vmax.f32 %v131_v23, 0.0 }
  0xad   :  { %v201_v28 = vpack.c.bf16 %v133_v26, %v132_v24  ;;  %v206_v29 = vpack.c.bf16 %v135_v27, %v134_v25 }
  0xaf   :  { %202 = vst [vmem:[%s290_s4] sm:$0xff] %v201_v28  }
  0xb0   :  { %208 = vst [vmem:[%s290_s4 + $0x8] sm:$0xff] %v206_v29  }

// kernel: _lambda_.29
= control target key start
LH: loop header
LB: loop body
LE: loop exit
PB: predicated region body
PF: predicated region fallthrough
CT: control target
= control target key end

     0   :  { %s238_s1 = inlined_call_operand.vmem [shape: bf16[128,128], index: 1, kind: input, shape index: {}]   ;;  %s239_s2 = inlined_call_operand.vmem [shape: f32[1,128], index: 2, kind: input, shape index: {}]   ;;  %s240_s3 = inlined_call_operand.vmem [shape: f32[1,128], index: 3, kind: input, shape index: {}]   ;;  %s241_s0 = inlined_call_operand.vmem [shape: bf16[16,128], index: 0, kind: input, shape index: {}]   ;;  %s242_s4 = inlined_call_operand.vmem [shape: bf16[16,128], index: 4, kind: output, shape index: {}]  }
   0x1   :  { %v169_v0 = vld [vmem:[%s238_s1 + $0x38] sm:$0xff]  ;;  %v168_v1 = vld [vmem:[%s238_s1 + $0x30] sm:$0xff]  ;;  %v167_v2 = vld [vmem:[%s238_s1 + $0x28] sm:$0xff] }
   0x2   :  { %89 = vmatpush.bf16.msra.mxu0 %v169_v0  ;;  %v166_v3 = vld [vmem:[%s238_s1 + $0x20] sm:$0xff]  ;;  %v165_v4 = vld [vmem:[%s238_s1 + $0x18] sm:$0xff]  ;;  %v164_v5 = vld [vmem:[%s238_s1 + $0x10] sm:$0xff] }
   0x3   :  { %v163_v6 = vld [vmem:[%s238_s1 + $0x8] sm:$0xff]  ;;  %v162_v7 = vld [vmem:[%s238_s1] sm:$0xff] }
   0x4   :  { %v161_v8 = vld [vmem:[%s241_s0] sm:$0xff] }
   0x5   :  { %v175_v10 = vld [vmem:[%s239_s2] ss:$0 sm:$0xff] }
   0x6   :  { %90 = vmatpush.bf16.msra.mxu0 %v168_v1  ;;  %v176_v12 = vld [vmem:[%s240_s3] ss:$0 sm:$0xff] }
   0xa   :  { %91 = vmatpush.bf16.msra.mxu0 %v167_v2 }
   0xe   :  { %92 = vmatpush.bf16.msra.mxu0 %v166_v3 }
  0x12   :  { %93 = vmatpush.bf16.msra.mxu0 %v165_v4 }
  0x16   :  { %94 = vmatpush.bf16.msra.mxu0 %v164_v5 }
  0x1a   :  { %95 = vmatpush.bf16.msra.mxu0 %v163_v6 }
  0x1e   :  { %96 = vmatpush.bf16.msra.mxu0 %v162_v7 }
  0x21   :  { %97 = vmatmul.bf16.vlgmr.msra.gmra.mxu0 %v161_v8 }
  0x9e   :  { %v98_v9 = vpop.f32.mrf.mxu0 }
  0x9f   :  { %v107_v11 = vmul.f32 %v175_v10, %v98_v9 }
  0xa1   :  { %v113_v14 = vadd.f32 %v176_v12, %v107_v11 }
  0xa3   :  { %v115_v17 = vmax.f32 %v113_v14, 0.0 }
  0xa6   :  { %v100_v13 = vpop.f32.mrf.mxu0 }
  0xa7   :  { %v108_v15 = vmul.f32 %v175_v10, %v100_v13 }
  0xa9   :  { %v114_v16 = vadd.f32 %v176_v12, %v108_v15 }
  0xab   :  { %v116_v18 = vmax.f32 %v114_v16, 0.0 }
  0xad   :  { %v173_v19 = vpack.c.bf16 %v116_v18, %v115_v17 }
  0xaf   :  { %174 = vst [vmem:[%s242_s4] sm:$0xff] %v173_v19  }

// kernel: _lambda_.30
= control target key start
LH: loop header
LB: loop body
LE: loop exit
PB: predicated region body
PF: predicated region fallthrough
CT: control target
= control target key end

     0   :  { %s398_s1 = inlined_call_operand.vmem [shape: bf16[256,128], index: 1, kind: input, shape index: {}]   ;;  %s399_s0 = inlined_call_operand.vmem [shape: bf16[16,256], index: 0, kind: input, shape index: {}]   ;;  %s400_s2 = inlined_call_operand.vmem [shape: f32[1,128], index: 2, kind: input, shape index: {}]   ;;  %s401_s3 = inlined_call_operand.vmem [shape: f32[1,128], index: 3, kind: input, shape index: {}]   ;;  %s402_s4 = inlined_call_operand.vmem [shape: bf16[16,128], index: 4, kind: output, shape index: {}]  }
   0x1   :  { %v288_v0 = vld [vmem:[%s398_s1 + $0x38] sm:$0xff]  ;;  %v287_v2 = vld [vmem:[%s398_s1 + $0x30] sm:$0xff]  ;;  %v286_v4 = vld [vmem:[%s398_s1 + $0x28] sm:$0xff] }
   0x2   :  { %v296_v1 = vld [vmem:[%s398_s1 + $0x78] sm:$0xff]  ;;  %157 = vmatpush.bf16.msra.mxu0 %v288_v0  ;;  %v295_v3 = vld [vmem:[%s398_s1 + $0x70] sm:$0xff]  ;;  %v294_v5 = vld [vmem:[%s398_s1 + $0x68] sm:$0xff] }
   0x3   :  { %171 = vmatpush.bf16.msra.mxu1 %v296_v1  ;;  %v285_v6 = vld [vmem:[%s398_s1 + $0x20] sm:$0xff]  ;;  %v284_v8 = vld [vmem:[%s398_s1 + $0x18] sm:$0xff]  ;;  %v283_v10 = vld [vmem:[%s398_s1 + $0x10] sm:$0xff] }
   0x4   :  { %v293_v7 = vld [vmem:[%s398_s1 + $0x60] sm:$0xff]  ;;  %v292_v9 = vld [vmem:[%s398_s1 + $0x58] sm:$0xff]  ;;  %v291_v11 = vld [vmem:[%s398_s1 + $0x50] sm:$0xff] }
   0x5   :  { %v282_v12 = vld [vmem:[%s398_s1 + $0x8] sm:$0xff]  ;;  %v281_v14 = vld [vmem:[%s398_s1] sm:$0xff] }
   0x6   :  { %158 = vmatpush.bf16.msra.mxu0 %v287_v2  ;;  %v290_v13 = vld [vmem:[%s398_s1 + $0x48] sm:$0xff]  ;;  %v289_v15 = vld [vmem:[%s398_s1 + $0x40] sm:$0xff] }
   0x7   :  { %172 = vmatpush.bf16.msra.mxu1 %v295_v3  ;;  %v209_v16 = vld [vmem:[%s399_s0] sm:$0xf]  ;;  %v280_v17 = vld [vmem:[%s399_s0 + $0x4] sm:$0xf0]  ;;  %v279_v18 = vld [vmem:[%s399_s0 + $0x4] sm:$0xf] }
   0x8   :  { %v211_v19 = vld [vmem:[%s399_s0 + $0x8] sm:$0xf0]  ;;  %v210_v20 = vor.u32 %v280_v17, %v209_v16  ;;  %v302_v25 = vld [vmem:[%s400_s2] ss:$0 sm:$0xff] }
   0x9   :  { %v214_v21 = vor.u32 %v279_v18, %v211_v19  ;;  %v303_v27 = vld [vmem:[%s401_s3] ss:$0 sm:$0xff] }
   0xa   :  { %159 = vmatpush.bf16.msra.mxu0 %v286_v4 }
   0xb   :  { %173 = vmatpush.bf16.msra.mxu1 %v294_v5 }
   0xe   :  { %160 = vmatpush.bf16.msra.mxu0 %v285_v6 }
   0xf   :  { %174 = vmatpush.bf16.msra.mxu1 %v293_v7 }
  0x12   :  { %161 = vmatpush.bf16.msra.mxu0 %v284_v8 }
  0x13   :  { %175 = vmatpush.bf16.msra.mxu1 %v292_v9 }
  0x16   :  { %162 = vmatpush.bf16.msra.mxu0 %v283_v10 }
  0x17   :  { %176 = vmatpush.bf16.msra.mxu1 %v291_v11 }
  0x1a   :  { %163 = vmatpush.bf16.msra.mxu0 %v282_v12 }
  0x1b   :  { %177 = vmatpush.bf16.msra.mxu1 %v290_v13 }
  0x1e   :  { %164 = vmatpush.bf16.msra.mxu0 %v281_v14 }
  0x1f   :  { %178 = vmatpush.bf16.msra.mxu1 %v289_v15 }
  0x21   :  { %165 = vmatmul.bf16.vlgmr.msra.gmra.mxu0 %v210_v20 }
  0x22   :  { %179 = vmatmul.bf16.vlgmr.msra.gmra.mxu1 %v214_v21 }
  0x9e   :  { %v166_v22 = vpop.f32.mrf.mxu0 }
  0x9f   :  { %v180_v23 = vpop.f32.mrf.mxu1 }
  0xa0   :  { %v181_v24 = vadd.f32 %v180_v23, %v166_v22 }
  0xa2   :  { %v189_v26 = vmul.f32 %v302_v25, %v181_v24 }
  0xa4   :  { %v195_v31 = vadd.f32 %v303_v27, %v189_v26 }
  0xa6   :  { %v168_v28 = vpop.f32.mrf.mxu0  ;;  %v197_v34 = vmax.f32 %v195_v31, 0.0 }
  0xa7   :  { %v182_v29 = vpop.f32.mrf.mxu1 }
  0xa8   :  { %v183_v30 = vadd.f32 %v182_v29, %v168_v28 }
  0xaa   :  { %v190_v32 = vmul.f32 %v302_v25, %v183_v30 }
  0xac   :  { %v196_v33 = vadd.f32 %v303_v27, %v190_v32 }
  0xae   :  { %v198_v35 = vmax.f32 %v196_v33, 0.0 }
  0xb0   :  { %v300_v36 = vpack.c.bf16 %v198_v35, %v197_v34 }
  0xb2   :  { %301 = vst [vmem:[%s402_s4] sm:$0xff] %v300_v36  }

// kernel: _lambda_.32
= control target key start
LH: loop header
LB: loop body
LE: loop exit
PB: predicated region body
PF: predicated region fallthrough
CT: control target
= control target key end

     0   :  { %s259_s1 = inlined_call_operand.vmem [shape: bf16[128,128], index: 1, kind: input, shape index: {}]   ;;  %s260_s2 = inlined_call_operand.vmem [shape: f32[1,128], index: 2, kind: input, shape index: {}]   ;;  %s261_s3 = inlined_call_operand.vmem [shape: f32[1,128], index: 3, kind: input, shape index: {}]   ;;  %s262_s0 = inlined_call_operand.vmem [shape: bf16[16,128], index: 0, kind: input, shape index: {}]   ;;  %s263_s4 = inlined_call_operand.vmem [shape: bf16[16,128], index: 4, kind: input, shape index: {}]   ;;  %s264_s5 = inlined_call_operand.vmem [shape: bf16[16,128], index: 5, kind: output, shape index: {}]  }
   0x1   :  { %v178_v0 = vld [vmem:[%s259_s1 + $0x38] sm:$0xff]  ;;  %v177_v1 = vld [vmem:[%s259_s1 + $0x30] sm:$0xff]  ;;  %v176_v2 = vld [vmem:[%s259_s1 + $0x28] sm:$0xff] }
   0x2   :  { %92 = vmatpush.bf16.msra.mxu0 %v178_v0  ;;  %v175_v3 = vld [vmem:[%s259_s1 + $0x20] sm:$0xff]  ;;  %v174_v4 = vld [vmem:[%s259_s1 + $0x18] sm:$0xff]  ;;  %v173_v5 = vld [vmem:[%s259_s1 + $0x10] sm:$0xff] }
   0x3   :  { %v172_v6 = vld [vmem:[%s259_s1 + $0x8] sm:$0xff]  ;;  %v171_v7 = vld [vmem:[%s259_s1] sm:$0xff] }
   0x4   :  { %v170_v8 = vld [vmem:[%s262_s0] sm:$0xff] }
   0x5   :  { %v188_v9 = vld [vmem:[%s260_s2] ss:$0 sm:$0xff] }
   0x6   :  { %93 = vmatpush.bf16.msra.mxu0 %v177_v1  ;;  %v189_v12 = vld [vmem:[%s261_s3] ss:$0 sm:$0xff] }
   0x7   :  { %v180_v13 = vld [vmem:[%s263_s4] sm:$0xff]  }
   0x8   :  { %v181_v15 = vunpack.c.l.bf16 %v180_v13  ;;  %v182_v18 = vunpack.c.h.bf16 %v180_v13 }
   0xa   :  { %94 = vmatpush.bf16.msra.mxu0 %v176_v2 }
   0xe   :  { %95 = vmatpush.bf16.msra.mxu0 %v175_v3 }
  0x12   :  { %96 = vmatpush.bf16.msra.mxu0 %v174_v4 }
  0x16   :  { %97 = vmatpush.bf16.msra.mxu0 %v173_v5 }
  0x1a   :  { %98 = vmatpush.bf16.msra.mxu0 %v172_v6 }
  0x1e   :  { %99 = vmatpush.bf16.msra.mxu0 %v171_v7 }
  0x21   :  { %100 = vmatmul.bf16.vlgmr.msra.gmra.mxu0 %v170_v8 }
  0x9e   :  { %v101_v10 = vpop.f32.mrf.mxu0 }
  0x9f   :  { %v110_v11 = vmul.f32 %v188_v9, %v101_v10 }
  0xa1   :  { %v116_v14 = vadd.f32 %v189_v12, %v110_v11 }
  0xa3   :  { %v122_v19 = vadd.f32 %v181_v15, %v116_v14 }
  0xa5   :  { %v124_v22 = vmax.f32 %v122_v19, 0.0 }
  0xa6   :  { %v103_v16 = vpop.f32.mrf.mxu0 }
  0xa7   :  { %v111_v17 = vmul.f32 %v188_v9, %v103_v16 }
  0xa9   :  { %v117_v20 = vadd.f32 %v189_v12, %v111_v17 }
  0xab   :  { %v123_v21 = vadd.f32 %v182_v18, %v117_v20 }
  0xad   :  { %v125_v23 = vmax.f32 %v123_v21, 0.0 }
  0xaf   :  { %v186_v24 = vpack.c.bf16 %v125_v23, %v124_v22 }
  0xb1   :  { %187 = vst [vmem:[%s264_s5] sm:$0xff] %v186_v24  }

// kernel: _lambda_.31
= control target key start
LH: loop header
LB: loop body
LE: loop exit
PB: predicated region body
PF: predicated region fallthrough
CT: control target
= control target key end

     0   :  { %s236_s1 = inlined_call_operand.vmem [shape: bf16[128,128], index: 1, kind: input, shape index: {}]   ;;  %s237_s2 = inlined_call_operand.vmem [shape: f32[1,128], index: 2, kind: input, shape index: {}]   ;;  %s238_s3 = inlined_call_operand.vmem [shape: f32[1,128], index: 3, kind: input, shape index: {}]   ;;  %s239_s0 = inlined_call_operand.vmem [shape: bf16[16,128], index: 0, kind: input, shape index: {}]   ;;  %s240_s4 = inlined_call_operand.vmem [shape: bf16[16,128], index: 4, kind: output, shape index: {}]  }
   0x1   :  { %v167_v0 = vld [vmem:[%s236_s1 + $0x38] sm:$0xff]  ;;  %v166_v1 = vld [vmem:[%s236_s1 + $0x30] sm:$0xff]  ;;  %v165_v2 = vld [vmem:[%s236_s1 + $0x28] sm:$0xff] }
   0x2   :  { %89 = vmatpush.bf16.msra.mxu0 %v167_v0  ;;  %v164_v3 = vld [vmem:[%s236_s1 + $0x20] sm:$0xff]  ;;  %v163_v4 = vld [vmem:[%s236_s1 + $0x18] sm:$0xff]  ;;  %v162_v5 = vld [vmem:[%s236_s1 + $0x10] sm:$0xff] }
   0x3   :  { %v161_v6 = vld [vmem:[%s236_s1 + $0x8] sm:$0xff]  ;;  %v160_v7 = vld [vmem:[%s236_s1] sm:$0xff] }
   0x4   :  { %v159_v8 = vld [vmem:[%s239_s0] sm:$0xff] }
   0x5   :  { %v173_v10 = vld [vmem:[%s237_s2] ss:$0 sm:$0xff] }
   0x6   :  { %90 = vmatpush.bf16.msra.mxu0 %v166_v1  ;;  %v174_v12 = vld [vmem:[%s238_s3] ss:$0 sm:$0xff] }
   0xa   :  { %91 = vmatpush.bf16.msra.mxu0 %v165_v2 }
   0xe   :  { %92 = vmatpush.bf16.msra.mxu0 %v164_v3 }
  0x12   :  { %93 = vmatpush.bf16.msra.mxu0 %v163_v4 }
  0x16   :  { %94 = vmatpush.bf16.msra.mxu0 %v162_v5 }
  0x1a   :  { %95 = vmatpush.bf16.msra.mxu0 %v161_v6 }
  0x1e   :  { %96 = vmatpush.bf16.msra.mxu0 %v160_v7 }
  0x21   :  { %97 = vmatmul.bf16.vlgmr.msra.gmra.mxu0 %v159_v8 }
  0x9e   :  { %v98_v9 = vpop.f32.mrf.mxu0 }
  0x9f   :  { %v107_v11 = vmul.f32 %v173_v10, %v98_v9 }
  0xa1   :  { %v113_v15 = vadd.f32 %v174_v12, %v107_v11 }
  0xa6   :  { %v100_v13 = vpop.f32.mrf.mxu0 }
  0xa7   :  { %v108_v14 = vmul.f32 %v173_v10, %v100_v13 }
  0xa9   :  { %v114_v16 = vadd.f32 %v174_v12, %v108_v14 }
  0xab   :  { %v171_v17 = vpack.c.bf16 %v114_v16, %v113_v15 }
  0xad   :  { %172 = vst [vmem:[%s240_s4] sm:$0xff] %v171_v17  }

// kernel: _lambda_.35
= control target key start
LH: loop header
LB: loop body
LE: loop exit
PB: predicated region body
PF: predicated region fallthrough
CT: control target
= control target key end

     0   :  { %s559_s1 = inlined_call_operand.vmem [shape: bf16[384,128], index: 1, kind: input, shape index: {}]   ;;  %s560_s0 = inlined_call_operand.vmem [shape: bf16[16,384], index: 0, kind: input, shape index: {}]   ;;  %s561_s2 = inlined_call_operand.vmem [shape: f32[1,128], index: 2, kind: input, shape index: {}]   ;;  %s562_s3 = inlined_call_operand.vmem [shape: f32[1,128], index: 3, kind: input, shape index: {}]   ;;  %s563_s4 = inlined_call_operand.vmem [shape: bf16[16,128], index: 4, kind: output, shape index: {}]  }
   0x1   :  { %v411_v0 = vld [vmem:[%s559_s1 + $0x38] sm:$0xff]  ;;  %v410_v3 = vld [vmem:[%s559_s1 + $0x30] sm:$0xff]  ;;  %v409_v6 = vld [vmem:[%s559_s1 + $0x28] sm:$0xff] }
   0x2   :  { %v419_v1 = vld [vmem:[%s559_s1 + $0x78] sm:$0xff]  ;;  %229 = vmatpush.bf16.msra.mxu0 %v411_v0  ;;  %v418_v4 = vld [vmem:[%s559_s1 + $0x70] sm:$0xff]  ;;  %v417_v7 = vld [vmem:[%s559_s1 + $0x68] sm:$0xff] }
   0x3   :  { %v427_v2 = vld [vmem:[%s559_s1 + $0xb8] sm:$0xff]  ;;  %243 = vmatpush.bf16.msra.mxu1 %v419_v1  ;;  %v426_v5 = vld [vmem:[%s559_s1 + $0xb0] sm:$0xff]  ;;  %v425_v8 = vld [vmem:[%s559_s1 + $0xa8] sm:$0xff] }
   0x4   :  { %257 = vmatpush.bf16.msra.mxu2 %v427_v2  ;;  %v408_v9 = vld [vmem:[%s559_s1 + $0x20] sm:$0xff]  ;;  %v407_v12 = vld [vmem:[%s559_s1 + $0x18] sm:$0xff]  ;;  %v406_v15 = vld [vmem:[%s559_s1 + $0x10] sm:$0xff] }
   0x5   :  { %v416_v10 = vld [vmem:[%s559_s1 + $0x60] sm:$0xff]  ;;  %v415_v13 = vld [vmem:[%s559_s1 + $0x58] sm:$0xff]  ;;  %v414_v16 = vld [vmem:[%s559_s1 + $0x50] sm:$0xff] }
   0x6   :  { %230 = vmatpush.bf16.msra.mxu0 %v410_v3  ;;  %v424_v11 = vld [vmem:[%s559_s1 + $0xa0] sm:$0xff]  ;;  %v423_v14 = vld [vmem:[%s559_s1 + $0x98] sm:$0xff]  ;;  %v422_v17 = vld [vmem:[%s559_s1 + $0x90] sm:$0xff] }
   0x7   :  { %244 = vmatpush.bf16.msra.mxu1 %v418_v4  ;;  %v405_v18 = vld [vmem:[%s559_s1 + $0x8] sm:$0xff]  ;;  %v404_v21 = vld [vmem:[%s559_s1] sm:$0xff]  ;;  %v297_v26 = vld [vmem:[%s560_s0 + $0xc] sm:$0xf0] }
   0x8   :  { %258 = vmatpush.bf16.msra.mxu2 %v426_v5  ;;  %v413_v19 = vld [vmem:[%s559_s1 + $0x48] sm:$0xff]  ;;  %v412_v22 = vld [vmem:[%s559_s1 + $0x40] sm:$0xff]  ;;  %v403_v29 = vld [vmem:[%s560_s0 + $0x10] sm:$0xf0] }
   0x9   :  { %v421_v20 = vld [vmem:[%s559_s1 + $0x88] sm:$0xff]  ;;  %v295_v23 = vld [vmem:[%s560_s0] sm:$0xf]  ;;  %v401_v25 = vld [vmem:[%s560_s0 + $0x4] sm:$0xf] }
   0xa   :  { %231 = vmatpush.bf16.msra.mxu0 %v409_v6  ;;  %v402_v24 = vld [vmem:[%s560_s0 + $0x8] sm:$0xf0]  ;;  %v420_v27 = vld [vmem:[%s559_s1 + $0x80] sm:$0xff]  ;;  %v303_v28 = vld [vmem:[%s560_s0 + $0x8] sm:$0xf]  ;;  %v300_v31 = vor.u32 %v401_v25, %v297_v26 }
   0xb   :  { %245 = vmatpush.bf16.msra.mxu1 %v417_v7  ;;  %v296_v30 = vor.u32 %v402_v24, %v295_v23  ;;  %v304_v32 = vor.u32 %v403_v29, %v303_v28  ;;  %v433_v38 = vld [vmem:[%s561_s2] ss:$0 sm:$0xff] }
   0xc   :  { %259 = vmatpush.bf16.msra.mxu2 %v425_v8  ;;  %v434_v42 = vld [vmem:[%s562_s3] ss:$0 sm:$0xff] }
   0xe   :  { %232 = vmatpush.bf16.msra.mxu0 %v408_v9 }
   0xf   :  { %246 = vmatpush.bf16.msra.mxu1 %v416_v10 }
  0x10   :  { %260 = vmatpush.bf16.msra.mxu2 %v424_v11 }
  0x12   :  { %233 = vmatpush.bf16.msra.mxu0 %v407_v12 }
  0x13   :  { %247 = vmatpush.bf16.msra.mxu1 %v415_v13 }
  0x14   :  { %261 = vmatpush.bf16.msra.mxu2 %v423_v14 }
  0x16   :  { %234 = vmatpush.bf16.msra.mxu0 %v406_v15 }
  0x17   :  { %248 = vmatpush.bf16.msra.mxu1 %v414_v16 }
  0x18   :  { %262 = vmatpush.bf16.msra.mxu2 %v422_v17 }
  0x1a   :  { %235 = vmatpush.bf16.msra.mxu0 %v405_v18 }
  0x1b   :  { %249 = vmatpush.bf16.msra.mxu1 %v413_v19 }
  0x1c   :  { %263 = vmatpush.bf16.msra.mxu2 %v421_v20 }
  0x1e   :  { %236 = vmatpush.bf16.msra.mxu0 %v404_v21 }
  0x1f   :  { %250 = vmatpush.bf16.msra.mxu1 %v412_v22 }
  0x20   :  { %264 = vmatpush.bf16.msra.mxu2 %v420_v27 }
  0x21   :  { %237 = vmatmul.bf16.vlgmr.msra.gmra.mxu0 %v296_v30 }
  0x22   :  { %251 = vmatmul.bf16.vlgmr.msra.gmra.mxu1 %v300_v31 }
  0x23   :  { %265 = vmatmul.bf16.vlgmr.msra.gmra.mxu2 %v304_v32 }
  0x9e   :  { %v238_v33 = vpop.f32.mrf.mxu0 }
  0x9f   :  { %v252_v34 = vpop.f32.mrf.mxu1 }
  0xa0   :  { %v253_v35 = vadd.f32 %v252_v34, %v238_v33 }
  0xa6   :  { %v266_v36 = vpop.f32.mrf.mxu2  ;;  %v240_v39 = vpop.f32.mrf.mxu0 }
  0xa7   :  { %v267_v37 = vadd.f32 %v266_v36, %v253_v35  ;;  %v254_v40 = vpop.f32.mrf.mxu1 }
  0xa8   :  { %v255_v43 = vadd.f32 %v254_v40, %v240_v39 }
  0xa9   :  { %v275_v41 = vmul.f32 %v433_v38, %v267_v37 }
  0xab   :  { %v281_v46 = vadd.f32 %v434_v42, %v275_v41 }
  0xad   :  { %v283_v49 = vmax.f32 %v281_v46, 0.0 }
  0xae   :  { %v268_v44 = vpop.f32.mrf.mxu2 }
  0xaf   :  { %v269_v45 = vadd.f32 %v268_v44, %v255_v43 }
  0xb1   :  { %v276_v47 = vmul.f32 %v433_v38, %v269_v45 }
  0xb3   :  { %v282_v48 = vadd.f32 %v434_v42, %v276_v47 }
  0xb5   :  { %v284_v50 = vmax.f32 %v282_v48, 0.0 }
  0xb7   :  { %v431_v51 = vpack.c.bf16 %v284_v50, %v283_v49 }
  0xb9   :  { %432 = vst [vmem:[%s563_s4] sm:$0xff] %v431_v51  }

// kernel: _lambda_.37
= control target key start
LH: loop header
LB: loop body
LE: loop exit
PB: predicated region body
PF: predicated region fallthrough
CT: control target
= control target key end

     0   :  { %s419_s1 = inlined_call_operand.vmem [shape: bf16[256,128], index: 1, kind: input, shape index: {}]   ;;  %s420_s0 = inlined_call_operand.vmem [shape: bf16[16,256], index: 0, kind: input, shape index: {}]   ;;  %s421_s2 = inlined_call_operand.vmem [shape: f32[1,128], index: 2, kind: input, shape index: {}]   ;;  %s422_s3 = inlined_call_operand.vmem [shape: f32[1,128], index: 3, kind: input, shape index: {}]   ;;  %s423_s4 = inlined_call_operand.vmem [shape: bf16[16,128], index: 4, kind: input, shape index: {}]   ;;  %s424_s5 = inlined_call_operand.vmem [shape: bf16[16,128], index: 5, kind: output, shape index: {}]  }
   0x1   :  { %v297_v0 = vld [vmem:[%s419_s1 + $0x38] sm:$0xff]  ;;  %v296_v2 = vld [vmem:[%s419_s1 + $0x30] sm:$0xff]  ;;  %v295_v4 = vld [vmem:[%s419_s1 + $0x28] sm:$0xff] }
   0x2   :  { %v305_v1 = vld [vmem:[%s419_s1 + $0x78] sm:$0xff]  ;;  %160 = vmatpush.bf16.msra.mxu0 %v297_v0  ;;  %v304_v3 = vld [vmem:[%s419_s1 + $0x70] sm:$0xff]  ;;  %v303_v5 = vld [vmem:[%s419_s1 + $0x68] sm:$0xff] }
   0x3   :  { %174 = vmatpush.bf16.msra.mxu1 %v305_v1  ;;  %v294_v6 = vld [vmem:[%s419_s1 + $0x20] sm:$0xff]  ;;  %v293_v8 = vld [vmem:[%s419_s1 + $0x18] sm:$0xff]  ;;  %v292_v10 = vld [vmem:[%s419_s1 + $0x10] sm:$0xff] }
   0x4   :  { %v302_v7 = vld [vmem:[%s419_s1 + $0x60] sm:$0xff]  ;;  %v301_v9 = vld [vmem:[%s419_s1 + $0x58] sm:$0xff]  ;;  %v300_v11 = vld [vmem:[%s419_s1 + $0x50] sm:$0xff] }
   0x5   :  { %v291_v12 = vld [vmem:[%s419_s1 + $0x8] sm:$0xff]  ;;  %v290_v14 = vld [vmem:[%s419_s1] sm:$0xff] }
   0x6   :  { %161 = vmatpush.bf16.msra.mxu0 %v296_v2  ;;  %v299_v13 = vld [vmem:[%s419_s1 + $0x48] sm:$0xff]  ;;  %v298_v15 = vld [vmem:[%s419_s1 + $0x40] sm:$0xff] }
   0x7   :  { %175 = vmatpush.bf16.msra.mxu1 %v304_v3  ;;  %v218_v16 = vld [vmem:[%s420_s0] sm:$0xf]  ;;  %v289_v17 = vld [vmem:[%s420_s0 + $0x4] sm:$0xf0]  ;;  %v288_v18 = vld [vmem:[%s420_s0 + $0x4] sm:$0xf] }
   0x8   :  { %v220_v19 = vld [vmem:[%s420_s0 + $0x8] sm:$0xf0]  ;;  %v219_v20 = vor.u32 %v289_v17, %v218_v16  ;;  %v315_v25 = vld [vmem:[%s421_s2] ss:$0 sm:$0xff] }
   0x9   :  { %v223_v21 = vor.u32 %v288_v18, %v220_v19  ;;  %v316_v27 = vld [vmem:[%s422_s3] ss:$0 sm:$0xff] }
   0xa   :  { %162 = vmatpush.bf16.msra.mxu0 %v295_v4  ;;  %v307_v28 = vld [vmem:[%s423_s4] sm:$0xff]  }
   0xb   :  { %176 = vmatpush.bf16.msra.mxu1 %v303_v5  ;;  %v308_v32 = vunpack.c.l.bf16 %v307_v28  ;;  %v309_v35 = vunpack.c.h.bf16 %v307_v28 }
   0xe   :  { %163 = vmatpush.bf16.msra.mxu0 %v294_v6 }
   0xf   :  { %177 = vmatpush.bf16.msra.mxu1 %v302_v7 }
  0x12   :  { %164 = vmatpush.bf16.msra.mxu0 %v293_v8 }
  0x13   :  { %178 = vmatpush.bf16.msra.mxu1 %v301_v9 }
  0x16   :  { %165 = vmatpush.bf16.msra.mxu0 %v292_v10 }
  0x17   :  { %179 = vmatpush.bf16.msra.mxu1 %v300_v11 }
  0x1a   :  { %166 = vmatpush.bf16.msra.mxu0 %v291_v12 }
  0x1b   :  { %180 = vmatpush.bf16.msra.mxu1 %v299_v13 }
  0x1e   :  { %167 = vmatpush.bf16.msra.mxu0 %v290_v14 }
  0x1f   :  { %181 = vmatpush.bf16.msra.mxu1 %v298_v15 }
  0x21   :  { %168 = vmatmul.bf16.vlgmr.msra.gmra.mxu0 %v219_v20 }
  0x22   :  { %182 = vmatmul.bf16.vlgmr.msra.gmra.mxu1 %v223_v21 }
  0x9e   :  { %v169_v22 = vpop.f32.mrf.mxu0 }
  0x9f   :  { %v183_v23 = vpop.f32.mrf.mxu1 }
  0xa0   :  { %v184_v24 = vadd.f32 %v183_v23, %v169_v22 }
  0xa2   :  { %v192_v26 = vmul.f32 %v315_v25, %v184_v24 }
  0xa4   :  { %v198_v31 = vadd.f32 %v316_v27, %v192_v26 }
  0xa6   :  { %v171_v29 = vpop.f32.mrf.mxu0  ;;  %v204_v36 = vadd.f32 %v308_v32, %v198_v31 }
  0xa7   :  { %v185_v30 = vpop.f32.mrf.mxu1 }
  0xa8   :  { %v186_v33 = vadd.f32 %v185_v30, %v171_v29  ;;  %v206_v39 = vmax.f32 %v204_v36, 0.0 }
  0xaa   :  { %v193_v34 = vmul.f32 %v315_v25, %v186_v33 }
  0xac   :  { %v199_v37 = vadd.f32 %v316_v27, %v193_v34 }
  0xae   :  { %v205_v38 = vadd.f32 %v309_v35, %v199_v37 }
  0xb0   :  { %v207_v40 = vmax.f32 %v205_v38, 0.0 }
  0xb2   :  { %v313_v41 = vpack.c.bf16 %v207_v40, %v206_v39 }
  0xb4   :  { %314 = vst [vmem:[%s424_s5] sm:$0xff] %v313_v41  }

// kernel: _lambda_.43
= control target key start
LH: loop header
LB: loop body
LE: loop exit
PB: predicated region body
PF: predicated region fallthrough
CT: control target
= control target key end

     0   :  { %vm13_vm0 = vcmask 517120   ;;  %vm20_vm1 = vcmask 523264   ;;  %v96_v1 = vmov 0.0   ;;  %s117_s0 = inlined_call_operand.vmem [shape: bf16[2,8,64], index: 0, kind: input, shape index: {}]   ;;  %s118_s1 = inlined_call_operand.hbm [shape: f32[2,64], index: 1, kind: output, shape index: {}]  }
   0x1   :  { %v65_v0 = vld [vmem:[%s117_s0] sm:$0xff]   ;;  %14 = vst.msk [vmem:[#allocation2] sm:$0x3] %vm13_vm0, %v96_v1 }
   0x2   :  { %v66_v2 = vunpack.c.l.bf16 %v65_v0  ;;  %v67_v3 = vunpack.c.h.bf16 %v65_v0 }
   0x3   :  { %6 = vsyncpa [#allocation3], 0  ;;  %vm37_vm2 = vcmask 1041409   ;;  %s97_s0 = smov [#allocation2]   ;;  %s55_s11 = sshll.u32 %s118_s1, 4  ;;  %s56_s11 = int_to_ptr.hbm [resolvable:$true] %s55_s11 }
   0x4   :  { %v21_v4 = vsel %vm20_vm1, %v66_v2, 0.0  ;;  %v28_v5 = vsel %vm20_vm1, %v67_v3, 0.0  ;;  %s53_s8 = sshll.u32 %s97_s0, 4  ;;  %s54_s8 = int_to_ptr.vmem [resolvable:$true] %s53_s8 }
   0x5   :  { %v22_v6 = vrot.slane %v21_v4, 4  ;;  %v29_v7 = vrot.slane %v28_v5, 4 }
   0x7   :  { %v23_v8 = vadd.f32 %v22_v6, %v21_v4  ;;  %v30_v9 = vadd.f32 %v29_v7, %v28_v5 }
   0x8   :  { %v15_v16 = vld [vmem:[#allocation2] sm:$0x3] }
   0x9   :  { %v24_v10 = vrot.slane %v23_v8, 2  ;;  %v31_v11 = vrot.slane %v30_v9, 2 }
   0xb   :  { %v25_v12 = vadd.f32 %v24_v10, %v23_v8  ;;  %v32_v13 = vadd.f32 %v31_v11, %v30_v9 }
   0xd   :  { %v26_v14 = vrot.slane %v25_v12, 1  ;;  %v33_v15 = vrot.slane %v32_v13, 1 }
   0xf   :  { %v27_v17 = vadd.f32 %v26_v14, %v25_v12  ;;  %v34_v18 = vadd.f32 %v33_v15, %v32_v13 }
  0x11   :  { %v38_v19 = vsel %vm37_vm2, %v34_v18, %v27_v17 }
  0x12   :  { %v40_v20 = vadd.f32 %v38_v19, %v15_v16 }
  0x14   :  { %42 = vst.msk [vmem:[#allocation2] sm:$0x3] %vm13_vm0, %v40_v20 }
  0x1b   :  { %v46_v21 = vld [vmem:[#allocation2] sm:$0x3] }
  0x1c   :  { %47 = vst.msk [vmem:[#allocation2] sm:$0x3] %vm13_vm0, %v46_v21 }
  0x1d   :  { %58 = dma.vmem_to_hbm [thread:$0]  %s54_s8, 32, %s56_s11, [#allocation3]  }
  0x1e   :  { %94 = dma.done.wait [#allocation3], 32  }
  0x1f   :  { %95 = vsyncadd [#allocation3], 4294967264 }
  0x20   :  { %63 = vsyncpa [#allocation3], 1 }

// kernel: _lambda_.40
= control target key start
LH: loop header
LB: loop body
LE: loop exit
PB: predicated region body
PF: predicated region fallthrough
CT: control target
= control target key end

     0   :  { %s1567_s15 = smov 0   ;;  %s1569_s16 = smov 0   ;;  %s1891_s0 = inlined_call_operand.vmem [shape: bf16[16,640], index: 0, kind: input, shape index: {}]   ;;  %s1892_s1 = inlined_call_operand.vmem [shape: bf16[640,256], index: 1, kind: input, shape index: {}]   ;;  %s1893_s2 = inlined_call_operand.vmem [shape: f32[1,256], index: 2, kind: input, shape index: {}]   ;;  %s1894_s3 = inlined_call_operand.vmem [shape: f32[1,256], index: 3, kind: input, shape index: {}]   ;;  %s1895_s4 = inlined_call_operand.vmem [shape: bf16[16,256], index: 4, kind: output, shape index: {}]  }
   0x1   :  { %s1571_s17 = smov 0   ;;  %s1573_s18 = smov 0  }
   0x2   :  { %s1575_s19 = smov 0  }
   0x3 LB: > { %s23_s20 = sadd.s32 1, %s1536_s18  ;;  %s1216_s21 = sadd.s32 4294967295, %s1540_s19   ;;  %s1540_s19 = sphi %s1575_s19, %s14_s19   ;;  %s1536_s18 = sphi %s1573_s18, %s1900_s18   ;;  %s1532_s17 = sphi %s1571_s17, %s1899_s17   ;;  %s1528_s16 = sphi %s1569_s16, %s1898_s16   ;;  %s1524_s15 = sphi %s1567_s15, %s1897_s15  }
   0x4   : > { %p24_p0 = scmp.ge.s32.totalorder %s23_s20, 2  ;;  %p66_p1 = scmp.ne.s32.totalorder %s1528_s16, %s1524_s15 }
   0x5   : > { %p67_p2 = scmp.eq.s32.totalorder %s1540_s19, 0  ;;  %p150_p4 = scmp.eq.s32.totalorder %s1216_s21, 1 }
   0x6   : > { %s1902_s20 = smov (%p24_p0, %s23_s20), 0  ;;  %s59_s23 = sadd.s32 1, %s1528_s16 }
   0x7   : > { %p68_p3 = por %p67_p2, %p66_p1  ;;  %s56_s22 = ssub.s32 %s1536_s18, %s1902_s20 }
   0x8   : > { %p57_p5 = scmp.eq.s32.totalorder %s56_s22, 0  ;;  %p1602_p6 = por %p150_p4, %p66_p1 }
   0x9   : > { %p1220_p7 = scmp.ge.s32.totalorder %s1540_s19, 2 }
   0xa   : > { %s1607_s25 = scalar_select %p57_p5, %s1528_s16, %s59_s23  }
   0xb   : > { %182 = sbr.rel (%p1220_p7) target bundleno = 101 (0x65), region = 20 }
  0x10   : > { %185 = sbr.rel (!%p68_p3) target bundleno = 101 (0x65), region = 24  ;;  %s187_s26 = sand.u32 (%p68_p3), 1, %s1528_s16  }
  0x11   : > { %s1221_s27 = sshll.u32 (%p68_p3), %s1536_s18, 2  ;;  %s1458_s28 = smul.u32 (%p68_p3), 320, %s187_s26 }
  0x12   : > { %s1615_s5 = scalar_lea.vmem (%p68_p3), %s1892_s1, %s1221_s27 }
  0x13   : > { %v208_v0 = vld [vmem:[%s1615_s5] sm:$0xf] (%p68_p3)  ;;  %v210_v1 = vld [vmem:[%s1615_s5 + $0x8] sm:$0xf] (%p68_p3)  ;;  %v212_v2 = vld [vmem:[%s1615_s5 + $0x10] sm:$0xf] (%p68_p3) }
  0x14   : > { %s1620_s6 = scalar_lea.vmem (%p68_p3), [#allocation2], %s1458_s28  ;;  %v214_v3 = vld [vmem:[%s1615_s5 + $0x18] sm:$0xf] (%p68_p3)  ;;  %v216_v4 = vld [vmem:[%s1615_s5 + $0x20] sm:$0xf] (%p68_p3) }
  0x15   : > { %209 = vst [vmem:[%s1620_s6] sm:$0xf] %v208_v0  ;;  %v218_v5 = vld [vmem:[%s1615_s5 + $0x28] sm:$0xf]  ;;  %v220_v6 = vld [vmem:[%s1615_s5 + $0x30] sm:$0xf] }
  0x16   : > { %211 = vst [vmem:[%s1620_s6 + $0x4] sm:$0xf] %v210_v1  ;;  %v222_v7 = vld [vmem:[%s1615_s5 + $0x38] sm:$0xf]  ;;  %v224_v8 = vld [vmem:[%s1615_s5 + $0x40] sm:$0xf] }
  0x17   : > { %213 = vst [vmem:[%s1620_s6 + $0x8] sm:$0xf] %v212_v2  ;;  %v226_v9 = vld [vmem:[%s1615_s5 + $0x48] sm:$0xf]  ;;  %v228_v10 = vld [vmem:[%s1615_s5 + $0x50] sm:$0xf] }
  0x18   : > { %215 = vst [vmem:[%s1620_s6 + $0xc] sm:$0xf] %v214_v3  ;;  %v230_v11 = vld [vmem:[%s1615_s5 + $0x58] sm:$0xf]  ;;  %v232_v12 = vld [vmem:[%s1615_s5 + $0x60] sm:$0xf] }
  0x19   : > { %217 = vst [vmem:[%s1620_s6 + $0x10] sm:$0xf] %v216_v4  ;;  %v234_v13 = vld [vmem:[%s1615_s5 + $0x68] sm:$0xf]  ;;  %v236_v14 = vld [vmem:[%s1615_s5 + $0x70] sm:$0xf] }
  0x1a   : > { %219 = vst [vmem:[%s1620_s6 + $0x14] sm:$0xf] %v218_v5  ;;  %v238_v15 = vld [vmem:[%s1615_s5 + $0x78] sm:$0xf]  ;;  %v240_v16 = vld [vmem:[%s1615_s5 + $0x80] sm:$0xf] }
  0x1b   : > { %221 = vst [vmem:[%s1620_s6 + $0x18] sm:$0xf] %v220_v6  ;;  %v242_v17 = vld [vmem:[%s1615_s5 + $0x88] sm:$0xf]  ;;  %v244_v18 = vld [vmem:[%s1615_s5 + $0x90] sm:$0xf] }
  0x1c   : > { %223 = vst [vmem:[%s1620_s6 + $0x1c] sm:$0xf] %v222_v7  ;;  %v246_v19 = vld [vmem:[%s1615_s5 + $0x98] sm:$0xf]  ;;  %v248_v20 = vld [vmem:[%s1615_s5 + $0xa0] sm:$0xf] }
  0x1d   : > { %225 = vst [vmem:[%s1620_s6 + $0x20] sm:$0xf] %v224_v8  ;;  %v250_v21 = vld [vmem:[%s1615_s5 + $0xa8] sm:$0xf]  ;;  %v252_v22 = vld [vmem:[%s1615_s5 + $0xb0] sm:$0xf] }
  0x1e   : > { %227 = vst [vmem:[%s1620_s6 + $0x24] sm:$0xf] %v226_v9  ;;  %v254_v23 = vld [vmem:[%s1615_s5 + $0xb8] sm:$0xf]  ;;  %v256_v24 = vld [vmem:[%s1615_s5 + $0xc0] sm:$0xf] }
  0x1f   : > { %229 = vst [vmem:[%s1620_s6 + $0x28] sm:$0xf] %v228_v10  ;;  %v258_v25 = vld [vmem:[%s1615_s5 + $0xc8] sm:$0xf]  ;;  %v260_v26 = vld [vmem:[%s1615_s5 + $0xd0] sm:$0xf] }
  0x20   : > { %231 = vst [vmem:[%s1620_s6 + $0x2c] sm:$0xf] %v230_v11  ;;  %v262_v27 = vld [vmem:[%s1615_s5 + $0xd8] sm:$0xf]  ;;  %v264_v28 = vld [vmem:[%s1615_s5 + $0xe0] sm:$0xf] }
  0x21   : > { %233 = vst [vmem:[%s1620_s6 + $0x30] sm:$0xf] %v232_v12  ;;  %v266_v29 = vld [vmem:[%s1615_s5 + $0xe8] sm:$0xf]  ;;  %v268_v30 = vld [vmem:[%s1615_s5 + $0xf0] sm:$0xf] }
  0x22   : > { %235 = vst [vmem:[%s1620_s6 + $0x34] sm:$0xf] %v234_v13  ;;  %v270_v31 = vld [vmem:[%s1615_s5 + $0xf8] sm:$0xf]  ;;  %v272_v32 = vld [vmem:[%s1615_s5 + $0x100] sm:$0xf] }
  0x23   : > { %237 = vst [vmem:[%s1620_s6 + $0x38] sm:$0xf] %v236_v14  ;;  %v274_v33 = vld [vmem:[%s1615_s5 + $0x108] sm:$0xf]  ;;  %v276_v34 = vld [vmem:[%s1615_s5 + $0x110] sm:$0xf] }
  0x24   : > { %239 = vst [vmem:[%s1620_s6 + $0x3c] sm:$0xf] %v238_v15  ;;  %v278_v35 = vld [vmem:[%s1615_s5 + $0x118] sm:$0xf]  ;;  %v280_v36 = vld [vmem:[%s1615_s5 + $0x120] sm:$0xf] }
  0x25   : > { %241 = vst [vmem:[%s1620_s6 + $0x40] sm:$0xf] %v240_v16  ;;  %v282_v37 = vld [vmem:[%s1615_s5 + $0x128] sm:$0xf]  ;;  %v284_v38 = vld [vmem:[%s1615_s5 + $0x130] sm:$0xf] }
  0x26   : > { %243 = vst [vmem:[%s1620_s6 + $0x44] sm:$0xf] %v242_v17  ;;  %v286_v39 = vld [vmem:[%s1615_s5 + $0x138] sm:$0xf]  ;;  %v288_v40 = vld [vmem:[%s1615_s5 + $0x140] sm:$0xf] }
  0x27   : > { %245 = vst [vmem:[%s1620_s6 + $0x48] sm:$0xf] %v244_v18  ;;  %v290_v41 = vld [vmem:[%s1615_s5 + $0x148] sm:$0xf]  ;;  %v292_v42 = vld [vmem:[%s1615_s5 + $0x150] sm:$0xf] }
  0x28   : > { %247 = vst [vmem:[%s1620_s6 + $0x4c] sm:$0xf] %v246_v19  ;;  %v294_v43 = vld [vmem:[%s1615_s5 + $0x158] sm:$0xf]  ;;  %v296_v44 = vld [vmem:[%s1615_s5 + $0x160] sm:$0xf] }
  0x29   : > { %249 = vst [vmem:[%s1620_s6 + $0x50] sm:$0xf] %v248_v20  ;;  %v298_v45 = vld [vmem:[%s1615_s5 + $0x168] sm:$0xf]  ;;  %v300_v46 = vld [vmem:[%s1615_s5 + $0x170] sm:$0xf] }
  0x2a   : > { %251 = vst [vmem:[%s1620_s6 + $0x54] sm:$0xf] %v250_v21  ;;  %v302_v47 = vld [vmem:[%s1615_s5 + $0x178] sm:$0xf]  ;;  %v304_v48 = vld [vmem:[%s1615_s5 + $0x180] sm:$0xf] }
  0x2b   : > { %253 = vst [vmem:[%s1620_s6 + $0x58] sm:$0xf] %v252_v22  ;;  %v306_v49 = vld [vmem:[%s1615_s5 + $0x188] sm:$0xf]  ;;  %v308_v50 = vld [vmem:[%s1615_s5 + $0x190] sm:$0xf] }
  0x2c   : > { %255 = vst [vmem:[%s1620_s6 + $0x5c] sm:$0xf] %v254_v23  ;;  %v310_v51 = vld [vmem:[%s1615_s5 + $0x198] sm:$0xf]  ;;  %v312_v52 = vld [vmem:[%s1615_s5 + $0x1a0] sm:$0xf] }
  0x2d   : > { %257 = vst [vmem:[%s1620_s6 + $0x60] sm:$0xf] %v256_v24  ;;  %v314_v53 = vld [vmem:[%s1615_s5 + $0x1a8] sm:$0xf]  ;;  %v316_v54 = vld [vmem:[%s1615_s5 + $0x1b0] sm:$0xf] }
  0x2e   : > { %259 = vst [vmem:[%s1620_s6 + $0x64] sm:$0xf] %v258_v25  ;;  %v318_v55 = vld [vmem:[%s1615_s5 + $0x1b8] sm:$0xf]  ;;  %v320_v56 = vld [vmem:[%s1615_s5 + $0x1c0] sm:$0xf] }
  0x2f   : > { %261 = vst [vmem:[%s1620_s6 + $0x68] sm:$0xf] %v260_v26  ;;  %v322_v57 = vld [vmem:[%s1615_s5 + $0x1c8] sm:$0xf]  ;;  %v324_v58 = vld [vmem:[%s1615_s5 + $0x1d0] sm:$0xf] }
  0x30   : > { %263 = vst [vmem:[%s1620_s6 + $0x6c] sm:$0xf] %v262_v27  ;;  %v326_v59 = vld [vmem:[%s1615_s5 + $0x1d8] sm:$0xf]  ;;  %v328_v60 = vld [vmem:[%s1615_s5 + $0x1e0] sm:$0xf] }
  0x31   : > { %265 = vst [vmem:[%s1620_s6 + $0x70] sm:$0xf] %v264_v28  ;;  %v330_v61 = vld [vmem:[%s1615_s5 + $0x1e8] sm:$0xf]  ;;  %v332_v62 = vld [vmem:[%s1615_s5 + $0x1f0] sm:$0xf] }
  0x32   : > { %267 = vst [vmem:[%s1620_s6 + $0x74] sm:$0xf] %v266_v29  ;;  %v334_v63 = vld [vmem:[%s1615_s5 + $0x1f8] sm:$0xf]  ;;  %v336_v0 = vld [vmem:[%s1615_s5 + $0x200] sm:$0xf] }
  0x33   : > { %269 = vst [vmem:[%s1620_s6 + $0x78] sm:$0xf] %v268_v30  ;;  %v338_v1 = vld [vmem:[%s1615_s5 + $0x208] sm:$0xf]  ;;  %v340_v2 = vld [vmem:[%s1615_s5 + $0x210] sm:$0xf] }
  0x34   : > { %271 = vst [vmem:[%s1620_s6 + $0x7c] sm:$0xf] %v270_v31  ;;  %v342_v3 = vld [vmem:[%s1615_s5 + $0x218] sm:$0xf]  ;;  %v344_v4 = vld [vmem:[%s1615_s5 + $0x220] sm:$0xf] }
  0x35   : > { %273 = vst [vmem:[%s1620_s6 + $0x80] sm:$0xf] %v272_v32  ;;  %v346_v5 = vld [vmem:[%s1615_s5 + $0x228] sm:$0xf]  ;;  %v348_v6 = vld [vmem:[%s1615_s5 + $0x230] sm:$0xf] }
  0x36   : > { %275 = vst [vmem:[%s1620_s6 + $0x84] sm:$0xf] %v274_v33  ;;  %v350_v7 = vld [vmem:[%s1615_s5 + $0x238] sm:$0xf]  ;;  %v352_v8 = vld [vmem:[%s1615_s5 + $0x240] sm:$0xf] }
  0x37   : > { %277 = vst [vmem:[%s1620_s6 + $0x88] sm:$0xf] %v276_v34  ;;  %v354_v9 = vld [vmem:[%s1615_s5 + $0x248] sm:$0xf]  ;;  %v356_v10 = vld [vmem:[%s1615_s5 + $0x250] sm:$0xf] }
  0x38   : > { %279 = vst [vmem:[%s1620_s6 + $0x8c] sm:$0xf] %v278_v35  ;;  %v358_v11 = vld [vmem:[%s1615_s5 + $0x258] sm:$0xf]  ;;  %v360_v12 = vld [vmem:[%s1615_s5 + $0x260] sm:$0xf] }
  0x39   : > { %281 = vst [vmem:[%s1620_s6 + $0x90] sm:$0xf] %v280_v36  ;;  %v362_v13 = vld [vmem:[%s1615_s5 + $0x268] sm:$0xf]  ;;  %v364_v14 = vld [vmem:[%s1615_s5 + $0x270] sm:$0xf] }
  0x3a   : > { %283 = vst [vmem:[%s1620_s6 + $0x94] sm:$0xf] %v282_v37  ;;  %v366_v15 = vld [vmem:[%s1615_s5 + $0x278] sm:$0xf] }
  0x3b   : > { %285 = vst [vmem:[%s1620_s6 + $0x98] sm:$0xf] %v284_v38 }
  0x3c   : > { %287 = vst [vmem:[%s1620_s6 + $0x9c] sm:$0xf] %v286_v39 }
  0x3d   : > { %289 = vst [vmem:[%s1620_s6 + $0xa0] sm:$0xf] %v288_v40 }
  0x3e   : > { %291 = vst [vmem:[%s1620_s6 + $0xa4] sm:$0xf] %v290_v41 }
  0x3f   : > { %293 = vst [vmem:[%s1620_s6 + $0xa8] sm:$0xf] %v292_v42 }
  0x40   : > { %295 = vst [vmem:[%s1620_s6 + $0xac] sm:$0xf] %v294_v43 }
  0x41   : > { %297 = vst [vmem:[%s1620_s6 + $0xb0] sm:$0xf] %v296_v44 }
  0x42   : > { %299 = vst [vmem:[%s1620_s6 + $0xb4] sm:$0xf] %v298_v45 }
  0x43   : > { %301 = vst [vmem:[%s1620_s6 + $0xb8] sm:$0xf] %v300_v46 }
  0x44   : > { %303 = vst [vmem:[%s1620_s6 + $0xbc] sm:$0xf] %v302_v47 }
  0x45   : > { %305 = vst [vmem:[%s1620_s6 + $0xc0] sm:$0xf] %v304_v48 }
  0x46   : > { %307 = vst [vmem:[%s1620_s6 + $0xc4] sm:$0xf] %v306_v49 }
  0x47   : > { %309 = vst [vmem:[%s1620_s6 + $0xc8] sm:$0xf] %v308_v50 }
  0x48   : > { %311 = vst [vmem:[%s1620_s6 + $0xcc] sm:$0xf] %v310_v51 }
  0x49   : > { %313 = vst [vmem:[%s1620_s6 + $0xd0] sm:$0xf] %v312_v52 }
  0x4a   : > { %315 = vst [vmem:[%s1620_s6 + $0xd4] sm:$0xf] %v314_v53 }
  0x4b   : > { %317 = vst [vmem:[%s1620_s6 + $0xd8] sm:$0xf] %v316_v54 }
  0x4c   : > { %319 = vst [vmem:[%s1620_s6 + $0xdc] sm:$0xf] %v318_v55 }
  0x4d   : > { %321 = vst [vmem:[%s1620_s6 + $0xe0] sm:$0xf] %v320_v56 }
  0x4e   : > { %323 = vst [vmem:[%s1620_s6 + $0xe4] sm:$0xf] %v322_v57 }
  0x4f   : > { %325 = vst [vmem:[%s1620_s6 + $0xe8] sm:$0xf] %v324_v58 }
  0x50   : > { %327 = vst [vmem:[%s1620_s6 + $0xec] sm:$0xf] %v326_v59 }
  0x51   : > { %329 = vst [vmem:[%s1620_s6 + $0xf0] sm:$0xf] %v328_v60 }
  0x52   : > { %331 = vst [vmem:[%s1620_s6 + $0xf4] sm:$0xf] %v330_v61 }
  0x53   : > { %333 = vst [vmem:[%s1620_s6 + $0xf8] sm:$0xf] %v332_v62 }
  0x54   : > { %335 = vst [vmem:[%s1620_s6 + $0xfc] sm:$0xf] %v334_v63 }
  0x55   : > { %337 = vst [vmem:[%s1620_s6 + $0x100] sm:$0xf] %v336_v0 }
  0x56   : > { %339 = vst [vmem:[%s1620_s6 + $0x104] sm:$0xf] %v338_v1 }
  0x57   : > { %341 = vst [vmem:[%s1620_s6 + $0x108] sm:$0xf] %v340_v2 }
  0x58   : > { %343 = vst [vmem:[%s1620_s6 + $0x10c] sm:$0xf] %v342_v3 }
  0x59   : > { %345 = vst [vmem:[%s1620_s6 + $0x110] sm:$0xf] %v344_v4 }
  0x5a   : > { %347 = vst [vmem:[%s1620_s6 + $0x114] sm:$0xf] %v346_v5 }
  0x5b   : > { %349 = vst [vmem:[%s1620_s6 + $0x118] sm:$0xf] %v348_v6 }
  0x5c   : > { %351 = vst [vmem:[%s1620_s6 + $0x11c] sm:$0xf] %v350_v7 }
  0x5d   : > { %353 = vst [vmem:[%s1620_s6 + $0x120] sm:$0xf] %v352_v8 }
  0x5e   : > { %355 = vst [vmem:[%s1620_s6 + $0x124] sm:$0xf] %v354_v9 }
  0x5f   : > { %357 = vst [vmem:[%s1620_s6 + $0x128] sm:$0xf] %v356_v10 }
  0x60   : > { %359 = vst [vmem:[%s1620_s6 + $0x12c] sm:$0xf] %v358_v11 }
  0x61   : > { %361 = vst [vmem:[%s1620_s6 + $0x130] sm:$0xf] %v360_v12 }
  0x62   : > { %363 = vst [vmem:[%s1620_s6 + $0x134] sm:$0xf] %v362_v13 }
  0x63   : > { %365 = vst [vmem:[%s1620_s6 + $0x138] sm:$0xf] %v364_v14 }
  0x64   : > { %367 = vst [vmem:[%s1620_s6 + $0x13c] sm:$0xf] %v366_v15 }
  0x65 PF: > { %p1222_p8 = scmp.ge.s32.totalorder %s1540_s19, 1  ;;  %p562_p9 = scmp.lt.s32.totalorder %s1540_s19, 3 }
  0x67   : > { %p563_p10 = pnand %p1222_p8, %p562_p9 }
  0x68   : > { %s569_s7 = sand.u32 (!%p563_p10), 1, %s1524_s15   ;;  %p612_p11 = scmp.lt.s32.totalorder (!%p563_p10), %s1532_s17, 1 }
  0x69   : > { %566 = sbr.rel (%p563_p10) target bundleno = 328 (0x148), region = 73 }
  0x6a   : > { %s1459_s8 = smul.u32 (!%p563_p10), 320, %s569_s7 }
  0x6c   : > { %s1784_s9 = scalar_lea.vmem (!%p563_p10), [#allocation2], %s1459_s8 }
  0x6e   : > { %v1420_v16 = vld [vmem:[%s1784_s9 + $0x38] sm:$0xff]  ;;  %v1419_v20 = vld [vmem:[%s1784_s9 + $0x30] sm:$0xff]  ;;  %v1418_v24 = vld [vmem:[%s1784_s9 + $0x28] sm:$0xff]  ;;  %s1850_s10 = scalar_select %p612_p11, %s1532_s17, 1 }
  0x6f   : > { %v1436_v17 = vld [vmem:[%s1784_s9 + $0xb8] sm:$0xff]  ;;  %971 = vmatpush.bf16.msra.mxu0 %v1420_v16  ;;  %v1435_v21 = vld [vmem:[%s1784_s9 + $0xb0] sm:$0xff]  ;;  %v1434_v25 = vld [vmem:[%s1784_s9 + $0xa8] sm:$0xff]  ;;  %s1405_s30 = sshll.u32 (%p1602_p6), %s1532_s17, 2 }
  0x70   : > { %v1444_v18 = vld [vmem:[%s1784_s9 + $0xf8] sm:$0xff]  ;;  %999 = vmatpush.bf16.msra.mxu2 %v1436_v17  ;;  %v1443_v22 = vld [vmem:[%s1784_s9 + $0xf0] sm:$0xff]  ;;  %v1442_v26 = vld [vmem:[%s1784_s9 + $0xe8] sm:$0xff]  ;;  %s614_s13 = scalar_lea.vmem %s1893_s2, %s1850_s10  ;;  %s617_s22 = scalar_lea.vmem %s1894_s3, %s1850_s10 }
  0x71   : > { %v1428_v19 = vld [vmem:[%s1784_s9 + $0x78] sm:$0xff]  ;;  %1013 = vmatpush.bf16.msra.mxu3 %v1444_v18  ;;  %v1427_v23 = vld [vmem:[%s1784_s9 + $0x70] sm:$0xff]  ;;  %v1426_v27 = vld [vmem:[%s1784_s9 + $0x68] sm:$0xff]  ;;  %s1070_s8 = scalar_lea.vmem (%p1602_p6), %s1895_s4, %s1405_s30 }
  0x72   : > { %985 = vmatpush.bf16.msra.mxu1 %v1428_v19  ;;  %v1417_v28 = vld [vmem:[%s1784_s9 + $0x20] sm:$0xff]  ;;  %v1416_v32 = vld [vmem:[%s1784_s9 + $0x18] sm:$0xff]  ;;  %v1415_v36 = vld [vmem:[%s1784_s9 + $0x10] sm:$0xff] }
  0x73   : > { %972 = vmatpush.bf16.msra.mxu0 %v1419_v20  ;;  %v1433_v29 = vld [vmem:[%s1784_s9 + $0xa0] sm:$0xff]  ;;  %v1432_v33 = vld [vmem:[%s1784_s9 + $0x98] sm:$0xff]  ;;  %v1431_v37 = vld [vmem:[%s1784_s9 + $0x90] sm:$0xff] }
  0x74   : > { %1000 = vmatpush.bf16.msra.mxu2 %v1435_v21  ;;  %v1441_v30 = vld [vmem:[%s1784_s9 + $0xe0] sm:$0xff]  ;;  %v1440_v34 = vld [vmem:[%s1784_s9 + $0xd8] sm:$0xff]  ;;  %v1439_v38 = vld [vmem:[%s1784_s9 + $0xd0] sm:$0xff] }
  0x75   : > { %1014 = vmatpush.bf16.msra.mxu3 %v1443_v22  ;;  %v1425_v31 = vld [vmem:[%s1784_s9 + $0x60] sm:$0xff]  ;;  %v1424_v35 = vld [vmem:[%s1784_s9 + $0x58] sm:$0xff]  ;;  %v1423_v39 = vld [vmem:[%s1784_s9 + $0x50] sm:$0xff] }
  0x76   : > { %986 = vmatpush.bf16.msra.mxu1 %v1427_v23  ;;  %v1414_v40 = vld [vmem:[%s1784_s9 + $0x8] sm:$0xff]  ;;  %v1413_v45 = vld [vmem:[%s1784_s9] sm:$0xff]  ;;  %v1411_v47 = vld [vmem:[%s1891_s0 + $0x18] sm:$0xf0] }
  0x77   : > { %973 = vmatpush.bf16.msra.mxu0 %v1418_v24  ;;  %v1430_v41 = vld [vmem:[%s1784_s9 + $0x88] sm:$0xff]  ;;  %v1429_v46 = vld [vmem:[%s1784_s9 + $0x80] sm:$0xff]  ;;  %v1452_v48 = vld [vmem:[%s1784_s9 + $0x138] sm:$0xff] }
  0x78   : > { %1001 = vmatpush.bf16.msra.mxu2 %v1434_v25  ;;  %v1438_v42 = vld [vmem:[%s1784_s9 + $0xc8] sm:$0xff]  ;;  %v1226_v49 = vld [vmem:[%s1891_s0] sm:$0xf]  ;;  %v1410_v50 = vld [vmem:[%s1891_s0 + $0x10] sm:$0xf0] }
  0x79   : > { %1015 = vmatpush.bf16.msra.mxu3 %v1442_v26  ;;  %v1422_v43 = vld [vmem:[%s1784_s9 + $0x48] sm:$0xff]  ;;  %v1437_v51 = vld [vmem:[%s1784_s9 + $0xc0] sm:$0xff]  ;;  %v1228_v56 = vld [vmem:[%s1891_s0 + $0x14] sm:$0xf0]  ;;  %v1227_v58 = vor.u32 %v1410_v50, %v1226_v49 }
  0x7a   : > { %987 = vmatpush.bf16.msra.mxu1 %v1426_v27  ;;  %v1234_v44 = vld [vmem:[%s1891_s0 + $0x8] sm:$0xf]  ;;  %v1409_v52 = vld [vmem:[%s1891_s0 + $0xc] sm:$0xf]  ;;  %v1236_v53 = vld [vmem:[%s1891_s0 + $0x1c] sm:$0xf0] }
  0x7b   : > { %974 = vmatpush.bf16.msra.mxu0 %v1417_v28  ;;  %v1421_v54 = vld [vmem:[%s1784_s9 + $0x40] sm:$0xff]  ;;  %v1235_v57 = vor.u32 %v1411_v47, %v1234_v44  ;;  %v1239_v59 = vor.u32 %v1409_v52, %v1236_v53  ;;  %v1451_v60 = vld [vmem:[%s1784_s9 + $0x130] sm:$0xff]  ;;  %v1450_v62 = vld [vmem:[%s1784_s9 + $0x128] sm:$0xff] }
  0x7c   : > { %1002 = vmatpush.bf16.msra.mxu2 %v1433_v29  ;;  %v1408_v55 = vld [vmem:[%s1891_s0 + $0x4] sm:$0xf]  ;;  %v1448_v0 = vld [vmem:[%s1784_s9 + $0x118] sm:$0xff]  ;;  %v1447_v1 = vld [vmem:[%s1784_s9 + $0x110] sm:$0xff] }
  0x7d   : > { %1016 = vmatpush.bf16.msra.mxu3 %v1441_v30  ;;  %v1231_v61 = vor.u32 %v1408_v55, %v1228_v56  ;;  %v1449_v63 = vld [vmem:[%s1784_s9 + $0x120] sm:$0xff]  ;;  %v1446_v2 = vld [vmem:[%s1784_s9 + $0x108] sm:$0xff]  ;;  %v1242_v4 = vld [vmem:[%s1891_s0 + $0x10] sm:$0xf] }
  0x7e   : > { %988 = vmatpush.bf16.msra.mxu1 %v1425_v31  ;;  %v1445_v3 = vld [vmem:[%s1784_s9 + $0x100] sm:$0xff]  ;;  %s1223_s9 = sshll.u32 %s569_s7, 3 }
  0x7f   : > { %975 = vmatpush.bf16.msra.mxu0 %v1416_v32  ;;  %v1412_v5 = vld [vmem:[%s1891_s0 + $0x20] sm:$0xf0]  ;;  %v1500_v21 = vld [vmem:[%s614_s13] ss:$0 sm:$0xff]  ;;  %s604_s29 = scalar_lea.vmem [#allocation3], %s1223_s9 }
  0x80   : > { %1003 = vmatpush.bf16.msra.mxu2 %v1432_v33  ;;  %v1243_v6 = vor.u32 %v1412_v5, %v1242_v4  ;;  %v1501_v25 = vld [vmem:[%s617_s22] ss:$0 sm:$0xff] }
  0x81   : > { %1017 = vmatpush.bf16.msra.mxu3 %v1440_v34 }
  0x82   : > { %989 = vmatpush.bf16.msra.mxu1 %v1424_v35 }
  0x83   : > { %976 = vmatpush.bf16.msra.mxu0 %v1415_v36 }
  0x84   : > { %1004 = vmatpush.bf16.msra.mxu2 %v1431_v37 }
  0x85   : > { %1018 = vmatpush.bf16.msra.mxu3 %v1439_v38 }
  0x86   : > { %990 = vmatpush.bf16.msra.mxu1 %v1423_v39 }
  0x87   : > { %977 = vmatpush.bf16.msra.mxu0 %v1414_v40 }
  0x88   : > { %1005 = vmatpush.bf16.msra.mxu2 %v1430_v41 }
  0x89   : > { %1019 = vmatpush.bf16.msra.mxu3 %v1438_v42 }
  0x8a   : > { %991 = vmatpush.bf16.msra.mxu1 %v1422_v43 }
  0x8b   : > { %978 = vmatpush.bf16.msra.mxu0 %v1413_v45 }
  0x8c   : > { %1006 = vmatpush.bf16.msra.mxu2 %v1429_v46 }
  0x8d   : > { %1020 = vmatpush.bf16.msra.mxu3 %v1437_v51 }
  0x8e   : > { %992 = vmatpush.bf16.msra.mxu1 %v1421_v54  ;;  %979 = vmatmul.bf16.vlgmr.msra.gmra.mxu0 %v1227_v58 }
  0x8f   : > { %1027 = vmatpush.bf16.msrb.mxu0 %v1452_v48  ;;  %1007 = vmatmul.bf16.vlgmr.msra.gmra.mxu2 %v1235_v57 }
  0x90   : > { %1021 = vmatmul.bf16.vlgmr.msra.gmra.mxu3 %v1239_v59 }
  0x91   : > { %993 = vmatmul.bf16.vlgmr.msra.gmra.mxu1 %v1231_v61 }
  0x93   : > { %1028 = vmatpush.bf16.msrb.mxu0 %v1451_v60 }
  0x97   : > { %1029 = vmatpush.bf16.msrb.mxu0 %v1450_v62 }
  0x9b   : > { %1030 = vmatpush.bf16.msrb.mxu0 %v1449_v63 }
  0x9f   : > { %1031 = vmatpush.bf16.msrb.mxu0 %v1448_v0 }
  0xa3   : > { %1032 = vmatpush.bf16.msrb.mxu0 %v1447_v1 }
  0xa7   : > { %1033 = vmatpush.bf16.msrb.mxu0 %v1446_v2 }
  0xab   : > { %1034 = vmatpush.bf16.msrb.mxu0 %v1445_v3 }
  0xae   : > { %1035 = vmatmul.bf16.vlgmr.msrb.gmra.mxu0 %v1243_v6 }
 0x10b   : > { %v980_v7 = vpop.f32.mrf.mxu0 }
 0x10e   : > { %v994_v8 = vpop.f32.mrf.mxu1 }
 0x10f   : > { %v995_v11 = vadd.f32 %v994_v8, %v980_v7 }
 0x112   : > { %v1008_v9 = vpop.f32.mrf.mxu2 }
 0x113   : > { %v982_v10 = vpop.f32.mrf.mxu0  ;;  %v1022_v12 = vpop.f32.mrf.mxu3  ;;  %v1009_v14 = vadd.f32 %v1008_v9, %v995_v11 }
 0x115   : > { %v1023_v18 = vadd.f32 %v1022_v12, %v1009_v14 }
 0x116   : > { %v996_v13 = vpop.f32.mrf.mxu1 }
 0x117   : > { %v997_v15 = vadd.f32 %v996_v13, %v982_v10 }
 0x11a   : > { %v1010_v16 = vpop.f32.mrf.mxu2 }
 0x11b   : > { %v1011_v19 = vadd.f32 %v1010_v16, %v997_v15  ;;  %v1024_v22 = vpop.f32.mrf.mxu3 }
 0x11d   : > { %v1025_v23 = vadd.f32 %v1024_v22, %v1011_v19 }
 0x12b   : > { %v1036_v17 = vpop.f32.mrf.mxu0 }
 0x12c   : > { %v1037_v20 = vadd.f32 %v1036_v17, %v1023_v18 }
 0x12e   : > { %v1045_v24 = vmul.f32 %v1500_v21, %v1037_v20 }
 0x130   : > { %v1051_v28 = vadd.f32 %v1501_v25, %v1045_v24 }
 0x132   : > { %v1053_v31 = vmax.f32 %v1051_v28, 0.0 }
 0x133   : > { %v1038_v26 = vpop.f32.mrf.mxu0 }
 0x134   : > { %v1039_v27 = vadd.f32 %v1038_v26, %v1025_v23 }
 0x136   : > { %v1046_v29 = vmul.f32 %v1500_v21, %v1039_v27 }
 0x138   : > { %v1052_v30 = vadd.f32 %v1501_v25, %v1046_v29 }
 0x13a   : > { %v1054_v32 = vmax.f32 %v1052_v30, 0.0  ;;  %1065 = sbr.rel (!%p1602_p6) target bundleno = 328 (0x148), region = 81 }
 0x13c   : > { %v1456_v33 = vpack.c.bf16 %v1054_v32, %v1053_v31 }
 0x13e   : > { %1457 = vst [vmem:[%s604_s29] sm:$0xff] %v1456_v33  }
 0x145   : > { %v1087_v34 = vld [vmem:[%s604_s29] sm:$0xf]  ;;  %v1089_v35 = vld [vmem:[%s604_s29 + $0x4] sm:$0xf] }
 0x146   : > { %1088 = vst [vmem:[%s1070_s8] sm:$0xf] %v1087_v34 }
 0x147   : > { %1090 = vst [vmem:[%s1070_s8 + $0x8] sm:$0xf] %v1089_v35 }
 0x148 PF: > { %s14_s19 = sadd.s32 1, %s1540_s19   ;;  %s1897_s15 = smov %s1528_s16 }
 0x149   : > { %p11_p12 = scmp.ge.s32.totalorder %s14_s19, 4   ;;  %s1898_s16 = smov %s1607_s25 }
 0x14a   : > { %s1899_s17 = smov %s1536_s18  ;;  %s1900_s18 = smov %s1902_s20 }
 0x14b   :  { %13 = sbr.rel (!%p11_p12) target bundleno = 3 (0x3), region = 162 }

// kernel: _lambda_.42
= control target key start
LH: loop header
LB: loop body
LE: loop exit
PB: predicated region body
PF: predicated region fallthrough
CT: control target
= control target key end

     0   :  { %s737_s1 = inlined_call_operand.vmem [shape: bf16[512,128], index: 1, kind: input, shape index: {}]   ;;  %s738_s0 = inlined_call_operand.vmem [shape: bf16[16,512], index: 0, kind: input, shape index: {}]   ;;  %s739_s2 = inlined_call_operand.vmem [shape: f32[1,128], index: 2, kind: input, shape index: {}]   ;;  %s740_s3 = inlined_call_operand.vmem [shape: f32[1,128], index: 3, kind: input, shape index: {}]   ;;  %s741_s4 = inlined_call_operand.vmem [shape: bf16[16,128], index: 4, kind: input, shape index: {}]   ;;  %s742_s5 = inlined_call_operand.vmem [shape: bf16[16,128], index: 5, kind: output, shape index: {}]  }
   0x1   :  { %v539_v0 = vld [vmem:[%s737_s1 + $0x38] sm:$0xff]  ;;  %v538_v4 = vld [vmem:[%s737_s1 + $0x30] sm:$0xff]  ;;  %v537_v8 = vld [vmem:[%s737_s1 + $0x28] sm:$0xff] }
   0x2   :  { %v547_v1 = vld [vmem:[%s737_s1 + $0x78] sm:$0xff]  ;;  %300 = vmatpush.bf16.msra.mxu0 %v539_v0  ;;  %v546_v5 = vld [vmem:[%s737_s1 + $0x70] sm:$0xff]  ;;  %v545_v9 = vld [vmem:[%s737_s1 + $0x68] sm:$0xff] }
   0x3   :  { %v555_v2 = vld [vmem:[%s737_s1 + $0xb8] sm:$0xff]  ;;  %314 = vmatpush.bf16.msra.mxu1 %v547_v1  ;;  %v554_v6 = vld [vmem:[%s737_s1 + $0xb0] sm:$0xff]  ;;  %v553_v10 = vld [vmem:[%s737_s1 + $0xa8] sm:$0xff] }
   0x4   :  { %v563_v3 = vld [vmem:[%s737_s1 + $0xf8] sm:$0xff]  ;;  %328 = vmatpush.bf16.msra.mxu2 %v555_v2  ;;  %v562_v7 = vld [vmem:[%s737_s1 + $0xf0] sm:$0xff]  ;;  %v561_v11 = vld [vmem:[%s737_s1 + $0xe8] sm:$0xff] }
   0x5   :  { %342 = vmatpush.bf16.msra.mxu3 %v563_v3  ;;  %v536_v12 = vld [vmem:[%s737_s1 + $0x20] sm:$0xff]  ;;  %v535_v16 = vld [vmem:[%s737_s1 + $0x18] sm:$0xff]  ;;  %v534_v20 = vld [vmem:[%s737_s1 + $0x10] sm:$0xff] }
   0x6   :  { %301 = vmatpush.bf16.msra.mxu0 %v538_v4  ;;  %v544_v13 = vld [vmem:[%s737_s1 + $0x60] sm:$0xff]  ;;  %v543_v17 = vld [vmem:[%s737_s1 + $0x58] sm:$0xff]  ;;  %v542_v21 = vld [vmem:[%s737_s1 + $0x50] sm:$0xff] }
   0x7   :  { %315 = vmatpush.bf16.msra.mxu1 %v546_v5  ;;  %v552_v14 = vld [vmem:[%s737_s1 + $0xa0] sm:$0xff]  ;;  %v551_v18 = vld [vmem:[%s737_s1 + $0x98] sm:$0xff]  ;;  %v550_v22 = vld [vmem:[%s737_s1 + $0x90] sm:$0xff] }
   0x8   :  { %329 = vmatpush.bf16.msra.mxu2 %v554_v6  ;;  %v560_v15 = vld [vmem:[%s737_s1 + $0xe0] sm:$0xff]  ;;  %v559_v19 = vld [vmem:[%s737_s1 + $0xd8] sm:$0xff]  ;;  %v558_v23 = vld [vmem:[%s737_s1 + $0xd0] sm:$0xff] }
   0x9   :  { %343 = vmatpush.bf16.msra.mxu3 %v562_v7  ;;  %v533_v24 = vld [vmem:[%s737_s1 + $0x8] sm:$0xff]  ;;  %v532_v28 = vld [vmem:[%s737_s1] sm:$0xff]  ;;  %v530_v33 = vld [vmem:[%s738_s0 + $0xc] sm:$0xf0] }
   0xa   :  { %302 = vmatpush.bf16.msra.mxu0 %v537_v8  ;;  %v541_v25 = vld [vmem:[%s737_s1 + $0x48] sm:$0xff]  ;;  %v540_v29 = vld [vmem:[%s737_s1 + $0x40] sm:$0xff]  ;;  %v388_v35 = vld [vmem:[%s738_s0 + $0x10] sm:$0xf0] }
   0xb   :  { %316 = vmatpush.bf16.msra.mxu1 %v545_v9  ;;  %v549_v26 = vld [vmem:[%s737_s1 + $0x88] sm:$0xff]  ;;  %v548_v30 = vld [vmem:[%s737_s1 + $0x80] sm:$0xff]  ;;  %v531_v37 = vld [vmem:[%s738_s0 + $0x14] sm:$0xf0] }
   0xc   :  { %330 = vmatpush.bf16.msra.mxu2 %v553_v10  ;;  %v557_v27 = vld [vmem:[%s737_s1 + $0xc8] sm:$0xff]  ;;  %v556_v31 = vld [vmem:[%s737_s1 + $0xc0] sm:$0xff]  ;;  %v396_v39 = vld [vmem:[%s738_s0 + $0x18] sm:$0xf0] }
   0xd   :  { %344 = vmatpush.bf16.msra.mxu3 %v561_v11  ;;  %v386_v32 = vld [vmem:[%s738_s0] sm:$0xf]  ;;  %v528_v34 = vld [vmem:[%s738_s0 + $0x4] sm:$0xf]  ;;  %v394_v36 = vld [vmem:[%s738_s0 + $0x8] sm:$0xf] }
   0xe   :  { %303 = vmatpush.bf16.msra.mxu0 %v536_v12  ;;  %v529_v38 = vld [vmem:[%s738_s0 + $0xc] sm:$0xf]  ;;  %v387_v40 = vor.u32 %v530_v33, %v386_v32  ;;  %v391_v41 = vor.u32 %v528_v34, %v388_v35  ;;  %v395_v42 = vor.u32 %v531_v37, %v394_v36  ;;  %v573_v51 = vld [vmem:[%s739_s2] ss:$0 sm:$0xff] }
   0xf   :  { %317 = vmatpush.bf16.msra.mxu1 %v544_v13  ;;  %v399_v43 = vor.u32 %v529_v38, %v396_v39  ;;  %v574_v55 = vld [vmem:[%s740_s3] ss:$0 sm:$0xff] }
  0x10   :  { %331 = vmatpush.bf16.msra.mxu2 %v552_v14  ;;  %v565_v57 = vld [vmem:[%s741_s4] sm:$0xff]  }
  0x11   :  { %345 = vmatpush.bf16.msra.mxu3 %v560_v15  ;;  %v566_v62 = vunpack.c.l.bf16 %v565_v57  ;;  %v567_v1 = vunpack.c.h.bf16 %v565_v57 }
  0x12   :  { %304 = vmatpush.bf16.msra.mxu0 %v535_v16 }
  0x13   :  { %318 = vmatpush.bf16.msra.mxu1 %v543_v17 }
  0x14   :  { %332 = vmatpush.bf16.msra.mxu2 %v551_v18 }
  0x15   :  { %346 = vmatpush.bf16.msra.mxu3 %v559_v19 }
  0x16   :  { %305 = vmatpush.bf16.msra.mxu0 %v534_v20 }
  0x17   :  { %319 = vmatpush.bf16.msra.mxu1 %v542_v21 }
  0x18   :  { %333 = vmatpush.bf16.msra.mxu2 %v550_v22 }
  0x19   :  { %347 = vmatpush.bf16.msra.mxu3 %v558_v23 }
  0x1a   :  { %306 = vmatpush.bf16.msra.mxu0 %v533_v24 }
  0x1b   :  { %320 = vmatpush.bf16.msra.mxu1 %v541_v25 }
  0x1c   :  { %334 = vmatpush.bf16.msra.mxu2 %v549_v26 }
  0x1d   :  { %348 = vmatpush.bf16.msra.mxu3 %v557_v27 }
  0x1e   :  { %307 = vmatpush.bf16.msra.mxu0 %v532_v28 }
  0x1f   :  { %321 = vmatpush.bf16.msra.mxu1 %v540_v29 }
  0x20   :  { %335 = vmatpush.bf16.msra.mxu2 %v548_v30 }
  0x21   :  { %349 = vmatpush.bf16.msra.mxu3 %v556_v31  ;;  %308 = vmatmul.bf16.vlgmr.msra.gmra.mxu0 %v387_v40 }
  0x22   :  { %322 = vmatmul.bf16.vlgmr.msra.gmra.mxu1 %v391_v41 }
  0x23   :  { %336 = vmatmul.bf16.vlgmr.msra.gmra.mxu2 %v395_v42 }
  0x24   :  { %350 = vmatmul.bf16.vlgmr.msra.gmra.mxu3 %v399_v43 }
  0x9e   :  { %v309_v44 = vpop.f32.mrf.mxu0 }
  0x9f   :  { %v323_v45 = vpop.f32.mrf.mxu1 }
  0xa0   :  { %v324_v46 = vadd.f32 %v323_v45, %v309_v44 }
  0xa6   :  { %v337_v47 = vpop.f32.mrf.mxu2  ;;  %v311_v52 = vpop.f32.mrf.mxu0 }
  0xa7   :  { %v351_v48 = vpop.f32.mrf.mxu3  ;;  %v338_v49 = vadd.f32 %v337_v47, %v324_v46  ;;  %v325_v53 = vpop.f32.mrf.mxu1 }
  0xa8   :  { %v326_v56 = vadd.f32 %v325_v53, %v311_v52 }
  0xa9   :  { %v352_v50 = vadd.f32 %v351_v48, %v338_v49 }
  0xab   :  { %v360_v54 = vmul.f32 %v573_v51, %v352_v50 }
  0xad   :  { %v366_v61 = vadd.f32 %v574_v55, %v360_v54 }
  0xae   :  { %v339_v58 = vpop.f32.mrf.mxu2 }
  0xaf   :  { %v340_v59 = vadd.f32 %v339_v58, %v326_v56  ;;  %v353_v60 = vpop.f32.mrf.mxu3  ;;  %v372_v2 = vadd.f32 %v566_v62, %v366_v61 }
  0xb1   :  { %v354_v63 = vadd.f32 %v353_v60, %v340_v59  ;;  %v374_v5 = vmax.f32 %v372_v2, 0.0 }
  0xb3   :  { %v361_v0 = vmul.f32 %v573_v51, %v354_v63 }
  0xb5   :  { %v367_v3 = vadd.f32 %v574_v55, %v361_v0 }
  0xb7   :  { %v373_v4 = vadd.f32 %v567_v1, %v367_v3 }
  0xb9   :  { %v375_v6 = vmax.f32 %v373_v4, 0.0 }
  0xbb   :  { %v571_v7 = vpack.c.bf16 %v375_v6, %v374_v5 }
  0xbd   :  { %572 = vst [vmem:[%s742_s5] sm:$0xff] %v571_v7  }

</bundles_post_ra>
